<compile_context>
chip_gen: v7x
topology: tpu7x:2x2x1
jax: 0.10.0
libtpu: 0.0.40
codegen_flags: <defaults>
</compile_context>

<pallas_src>
import math
import jax
import jax.numpy as jnp
from jax import lax
from jax.experimental import pallas as pl
from jax.experimental.pallas import tpu as pltpu


# ----------------------------------------------------------------------------
# In-kernel BiLSTM helper (shared by the fused forward kernel and sg kernel)
# ----------------------------------------------------------------------------

def _run_bilstm(x, wih_ref, whh_ref, b_ref, gx_ref,
                seq_scr_ref=None, seq_out_ref=None, span=None):
    """Single-layer bidirectional LSTM, fwd/bwd interleaved in one recurrence.

    x:        [T, D]      input sequence (value)
    wih_ref:  [D, 8*H2]   dense packed input->gate weights, gate order
                          [i|f|o|g], each group = [fwd H2 | bwd H2] lanes
    whh_ref:  [2*H2, 8*H2] block-diagonal packed hidden->gate weights
                          (half zeros; acceptable at small H2 — see review)
    b_ref:    [1, 8*H2]   packed biases (b_ih + b_hh per direction)
    gx_ref:   [T, 8*H2]   VMEM scratch for the hoisted input projection
    seq_scr_ref/[T,2*H2]  optional: per-step packed hidden scratch
    seq_out_ref [T,2*H2]  optional: time-ordered packed sequence output
    span:     optional (start, end) scalars -> on-the-fly span-sum of the
              time-ordered hidden sequence (returned as `acc`)

    Returns (h_last [1, 2*H2], acc [1, 2*H2] or None).
    """
    T = x.shape[0]
    G = whh_ref.shape[0]          # 2 * H2 == hidden_size (packed fwd|bwd)
    H2 = G // 2
    W = 4 * G                     # packed gate width

    # Hoisted input->gate projection: ONE dense MXU matmul for all steps and
    # both directions (no zero-padded K, no wrapper-side reverse/concat).
    gx_ref[...] = (jnp.dot(x, wih_ref[...], preferred_element_type=jnp.float32)
                   + b_ref[...])

    lane_w = lax.broadcasted_iota(jnp.int32, (1, W), 1)
    is_bwd_gate = (lane_w % G) >= H2                 # bwd lanes of each gate grp
    lane_g = lax.broadcasted_iota(jnp.int32, (1, G), 1)
    is_bwd_h = lane_g >= H2
    fwd_mask = (lane_g < H2).astype(jnp.float32)     # [1, G]
    bwd_mask = 1.0 - fwd_mask

    whh = whh_ref[...]
    h = jnp.zeros((1, G), jnp.float32)
    c = jnp.zeros((1, G), jnp.float32)
    acc = jnp.zeros((1, G), jnp.float32) if span is not None else None

    # T is small/static -> fully unrolled recurrence with static slices.
    for s in range(T):
        # fwd lanes read projection row s, bwd lanes read row T-1-s.  The two
        # loads + select do not depend on the carry -> off the critical chain.
        row_f = gx_ref[s:s + 1, :]
        row_b = gx_ref[T - 1 - s:T - s, :]
        gates = jnp.where(is_bwd_gate, row_b, row_f) + jnp.dot(
            h, whh, preferred_element_type=jnp.float32)     # [1, 4*G]
        # gate order [i|f|o|g]: one sigmoid over 3*G lanes, one tanh over G.
        sig = jax.nn.sigmoid(gates[:, 0:3 * G])
        i = sig[:, 0:G]
        f = sig[:, G:2 * G]
        o = sig[:, 2 * G:3 * G]
        g = jnp.tanh(gates[:, 3 * G:4 * G])
        c = f * c + i * g
        h = o * jnp.tanh(c)
        if seq_scr_ref is not None:
            seq_scr_ref[s:s + 1, :] = h        # single full-width store / step
        if span is not None:
            start, end = span
            in_f = ((s >= start) & (s < end)).astype(jnp.float32)
            tb = T - 1 - s                     # bwd hidden is time T-1-s
            in_b = ((tb >= start) & (tb < end)).astype(jnp.float32)
            acc = acc + h * (in_f * fwd_mask + in_b * bwd_mask)

    if seq_out_ref is not None:
        # Un-reverse the bwd half once, after the loop (off the critical path).
        for t in range(T):
            row = jnp.where(is_bwd_h,
                            seq_scr_ref[T - 1 - t:T - t, :],
                            seq_scr_ref[t:t + 1, :])
            seq_out_ref[t:t + 1, :] = row

    return h, acc


# ----------------------------------------------------------------------------
# Kernels
# ----------------------------------------------------------------------------

def _forward_kernel(span_ref,                    # SMEM [2] int32: (start, end)
                    vid_ref, q_ref,              # [Tv, Dv], [Tq, Dt]
                    wih_v, whh_v, b_v,           # video encoder (packed)
                    wih_t, whh_t, b_t,           # text encoder (packed)
                    w1_ref, b1_ref, w2_ref, b2_ref,   # decoder (lane-padded)
                    vseq_ref, logits_ref,        # outputs
                    gx_v_ref, gx_q_ref, vscr_ref):    # scratch
    """Fused: video BiLSTM + question BiLSTM + span-mean + concat + decoder."""
    # Video encoder (full packed sequence output, for parity with reference).
    _run_bilstm(vid_ref[...], wih_v, whh_v, b_v, gx_v_ref,
                seq_scr_ref=vscr_ref, seq_out_ref=vseq_ref)

    # Question encoder: final hidden = question feature; span mean accumulated
    # on the fly (token features never leave vregs/VMEM).
    start = span_ref[0]
    end = span_ref[1]
    h_q, acc = _run_bilstm(q_ref[...], wih_t, whh_t, b_t, gx_q_ref,
                           span=(start, end))
    cnt = jnp.maximum(end - start, 1).astype(jnp.float32)
    hidden = acc * (1.0 / cnt)                  # torch.mean over the span

    # Decoder: cat([hidden, question_feature]) @ W1 -> ReLU -> @ W2.
    # Split W1 by rows instead of materializing the concat.
    H = hidden.shape[1]
    h1 = (jnp.dot(hidden, w1_ref[0:H, :], preferred_element_type=jnp.float32)
          + jnp.dot(h_q, w1_ref[H:2 * H, :], preferred_element_type=jnp.float32)
          + b1_ref[...])
    h1 = jnp.maximum(h1, 0.0)
    # TODO(synk): nn.Dropout in training mode not reproduced (eval identity).
    logits_ref[...] = (jnp.dot(h1, w2_ref[...], preferred_element_type=jnp.float32)
                       + b2_ref[...])


def _sg_encoder_kernel(x_ref, wih_ref, whh_ref, b_ref, out_ref, gx_ref):
    """One scene-graph embedding per grid step: text BiLSTM h_n + fused L2 norm."""
    h, _ = _run_bilstm(x_ref[0], wih_ref, whh_ref, b_ref, gx_ref)
    nrm2 = jnp.sum(h * h)
    # F.normalize(h_n, dim=0): divide by max(||h||, 1e-12), via rsqrt (EUP).
    out_ref[0] = h * lax.rsqrt(jnp.maximum(nrm2, 1e-24))


# ----------------------------------------------------------------------------
# Wrappers calling pallas_call
# ----------------------------------------------------------------------------

def nmn_fused_forward(params, video, question, start, end):
    """One pallas_call for the whole main path. Returns (video_seq, logits)."""
    Tv, _ = video.shape
    Tq, _ = question.shape
    pv, pt, pd = params["video_encoder"], params["text_encoder"], params["decoder"]
    G = pv["whh"].shape[0]          # hidden_size (packed fwd|bwd)
    W = 4 * G
    A = pd["A"]
    span = jnp.array([start, end], dtype=jnp.int32)

    vmem = pl.BlockSpec(memory_space=pltpu.MemorySpace.VMEM)
    smem = pl.BlockSpec(memory_space=pltpu.MemorySpace.SMEM)

    vseq, logits = pl.pallas_call(
        _forward_kernel,
        out_shape=(jax.ShapeDtypeStruct((Tv, G), jnp.float32),
                   jax.ShapeDtypeStruct((1, pd["w2"].shape[1]), jnp.float32)),
        in_specs=[smem] + [vmem] * 12,
        out_specs=(vmem, vmem),
        scratch_shapes=[pltpu.VMEM((Tv, W), jnp.float32),   # gx (video)
                        pltpu.VMEM((Tq, W), jnp.float32),   # gx (question)
                        pltpu.VMEM((Tv, G), jnp.float32)],  # video seq scratch
    )(span,
      video.astype(jnp.float32), question.astype(jnp.float32),
      pv["wih"], pv["whh"], pv["b"],
      pt["wih"], pt["whh"], pt["b"],
      pd["w1"], pd["b1"], pd["w2"], pd["b2"])
    return vseq, logits[0, :A]


def sg_encode_batch(pt, embs):
    """Batched sg re-encoding: grid over N embeddings, weights stay resident."""
    N, Te, D = embs.shape
    G = pt["whh"].shape[0]
    W = 4 * G
    out = pl.pallas_call(
        _sg_encoder_kernel,
        grid=(N,),
        out_shape=jax.ShapeDtypeStruct((N, 1, G), jnp.float32),
        in_specs=[
            pl.BlockSpec((1, Te, D), lambda n: (n, 0, 0)),
            pl.BlockSpec((D, W), lambda n: (0, 0)),     # weights: block (0,0)
            pl.BlockSpec((G, W), lambda n: (0, 0)),     # -> resident in VMEM
            pl.BlockSpec((1, W), lambda n: (0, 0)),
        ],
        out_specs=pl.BlockSpec((1, 1, G), lambda n: (n, 0, 0)),
        scratch_shapes=[pltpu.VMEM((Te, W), jnp.float32)],
        compiler_params=pltpu.CompilerParams(
            dimension_semantics=("parallel",)),          # v7x: 2 TCs split N
    )(embs.astype(jnp.float32), pt["wih"], pt["whh"], pt["b"])
    return out[:, 0, :]


# ----------------------------------------------------------------------------
# Parameter construction (PyTorch default-style init) + packing
# ----------------------------------------------------------------------------

def _round_up(x, m):
    return ((x + m - 1) // m) * m


def _uniform(key, shape, k):
    return jax.random.uniform(key, shape, jnp.float32, minval=-k, maxval=k)


_GATE_ORDER = (0, 1, 3, 2)      # torch gate order [i, f, g, o] -> packed [i, f, o, g]


def _pack_bilstm(wih_f, whh_f, b_f, wih_b, whh_b, b_b, h2):
    """Pack torch-layout per-direction weights into the kernel layout.

    Gate-axis layout (width 8*h2): [i_f|i_b | f_f|f_b | o_f|o_b | g_f|g_b].
    wih is dense [D, 8*h2]; whh is block-diagonal [2*h2, 8*h2] (h_fwd feeds
    fwd lanes, h_bwd feeds bwd lanes).
    """
    def blk(w, k):   # torch [4*h2, in] -> [in, h2] for gate k
        return w[k * h2:(k + 1) * h2, :].T

    wih = jnp.concatenate(
        [jnp.concatenate([blk(wih_f, k), blk(wih_b, k)], axis=1)
         for k in _GATE_ORDER], axis=1)                           # [D, 8*h2]

    zh = jnp.zeros((h2, h2), jnp.float32)
    whh = jnp.concatenate(
        [jnp.concatenate(
            [jnp.concatenate([blk(whh_f, k), zh], axis=1),
             jnp.concatenate([zh, blk(whh_b, k)], axis=1)], axis=0)
         for k in _GATE_ORDER], axis=1)                           # [2*h2, 8*h2]

    b = jnp.concatenate(
        [jnp.concatenate([b_f[k * h2:(k + 1) * h2], b_b[k * h2:(k + 1) * h2]])
         for k in _GATE_ORDER])[None, :]                          # [1, 8*h2]

    return {"wih": wih, "whh": whh, "b": b}


def init_lstm_params(key, input_size, h2):
    k = 1.0 / math.sqrt(h2)
    ks = jax.random.split(key, 8)
    wih_f = _uniform(ks[0], (4 * h2, input_size), k)   # torch layout [4*H2, D]
    whh_f = _uniform(ks[1], (4 * h2, h2), k)
    bih_f = _uniform(ks[2], (4 * h2,), k)
    bhh_f = _uniform(ks[3], (4 * h2,), k)
    wih_b = _uniform(ks[4], (4 * h2, input_size), k)
    whh_b = _uniform(ks[5], (4 * h2, h2), k)
    bih_b = _uniform(ks[6], (4 * h2,), k)
    bhh_b = _uniform(ks[7], (4 * h2,), k)
    return _pack_bilstm(wih_f, whh_f, bih_f + bhh_f,
                        wih_b, whh_b, bih_b + bhh_b, h2)


def init_decoder_params(key, hidden_size, answer_vocab):
    d = hidden_size * 2
    p_mid = max(128, _round_up(d, 128))           # lane-pad intermediates
    p_out = max(128, _round_up(answer_vocab, 128))
    k1 = 1.0 / math.sqrt(d)
    ks = jax.random.split(key, 4)
    w1 = _uniform(ks[0], (d, d), k1)              # torch Linear weight [out, in]
    b1 = _uniform(ks[1], (d,), k1)
    w2 = _uniform(ks[2], (answer_vocab, d), k1)
    b2 = _uniform(ks[3], (answer_vocab,), k1)
    w1p = jnp.zeros((d, p_mid), jnp.float32).at[:, :d].set(w1.T)
    b1p = jnp.zeros((1, p_mid), jnp.float32).at[:, :d].set(b1)
    w2p = jnp.zeros((p_mid, p_out), jnp.float32).at[:d, :answer_vocab].set(w2.T)
    b2p = jnp.zeros((1, p_out), jnp.float32).at[:, :answer_vocab].set(b2)
    return {"w1": w1p, "b1": b1p, "w2": w2p, "b2": b2p, "A": answer_vocab}


def init_params(key, config):
    # TODO(synk): weights could be stored bf16 on v6e/v7x (MXU-native, f32 acc);
    #             kept f32 here for v5e VPU/EUP compatibility and simplicity.
    h2 = config["hidden_size"] // 2
    k_v, k_t, k_d = jax.random.split(key, 3)
    return {
        "video_encoder": init_lstm_params(k_v, config["video_size"], h2),
        "text_encoder": init_lstm_params(k_t, config["text_size"], h2),
        "decoder": init_decoder_params(k_d, config["hidden_size"],
                                       config["answer_vocab_length"]),
    }


# ----------------------------------------------------------------------------
# VideoNMN forward (program interpreter + Pallas compute)
# ----------------------------------------------------------------------------

WORDS_TO_KEEP = {"min", "max"} | {"actions", "objects", "relations"}
SUBMODULE_NAMES = set()   # NAME_TO_MODULE is undefined in the reference source


def _reencode_sg(params, value):
    """Batch all sg embeddings of the same length into one gridded call."""
    # TODO(synk): fully ragged lengths could use PrefetchScalarGridSpec with
    #             padded sequences + per-row lengths; here we batch per length.
    by_len = {}
    for j, (_, emb) in enumerate(value):
        by_len.setdefault(int(emb.shape[0]), []).append(j)
    out = [None] * len(value)
    for _, idxs in by_len.items():
        embs = jnp.stack([lax.stop_gradient(value[j][1]) for j in idxs], axis=0)
        normed = sg_encode_batch(params["text_encoder"], embs)
        for pos, j in enumerate(idxs):
            out[j] = (value[j][0], normed[pos])
    return out


def video_nmn_forward(params, data, test_mode=False):
    question = data["question"]
    video_feat = data["video_features"]
    spans = data["prog_str_to_question_tokens"]
    program_list = data["nmn_program_list"]

    # Program interpretation (pure Python in the supported keyword/span path).
    stack = []
    for i in range(len(program_list) - 1, -1, -1):
        prog = program_list[i]
        if prog in SUBMODULE_NAMES:
            # TODO(synk): neural-module programs unavailable (NAME_TO_MODULE undefined).
            raise NotImplementedError(prog)
        elif prog in WORDS_TO_KEEP:
            stack.append(prog)
        else:
            start_token, end_token = spans[i]
            stack.append(("__span__", int(start_token), int(end_token)))
    assert len(stack) == 1
    hidden = stack[0]
    if not (isinstance(hidden, tuple) and hidden[0] == "__span__"):
        raise NotImplementedError(
            "final program result must be a token span in the supported subset")

    # ONE fused pallas_call: video BiLSTM + question BiLSTM + span-mean +
    # concat + decoder MLP (intermediates stay in VMEM).
    video_enc, logits = nmn_fused_forward(params, video_feat, question,
                                          hidden[1], hidden[2])
    del video_enc  # computed for parity with the reference; unused by span path

    # Scene-graph embeddings: one gridded pallas_call (per distinct length).
    new_sg_res_by_step = dict()
    for key, value in data.get("sg_res_by_step", {}).items():
        if isinstance(value, list) and len(value) and hasattr(value[0][1], "shape"):
            new_sg_res_by_step[key] = _reencode_sg(params, value)
        else:
            new_sg_res_by_step[key] = value

    ret = {"logits": logits, "res_by_step": dict()}
    if not test_mode:
        ret["sg_res_by_step"] = new_sg_res_by_step
    return ret


# ----------------------------------------------------------------------------
# Main
# ----------------------------------------------------------------------------

if __name__ == "__main__":
    config = {
        "video_size": 32,
        "text_size": 32,
        "hidden_size": 32,           # per-direction LSTM hidden = 16
        "answer_vocab_length": 24,
        "dropout": 0.1,
        "have_pretrain_head": False,
    }

    key = jax.random.PRNGKey(0)
    k_param, k_q, k_v, k_sg = jax.random.split(key, 4)

    params = init_params(k_param, config)

    Tq, Tv, Te = 8, 12, 5
    question = jax.random.normal(k_q, (Tq, config["text_size"]), jnp.float32)
    video = jax.random.normal(k_v, (Tv, config["video_size"]), jnp.float32)
    sg_keys = jax.random.split(k_sg, 3)
    sg_embs = [jax.random.normal(kk, (Te, config["text_size"]), jnp.float32)
               for kk in sg_keys]

    data = {
        "question": question,
        "video_features": video,
        # single leaf program -> falls into the token-span-mean branch
        "nmn_program_list": ["the red object"],
        "nmn_program_idx": [None],
        "prog_str_to_question_tokens": [(1, 5)],
        "sg_res_by_step": {"0": [("person", sg_embs[0]),
                                 ("table", sg_embs[1]),
                                 ("cup", sg_embs[2])]},
    }

    out = video_nmn_forward(params, data)
    logits = jax.block_until_ready(out["logits"])
    sg_list = out["sg_res_by_step"]["0"]
    jax.block_until_ready(sg_list[0][1])

    assert logits.shape == (config["answer_vocab_length"],)
    assert bool(jnp.all(jnp.isfinite(logits)))
    for _, emb in sg_list:
        assert emb.shape == (config["hidden_size"],)
        assert bool(jnp.all(jnp.isfinite(emb)))
        # contrastive head output must be unit-norm
        assert abs(float(jnp.linalg.norm(emb)) - 1.0) < 1e-4
    print("KERNEL_OK")
</pallas_src>

<mosaic_0001>
module attributes {stable_mosaic.version = 11 : i64} {
  func.func @_forward_kernel(%arg0: memref<2xi32, #tpu.memory_space<smem>>, %arg1: memref<12x32xf32, #tpu.memory_space<vmem>>, %arg2: memref<8x32xf32, #tpu.memory_space<vmem>>, %arg3: memref<32x128xf32, #tpu.memory_space<vmem>>, %arg4: memref<32x128xf32, #tpu.memory_space<vmem>>, %arg5: memref<1x128xf32, #tpu.memory_space<vmem>>, %arg6: memref<32x128xf32, #tpu.memory_space<vmem>>, %arg7: memref<32x128xf32, #tpu.memory_space<vmem>>, %arg8: memref<1x128xf32, #tpu.memory_space<vmem>>, %arg9: memref<64x128xf32, #tpu.memory_space<vmem>>, %arg10: memref<1x128xf32, #tpu.memory_space<vmem>>, %arg11: memref<128x128xf32, #tpu.memory_space<vmem>>, %arg12: memref<1x128xf32, #tpu.memory_space<vmem>>, %arg13: memref<12x32xf32, #tpu.memory_space<vmem>>, %arg14: memref<1x128xf32, #tpu.memory_space<vmem>>, %arg15: memref<12x128xf32, #tpu.memory_space<vmem>>, %arg16: memref<8x128xf32, #tpu.memory_space<vmem>>, %arg17: memref<12x32xf32, #tpu.memory_space<vmem>>) attributes {dimension_semantics = [], scalar_prefetch = 0 : i64, scratch_operands = 3 : i64, tpu.core_type = #tpu.core_type<tc>} {
    %c0 = arith.constant 0 : index
    %c0_0 = arith.constant 0 : index
    %0 = vector.load %arg1[%c0, %c0_0] : memref<12x32xf32, #tpu.memory_space<vmem>>, vector<12x32xf32>
    %c0_1 = arith.constant 0 : index
    %c0_2 = arith.constant 0 : index
    %1 = vector.load %arg3[%c0_1, %c0_2] : memref<32x128xf32, #tpu.memory_space<vmem>>, vector<32x128xf32>
    %cst = arith.constant dense<0.000000e+00> : vector<12x128xf32>
    %2 = tpu.matmul %0, %1, %cst {dimension_numbers = #tpu.dot_dimension_numbers<[1], [0], [0], [1], [0, 0, 1, 1], [], []>} : vector<12x32xf32>, vector<32x128xf32>, vector<12x128xf32> -> vector<12x128xf32>
    %c0_3 = arith.constant 0 : index
    %c0_4 = arith.constant 0 : index
    %3 = vector.load %arg5[%c0_3, %c0_4] : memref<1x128xf32, #tpu.memory_space<vmem>>, vector<1x128xf32>
    %4 = vector.broadcast %3 : vector<1x128xf32> to vector<12x128xf32>
    %5 = arith.addf %2, %4 : vector<12x128xf32>
    %c0_5 = arith.constant 0 : index
    %c0_6 = arith.constant 0 : index
    %6 = vector.load %arg15[%c0_5, %c0_6] : memref<12x128xf32, #tpu.memory_space<vmem>>, vector<12x128xf32>
    tpu.vector_store %arg15[%c0_5, %c0_6], %5 {strides = array<i32>} : memref<12x128xf32, #tpu.memory_space<vmem>>, vector<12x128xf32>,
    %7 = tpu.iota {dimensions = array<i32: 1>} : vector<1x128xi32>
    %c32_i32 = arith.constant 32 : i32
    %c0_i32 = arith.constant 0 : i32
    %8 = arith.cmpi eq, %c32_i32, %c0_i32 : i32
    %c1_i32 = arith.constant 1 : i32
    %9 = arith.select %8, %c1_i32, %c32_i32 : i32
    %10 = vector.broadcast %9 : i32 to vector<1x128xi32>
    %11 = arith.remsi %7, %10 : vector<1x128xi32>
    %c0_i32_7 = arith.constant 0 : i32
    %12 = vector.broadcast %c0_i32_7 : i32 to vector<1x128xi32>
    %13 = arith.cmpi ne, %11, %12 : vector<1x128xi32>
    %c0_i32_8 = arith.constant 0 : i32
    %14 = vector.broadcast %c0_i32_8 : i32 to vector<1x128xi32>
    %15 = arith.cmpi slt, %11, %14 : vector<1x128xi32>
    %c0_i32_9 = arith.constant 0 : i32
    %16 = arith.cmpi slt, %9, %c0_i32_9 : i32
    %17 = vector.broadcast %16 : i1 to vector<1x128xi1>
    %18 = vector.broadcast %17 : vector<1x128xi1> to vector<1x128xi1>
    %19 = arith.xori %15, %18 : vector<1x128xi1>
    %20 = arith.andi %19, %13 : vector<1x128xi1>
    %21 = vector.broadcast %9 : i32 to vector<1x128xi32>
    %22 = arith.addi %11, %21 : vector<1x128xi32>
    %23 = arith.select %20, %22, %11 : vector<1x128xi1>, vector<1x128xi32>
    %c16_i32 = arith.constant 16 : i32
    %24 = vector.broadcast %c16_i32 : i32 to vector<1x128xi32>
    %25 = arith.cmpi sge, %23, %24 : vector<1x128xi32>
    %26 = tpu.iota {dimensions = array<i32: 1>} : vector<1x32xi32>
    %c16_i32_10 = arith.constant 16 : i32
    %27 = vector.broadcast %c16_i32_10 : i32 to vector<1x32xi32>
    %28 = arith.cmpi sge, %26, %27 : vector<1x32xi32>
    %c0_11 = arith.constant 0 : index
    %c0_12 = arith.constant 0 : index
    %29 = vector.load %arg4[%c0_11, %c0_12] : memref<32x128xf32, #tpu.memory_space<vmem>>, vector<32x128xf32>
    %cst_13 = arith.constant 0.000000e+00 : f32
    %30 = vector.broadcast %cst_13 : f32 to vector<1x32xf32>
    %cst_14 = arith.constant 0.000000e+00 : f32
    %31 = vector.broadcast %cst_14 : f32 to vector<1x32xf32>
    %c0_15 = arith.constant 0 : index
    %c0_16 = arith.constant 0 : index
    %32 = vector.load %arg15[%c0_15, %c0_16] : memref<12x128xf32, #tpu.memory_space<vmem>>, vector<1x128xf32>
    %c11 = arith.constant 11 : index
    %c0_17 = arith.constant 0 : index
    %33 = vector.load %arg15[%c11, %c0_17] : memref<12x128xf32, #tpu.memory_space<vmem>>, vector<1x128xf32>
    %34 = arith.select %25, %33, %32 : vector<1x128xi1>, vector<1x128xf32>
    %cst_18 = arith.constant dense<0.000000e+00> : vector<1x128xf32>
    %35 = tpu.matmul %30, %29, %cst_18 {dimension_numbers = #tpu.dot_dimension_numbers<[1], [0], [0], [1], [0, 0, 1, 1], [], []>} : vector<1x32xf32>, vector<32x128xf32>, vector<1x128xf32> -> vector<1x128xf32>
    %36 = arith.addf %34, %35 : vector<1x128xf32>
    %37 = vector.extract_strided_slice %36 {offsets = [0, 0], sizes = [1, 96], strides = [1, 1]} : vector<1x128xf32> to vector<1x96xf32>
    %38 = arith.negf %37 : vector<1x96xf32>
    %39 = math.exp %38 : vector<1x96xf32>
    %cst_19 = arith.constant 1.000000e+00 : f32
    %40 = vector.broadcast %cst_19 : f32 to vector<1x96xf32>
    %41 = arith.addf %40, %39 : vector<1x96xf32>
    %42 = arith.divf %40, %41 : vector<1x96xf32>
    %43 = vector.extract_strided_slice %42 {offsets = [0, 0], sizes = [1, 32], strides = [1, 1]} : vector<1x96xf32> to vector<1x32xf32>
    %44 = vector.extract_strided_slice %42 {offsets = [0, 32], sizes = [1, 32], strides = [1, 1]} : vector<1x96xf32> to vector<1x32xf32>
    %45 = vector.extract_strided_slice %42 {offsets = [0, 64], sizes = [1, 32], strides = [1, 1]} : vector<1x96xf32> to vector<1x32xf32>
    %46 = vector.extract_strided_slice %36 {offsets = [0, 96], sizes = [1, 32], strides = [1, 1]} : vector<1x128xf32> to vector<1x32xf32>
    %47 = math.tanh %46 : vector<1x32xf32>
    %48 = arith.mulf %44, %31 : vector<1x32xf32>
    %49 = arith.mulf %43, %47 : vector<1x32xf32>
    %50 = arith.addf %48, %49 : vector<1x32xf32>
    %51 = math.tanh %50 : vector<1x32xf32>
    %52 = arith.mulf %45, %51 : vector<1x32xf32>
    %c0_20 = arith.constant 0 : index
    %c0_21 = arith.constant 0 : index
    %53 = vector.load %arg17[%c0_20, %c0_21] : memref<12x32xf32, #tpu.memory_space<vmem>>, vector<1x32xf32>
    tpu.vector_store %arg17[%c0_20, %c0_21], %52 {strides = array<i32>} : memref<12x32xf32, #tpu.memory_space<vmem>>, vector<1x32xf32>,
    %c1 = arith.constant 1 : index
    %c0_22 = arith.constant 0 : index
    %54 = vector.load %arg15[%c1, %c0_22] : memref<12x128xf32, #tpu.memory_space<vmem>>, vector<1x128xf32>
    %c10 = arith.constant 10 : index
    %c0_23 = arith.constant 0 : index
    %55 = vector.load %arg15[%c10, %c0_23] : memref<12x128xf32, #tpu.memory_space<vmem>>, vector<1x128xf32>
    %56 = arith.select %25, %55, %54 : vector<1x128xi1>, vector<1x128xf32>
    %cst_24 = arith.constant dense<0.000000e+00> : vector<1x128xf32>
    %57 = tpu.matmul %52, %29, %cst_24 {dimension_numbers = #tpu.dot_dimension_numbers<[1], [0], [0], [1], [0, 0, 1, 1], [], []>} : vector<1x32xf32>, vector<32x128xf32>, vector<1x128xf32> -> vector<1x128xf32>
    %58 = arith.addf %56, %57 : vector<1x128xf32>
    %59 = vector.extract_strided_slice %58 {offsets = [0, 0], sizes = [1, 96], strides = [1, 1]} : vector<1x128xf32> to vector<1x96xf32>
    %60 = arith.negf %59 : vector<1x96xf32>
    %61 = math.exp %60 : vector<1x96xf32>
    %cst_25 = arith.constant 1.000000e+00 : f32
    %62 = vector.broadcast %cst_25 : f32 to vector<1x96xf32>
    %63 = arith.addf %62, %61 : vector<1x96xf32>
    %64 = arith.divf %62, %63 : vector<1x96xf32>
    %65 = vector.extract_strided_slice %64 {offsets = [0, 0], sizes = [1, 32], strides = [1, 1]} : vector<1x96xf32> to vector<1x32xf32>
    %66 = vector.extract_strided_slice %64 {offsets = [0, 32], sizes = [1, 32], strides = [1, 1]} : vector<1x96xf32> to vector<1x32xf32>
    %67 = vector.extract_strided_slice %64 {offsets = [0, 64], sizes = [1, 32], strides = [1, 1]} : vector<1x96xf32> to vector<1x32xf32>
    %68 = vector.extract_strided_slice %58 {offsets = [0, 96], sizes = [1, 32], strides = [1, 1]} : vector<1x128xf32> to vector<1x32xf32>
    %69 = math.tanh %68 : vector<1x32xf32>
    %70 = arith.mulf %66, %50 : vector<1x32xf32>
    %71 = arith.mulf %65, %69 : vector<1x32xf32>
    %72 = arith.addf %70, %71 : vector<1x32xf32>
    %73 = math.tanh %72 : vector<1x32xf32>
    %74 = arith.mulf %67, %73 : vector<1x32xf32>
    %c1_26 = arith.constant 1 : index
    %c0_27 = arith.constant 0 : index
    %75 = vector.load %arg17[%c1_26, %c0_27] : memref<12x32xf32, #tpu.memory_space<vmem>>, vector<1x32xf32>
    tpu.vector_store %arg17[%c1_26, %c0_27], %74 {strides = array<i32>} : memref<12x32xf32, #tpu.memory_space<vmem>>, vector<1x32xf32>,
    %c2 = arith.constant 2 : index
    %c0_28 = arith.constant 0 : index
    %76 = vector.load %arg15[%c2, %c0_28] : memref<12x128xf32, #tpu.memory_space<vmem>>, vector<1x128xf32>
    %c9 = arith.constant 9 : index
    %c0_29 = arith.constant 0 : index
    %77 = vector.load %arg15[%c9, %c0_29] : memref<12x128xf32, #tpu.memory_space<vmem>>, vector<1x128xf32>
    %78 = arith.select %25, %77, %76 : vector<1x128xi1>, vector<1x128xf32>
    %cst_30 = arith.constant dense<0.000000e+00> : vector<1x128xf32>
    %79 = tpu.matmul %74, %29, %cst_30 {dimension_numbers = #tpu.dot_dimension_numbers<[1], [0], [0], [1], [0, 0, 1, 1], [], []>} : vector<1x32xf32>, vector<32x128xf32>, vector<1x128xf32> -> vector<1x128xf32>
    %80 = arith.addf %78, %79 : vector<1x128xf32>
    %81 = vector.extract_strided_slice %80 {offsets = [0, 0], sizes = [1, 96], strides = [1, 1]} : vector<1x128xf32> to vector<1x96xf32>
    %82 = arith.negf %81 : vector<1x96xf32>
    %83 = math.exp %82 : vector<1x96xf32>
    %cst_31 = arith.constant 1.000000e+00 : f32
    %84 = vector.broadcast %cst_31 : f32 to vector<1x96xf32>
    %85 = arith.addf %84, %83 : vector<1x96xf32>
    %86 = arith.divf %84, %85 : vector<1x96xf32>
    %87 = vector.extract_strided_slice %86 {offsets = [0, 0], sizes = [1, 32], strides = [1, 1]} : vector<1x96xf32> to vector<1x32xf32>
    %88 = vector.extract_strided_slice %86 {offsets = [0, 32], sizes = [1, 32], strides = [1, 1]} : vector<1x96xf32> to vector<1x32xf32>
    %89 = vector.extract_strided_slice %86 {offsets = [0, 64], sizes = [1, 32], strides = [1, 1]} : vector<1x96xf32> to vector<1x32xf32>
    %90 = vector.extract_strided_slice %80 {offsets = [0, 96], sizes = [1, 32], strides = [1, 1]} : vector<1x128xf32> to vector<1x32xf32>
    %91 = math.tanh %90 : vector<1x32xf32>
    %92 = arith.mulf %88, %72 : vector<1x32xf32>
    %93 = arith.mulf %87, %91 : vector<1x32xf32>
    %94 = arith.addf %92, %93 : vector<1x32xf32>
    %95 = math.tanh %94 : vector<1x32xf32>
    %96 = arith.mulf %89, %95 : vector<1x32xf32>
    %c2_32 = arith.constant 2 : index
    %c0_33 = arith.constant 0 : index
    %97 = vector.load %arg17[%c2_32, %c0_33] : memref<12x32xf32, #tpu.memory_space<vmem>>, vector<1x32xf32>
    tpu.vector_store %arg17[%c2_32, %c0_33], %96 {strides = array<i32>} : memref<12x32xf32, #tpu.memory_space<vmem>>, vector<1x32xf32>,
    %c3 = arith.constant 3 : index
    %c0_34 = arith.constant 0 : index
    %98 = vector.load %arg15[%c3, %c0_34] : memref<12x128xf32, #tpu.memory_space<vmem>>, vector<1x128xf32>
    %c8 = arith.constant 8 : index
    %c0_35 = arith.constant 0 : index
    %99 = vector.load %arg15[%c8, %c0_35] : memref<12x128xf32, #tpu.memory_space<vmem>>, vector<1x128xf32>
    %100 = arith.select %25, %99, %98 : vector<1x128xi1>, vector<1x128xf32>
    %cst_36 = arith.constant dense<0.000000e+00> : vector<1x128xf32>
    %101 = tpu.matmul %96, %29, %cst_36 {dimension_numbers = #tpu.dot_dimension_numbers<[1], [0], [0], [1], [0, 0, 1, 1], [], []>} : vector<1x32xf32>, vector<32x128xf32>, vector<1x128xf32> -> vector<1x128xf32>
    %102 = arith.addf %100, %101 : vector<1x128xf32>
    %103 = vector.extract_strided_slice %102 {offsets = [0, 0], sizes = [1, 96], strides = [1, 1]} : vector<1x128xf32> to vector<1x96xf32>
    %104 = arith.negf %103 : vector<1x96xf32>
    %105 = math.exp %104 : vector<1x96xf32>
    %cst_37 = arith.constant 1.000000e+00 : f32
    %106 = vector.broadcast %cst_37 : f32 to vector<1x96xf32>
    %107 = arith.addf %106, %105 : vector<1x96xf32>
    %108 = arith.divf %106, %107 : vector<1x96xf32>
    %109 = vector.extract_strided_slice %108 {offsets = [0, 0], sizes = [1, 32], strides = [1, 1]} : vector<1x96xf32> to vector<1x32xf32>
    %110 = vector.extract_strided_slice %108 {offsets = [0, 32], sizes = [1, 32], strides = [1, 1]} : vector<1x96xf32> to vector<1x32xf32>
    %111 = vector.extract_strided_slice %108 {offsets = [0, 64], sizes = [1, 32], strides = [1, 1]} : vector<1x96xf32> to vector<1x32xf32>
    %112 = vector.extract_strided_slice %102 {offsets = [0, 96], sizes = [1, 32], strides = [1, 1]} : vector<1x128xf32> to vector<1x32xf32>
    %113 = math.tanh %112 : vector<1x32xf32>
    %114 = arith.mulf %110, %94 : vector<1x32xf32>
    %115 = arith.mulf %109, %113 : vector<1x32xf32>
    %116 = arith.addf %114, %115 : vector<1x32xf32>
    %117 = math.tanh %116 : vector<1x32xf32>
    %118 = arith.mulf %111, %117 : vector<1x32xf32>
    %c3_38 = arith.constant 3 : index
    %c0_39 = arith.constant 0 : index
    %119 = vector.load %arg17[%c3_38, %c0_39] : memref<12x32xf32, #tpu.memory_space<vmem>>, vector<1x32xf32>
    tpu.vector_store %arg17[%c3_38, %c0_39], %118 {strides = array<i32>} : memref<12x32xf32, #tpu.memory_space<vmem>>, vector<1x32xf32>,
    %c4 = arith.constant 4 : index
    %c0_40 = arith.constant 0 : index
    %120 = vector.load %arg15[%c4, %c0_40] : memref<12x128xf32, #tpu.memory_space<vmem>>, vector<1x128xf32>
    %c7 = arith.constant 7 : index
    %c0_41 = arith.constant 0 : index
    %121 = vector.load %arg15[%c7, %c0_41] : memref<12x128xf32, #tpu.memory_space<vmem>>, vector<1x128xf32>
    %122 = arith.select %25, %121, %120 : vector<1x128xi1>, vector<1x128xf32>
    %cst_42 = arith.constant dense<0.000000e+00> : vector<1x128xf32>
    %123 = tpu.matmul %118, %29, %cst_42 {dimension_numbers = #tpu.dot_dimension_numbers<[1], [0], [0], [1], [0, 0, 1, 1], [], []>} : vector<1x32xf32>, vector<32x128xf32>, vector<1x128xf32> -> vector<1x128xf32>
    %124 = arith.addf %122, %123 : vector<1x128xf32>
    %125 = vector.extract_strided_slice %124 {offsets = [0, 0], sizes = [1, 96], strides = [1, 1]} : vector<1x128xf32> to vector<1x96xf32>
    %126 = arith.negf %125 : vector<1x96xf32>
    %127 = math.exp %126 : vector<1x96xf32>
    %cst_43 = arith.constant 1.000000e+00 : f32
    %128 = vector.broadcast %cst_43 : f32 to vector<1x96xf32>
    %129 = arith.addf %128, %127 : vector<1x96xf32>
    %130 = arith.divf %128, %129 : vector<1x96xf32>
    %131 = vector.extract_strided_slice %130 {offsets = [0, 0], sizes = [1, 32], strides = [1, 1]} : vector<1x96xf32> to vector<1x32xf32>
    %132 = vector.extract_strided_slice %130 {offsets = [0, 32], sizes = [1, 32], strides = [1, 1]} : vector<1x96xf32> to vector<1x32xf32>
    %133 = vector.extract_strided_slice %130 {offsets = [0, 64], sizes = [1, 32], strides = [1, 1]} : vector<1x96xf32> to vector<1x32xf32>
    %134 = vector.extract_strided_slice %124 {offsets = [0, 96], sizes = [1, 32], strides = [1, 1]} : vector<1x128xf32> to vector<1x32xf32>
    %135 = math.tanh %134 : vector<1x32xf32>
    %136 = arith.mulf %132, %116 : vector<1x32xf32>
    %137 = arith.mulf %131, %135 : vector<1x32xf32>
    %138 = arith.addf %136, %137 : vector<1x32xf32>
    %139 = math.tanh %138 : vector<1x32xf32>
    %140 = arith.mulf %133, %139 : vector<1x32xf32>
    %c4_44 = arith.constant 4 : index
    %c0_45 = arith.constant 0 : index
    %141 = vector.load %arg17[%c4_44, %c0_45] : memref<12x32xf32, #tpu.memory_space<vmem>>, vector<1x32xf32>
    tpu.vector_store %arg17[%c4_44, %c0_45], %140 {strides = array<i32>} : memref<12x32xf32, #tpu.memory_space<vmem>>, vector<1x32xf32>,
    %c5 = arith.constant 5 : index
    %c0_46 = arith.constant 0 : index
    %142 = vector.load %arg15[%c5, %c0_46] : memref<12x128xf32, #tpu.memory_space<vmem>>, vector<1x128xf32>
    %c6 = arith.constant 6 : index
    %c0_47 = arith.constant 0 : index
    %143 = vector.load %arg15[%c6, %c0_47] : memref<12x128xf32, #tpu.memory_space<vmem>>, vector<1x128xf32>
    %144 = arith.select %25, %143, %142 : vector<1x128xi1>, vector<1x128xf32>
    %cst_48 = arith.constant dense<0.000000e+00> : vector<1x128xf32>
    %145 = tpu.matmul %140, %29, %cst_48 {dimension_numbers = #tpu.dot_dimension_numbers<[1], [0], [0], [1], [0, 0, 1, 1], [], []>} : vector<1x32xf32>, vector<32x128xf32>, vector<1x128xf32> -> vector<1x128xf32>
    %146 = arith.addf %144, %145 : vector<1x128xf32>
    %147 = vector.extract_strided_slice %146 {offsets = [0, 0], sizes = [1, 96], strides = [1, 1]} : vector<1x128xf32> to vector<1x96xf32>
    %148 = arith.negf %147 : vector<1x96xf32>
    %149 = math.exp %148 : vector<1x96xf32>
    %cst_49 = arith.constant 1.000000e+00 : f32
    %150 = vector.broadcast %cst_49 : f32 to vector<1x96xf32>
    %151 = arith.addf %150, %149 : vector<1x96xf32>
    %152 = arith.divf %150, %151 : vector<1x96xf32>
    %153 = vector.extract_strided_slice %152 {offsets = [0, 0], sizes = [1, 32], strides = [1, 1]} : vector<1x96xf32> to vector<1x32xf32>
    %154 = vector.extract_strided_slice %152 {offsets = [0, 32], sizes = [1, 32], strides = [1, 1]} : vector<1x96xf32> to vector<1x32xf32>
    %155 = vector.extract_strided_slice %152 {offsets = [0, 64], sizes = [1, 32], strides = [1, 1]} : vector<1x96xf32> to vector<1x32xf32>
    %156 = vector.extract_strided_slice %146 {offsets = [0, 96], sizes = [1, 32], strides = [1, 1]} : vector<1x128xf32> to vector<1x32xf32>
    %157 = math.tanh %156 : vector<1x32xf32>
    %158 = arith.mulf %154, %138 : vector<1x32xf32>
    %159 = arith.mulf %153, %157 : vector<1x32xf32>
    %160 = arith.addf %158, %159 : vector<1x32xf32>
    %161 = math.tanh %160 : vector<1x32xf32>
    %162 = arith.mulf %155, %161 : vector<1x32xf32>
    %c5_50 = arith.constant 5 : index
    %c0_51 = arith.constant 0 : index
    %163 = vector.load %arg17[%c5_50, %c0_51] : memref<12x32xf32, #tpu.memory_space<vmem>>, vector<1x32xf32>
    tpu.vector_store %arg17[%c5_50, %c0_51], %162 {strides = array<i32>} : memref<12x32xf32, #tpu.memory_space<vmem>>, vector<1x32xf32>,
    %c6_52 = arith.constant 6 : index
    %c0_53 = arith.constant 0 : index
    %164 = vector.load %arg15[%c6_52, %c0_53] : memref<12x128xf32, #tpu.memory_space<vmem>>, vector<1x128xf32>
    %c5_54 = arith.constant 5 : index
    %c0_55 = arith.constant 0 : index
    %165 = vector.load %arg15[%c5_54, %c0_55] : memref<12x128xf32, #tpu.memory_space<vmem>>, vector<1x128xf32>
    %166 = arith.select %25, %165, %164 : vector<1x128xi1>, vector<1x128xf32>
    %cst_56 = arith.constant dense<0.000000e+00> : vector<1x128xf32>
    %167 = tpu.matmul %162, %29, %cst_56 {dimension_numbers = #tpu.dot_dimension_numbers<[1], [0], [0], [1], [0, 0, 1, 1], [], []>} : vector<1x32xf32>, vector<32x128xf32>, vector<1x128xf32> -> vector<1x128xf32>
    %168 = arith.addf %166, %167 : vector<1x128xf32>
    %169 = vector.extract_strided_slice %168 {offsets = [0, 0], sizes = [1, 96], strides = [1, 1]} : vector<1x128xf32> to vector<1x96xf32>
    %170 = arith.negf %169 : vector<1x96xf32>
    %171 = math.exp %170 : vector<1x96xf32>
    %cst_57 = arith.constant 1.000000e+00 : f32
    %172 = vector.broadcast %cst_57 : f32 to vector<1x96xf32>
    %173 = arith.addf %172, %171 : vector<1x96xf32>
    %174 = arith.divf %172, %173 : vector<1x96xf32>
    %175 = vector.extract_strided_slice %174 {offsets = [0, 0], sizes = [1, 32], strides = [1, 1]} : vector<1x96xf32> to vector<1x32xf32>
    %176 = vector.extract_strided_slice %174 {offsets = [0, 32], sizes = [1, 32], strides = [1, 1]} : vector<1x96xf32> to vector<1x32xf32>
    %177 = vector.extract_strided_slice %174 {offsets = [0, 64], sizes = [1, 32], strides = [1, 1]} : vector<1x96xf32> to vector<1x32xf32>
    %178 = vector.extract_strided_slice %168 {offsets = [0, 96], sizes = [1, 32], strides = [1, 1]} : vector<1x128xf32> to vector<1x32xf32>
    %179 = math.tanh %178 : vector<1x32xf32>
    %180 = arith.mulf %176, %160 : vector<1x32xf32>
    %181 = arith.mulf %175, %179 : vector<1x32xf32>
    %182 = arith.addf %180, %181 : vector<1x32xf32>
    %183 = math.tanh %182 : vector<1x32xf32>
    %184 = arith.mulf %177, %183 : vector<1x32xf32>
    %c6_58 = arith.constant 6 : index
    %c0_59 = arith.constant 0 : index
    %185 = vector.load %arg17[%c6_58, %c0_59] : memref<12x32xf32, #tpu.memory_space<vmem>>, vector<1x32xf32>
    tpu.vector_store %arg17[%c6_58, %c0_59], %184 {strides = array<i32>} : memref<12x32xf32, #tpu.memory_space<vmem>>, vector<1x32xf32>,
    %c7_60 = arith.constant 7 : index
    %c0_61 = arith.constant 0 : index
    %186 = vector.load %arg15[%c7_60, %c0_61] : memref<12x128xf32, #tpu.memory_space<vmem>>, vector<1x128xf32>
    %c4_62 = arith.constant 4 : index
    %c0_63 = arith.constant 0 : index
    %187 = vector.load %arg15[%c4_62, %c0_63] : memref<12x128xf32, #tpu.memory_space<vmem>>, vector<1x128xf32>
    %188 = arith.select %25, %187, %186 : vector<1x128xi1>, vector<1x128xf32>
    %cst_64 = arith.constant dense<0.000000e+00> : vector<1x128xf32>
    %189 = tpu.matmul %184, %29, %cst_64 {dimension_numbers = #tpu.dot_dimension_numbers<[1], [0], [0], [1], [0, 0, 1, 1], [], []>} : vector<1x32xf32>, vector<32x128xf32>, vector<1x128xf32> -> vector<1x128xf32>
    %190 = arith.addf %188, %189 : vector<1x128xf32>
    %191 = vector.extract_strided_slice %190 {offsets = [0, 0], sizes = [1, 96], strides = [1, 1]} : vector<1x128xf32> to vector<1x96xf32>
    %192 = arith.negf %191 : vector<1x96xf32>
    %193 = math.exp %192 : vector<1x96xf32>
    %cst_65 = arith.constant 1.000000e+00 : f32
    %194 = vector.broadcast %cst_65 : f32 to vector<1x96xf32>
    %195 = arith.addf %194, %193 : vector<1x96xf32>
    %196 = arith.divf %194, %195 : vector<1x96xf32>
    %197 = vector.extract_strided_slice %196 {offsets = [0, 0], sizes = [1, 32], strides = [1, 1]} : vector<1x96xf32> to vector<1x32xf32>
    %198 = vector.extract_strided_slice %196 {offsets = [0, 32], sizes = [1, 32], strides = [1, 1]} : vector<1x96xf32> to vector<1x32xf32>
    %199 = vector.extract_strided_slice %196 {offsets = [0, 64], sizes = [1, 32], strides = [1, 1]} : vector<1x96xf32> to vector<1x32xf32>
    %200 = vector.extract_strided_slice %190 {offsets = [0, 96], sizes = [1, 32], strides = [1, 1]} : vector<1x128xf32> to vector<1x32xf32>
    %201 = math.tanh %200 : vector<1x32xf32>
    %202 = arith.mulf %198, %182 : vector<1x32xf32>
    %203 = arith.mulf %197, %201 : vector<1x32xf32>
    %204 = arith.addf %202, %203 : vector<1x32xf32>
    %205 = math.tanh %204 : vector<1x32xf32>
    %206 = arith.mulf %199, %205 : vector<1x32xf32>
    %c7_66 = arith.constant 7 : index
    %c0_67 = arith.constant 0 : index
    %207 = vector.load %arg17[%c7_66, %c0_67] : memref<12x32xf32, #tpu.memory_space<vmem>>, vector<1x32xf32>
    tpu.vector_store %arg17[%c7_66, %c0_67], %206 {strides = array<i32>} : memref<12x32xf32, #tpu.memory_space<vmem>>, vector<1x32xf32>,
    %c8_68 = arith.constant 8 : index
    %c0_69 = arith.constant 0 : index
    %208 = vector.load %arg15[%c8_68, %c0_69] : memref<12x128xf32, #tpu.memory_space<vmem>>, vector<1x128xf32>
    %c3_70 = arith.constant 3 : index
    %c0_71 = arith.constant 0 : index
    %209 = vector.load %arg15[%c3_70, %c0_71] : memref<12x128xf32, #tpu.memory_space<vmem>>, vector<1x128xf32>
    %210 = arith.select %25, %209, %208 : vector<1x128xi1>, vector<1x128xf32>
    %cst_72 = arith.constant dense<0.000000e+00> : vector<1x128xf32>
    %211 = tpu.matmul %206, %29, %cst_72 {dimension_numbers = #tpu.dot_dimension_numbers<[1], [0], [0], [1], [0, 0, 1, 1], [], []>} : vector<1x32xf32>, vector<32x128xf32>, vector<1x128xf32> -> vector<1x128xf32>
    %212 = arith.addf %210, %211 : vector<1x128xf32>
    %213 = vector.extract_strided_slice %212 {offsets = [0, 0], sizes = [1, 96], strides = [1, 1]} : vector<1x128xf32> to vector<1x96xf32>
    %214 = arith.negf %213 : vector<1x96xf32>
    %215 = math.exp %214 : vector<1x96xf32>
    %cst_73 = arith.constant 1.000000e+00 : f32
    %216 = vector.broadcast %cst_73 : f32 to vector<1x96xf32>
    %217 = arith.addf %216, %215 : vector<1x96xf32>
    %218 = arith.divf %216, %217 : vector<1x96xf32>
    %219 = vector.extract_strided_slice %218 {offsets = [0, 0], sizes = [1, 32], strides = [1, 1]} : vector<1x96xf32> to vector<1x32xf32>
    %220 = vector.extract_strided_slice %218 {offsets = [0, 32], sizes = [1, 32], strides = [1, 1]} : vector<1x96xf32> to vector<1x32xf32>
    %221 = vector.extract_strided_slice %218 {offsets = [0, 64], sizes = [1, 32], strides = [1, 1]} : vector<1x96xf32> to vector<1x32xf32>
    %222 = vector.extract_strided_slice %212 {offsets = [0, 96], sizes = [1, 32], strides = [1, 1]} : vector<1x128xf32> to vector<1x32xf32>
    %223 = math.tanh %222 : vector<1x32xf32>
    %224 = arith.mulf %220, %204 : vector<1x32xf32>
    %225 = arith.mulf %219, %223 : vector<1x32xf32>
    %226 = arith.addf %224, %225 : vector<1x32xf32>
    %227 = math.tanh %226 : vector<1x32xf32>
    %228 = arith.mulf %221, %227 : vector<1x32xf32>
    %c8_74 = arith.constant 8 : index
    %c0_75 = arith.constant 0 : index
    %229 = vector.load %arg17[%c8_74, %c0_75] : memref<12x32xf32, #tpu.memory_space<vmem>>, vector<1x32xf32>
    tpu.vector_store %arg17[%c8_74, %c0_75], %228 {strides = array<i32>} : memref<12x32xf32, #tpu.memory_space<vmem>>, vector<1x32xf32>,
    %c9_76 = arith.constant 9 : index
    %c0_77 = arith.constant 0 : index
    %230 = vector.load %arg15[%c9_76, %c0_77] : memref<12x128xf32, #tpu.memory_space<vmem>>, vector<1x128xf32>
    %c2_78 = arith.constant 2 : index
    %c0_79 = arith.constant 0 : index
    %231 = vector.load %arg15[%c2_78, %c0_79] : memref<12x128xf32, #tpu.memory_space<vmem>>, vector<1x128xf32>
    %232 = arith.select %25, %231, %230 : vector<1x128xi1>, vector<1x128xf32>
    %cst_80 = arith.constant dense<0.000000e+00> : vector<1x128xf32>
    %233 = tpu.matmul %228, %29, %cst_80 {dimension_numbers = #tpu.dot_dimension_numbers<[1], [0], [0], [1], [0, 0, 1, 1], [], []>} : vector<1x32xf32>, vector<32x128xf32>, vector<1x128xf32> -> vector<1x128xf32>
    %234 = arith.addf %232, %233 : vector<1x128xf32>
    %235 = vector.extract_strided_slice %234 {offsets = [0, 0], sizes = [1, 96], strides = [1, 1]} : vector<1x128xf32> to vector<1x96xf32>
    %236 = arith.negf %235 : vector<1x96xf32>
    %237 = math.exp %236 : vector<1x96xf32>
    %cst_81 = arith.constant 1.000000e+00 : f32
    %238 = vector.broadcast %cst_81 : f32 to vector<1x96xf32>
    %239 = arith.addf %238, %237 : vector<1x96xf32>
    %240 = arith.divf %238, %239 : vector<1x96xf32>
    %241 = vector.extract_strided_slice %240 {offsets = [0, 0], sizes = [1, 32], strides = [1, 1]} : vector<1x96xf32> to vector<1x32xf32>
    %242 = vector.extract_strided_slice %240 {offsets = [0, 32], sizes = [1, 32], strides = [1, 1]} : vector<1x96xf32> to vector<1x32xf32>
    %243 = vector.extract_strided_slice %240 {offsets = [0, 64], sizes = [1, 32], strides = [1, 1]} : vector<1x96xf32> to vector<1x32xf32>
    %244 = vector.extract_strided_slice %234 {offsets = [0, 96], sizes = [1, 32], strides = [1, 1]} : vector<1x128xf32> to vector<1x32xf32>
    %245 = math.tanh %244 : vector<1x32xf32>
    %246 = arith.mulf %242, %226 : vector<1x32xf32>
    %247 = arith.mulf %241, %245 : vector<1x32xf32>
    %248 = arith.addf %246, %247 : vector<1x32xf32>
    %249 = math.tanh %248 : vector<1x32xf32>
    %250 = arith.mulf %243, %249 : vector<1x32xf32>
    %c9_82 = arith.constant 9 : index
    %c0_83 = arith.constant 0 : index
    %251 = vector.load %arg17[%c9_82, %c0_83] : memref<12x32xf32, #tpu.memory_space<vmem>>, vector<1x32xf32>
    tpu.vector_store %arg17[%c9_82, %c0_83], %250 {strides = array<i32>} : memref<12x32xf32, #tpu.memory_space<vmem>>, vector<1x32xf32>,
    %c10_84 = arith.constant 10 : index
    %c0_85 = arith.constant 0 : index
    %252 = vector.load %arg15[%c10_84, %c0_85] : memref<12x128xf32, #tpu.memory_space<vmem>>, vector<1x128xf32>
    %c1_86 = arith.constant 1 : index
    %c0_87 = arith.constant 0 : index
    %253 = vector.load %arg15[%c1_86, %c0_87] : memref<12x128xf32, #tpu.memory_space<vmem>>, vector<1x128xf32>
    %254 = arith.select %25, %253, %252 : vector<1x128xi1>, vector<1x128xf32>
    %cst_88 = arith.constant dense<0.000000e+00> : vector<1x128xf32>
    %255 = tpu.matmul %250, %29, %cst_88 {dimension_numbers = #tpu.dot_dimension_numbers<[1], [0], [0], [1], [0, 0, 1, 1], [], []>} : vector<1x32xf32>, vector<32x128xf32>, vector<1x128xf32> -> vector<1x128xf32>
    %256 = arith.addf %254, %255 : vector<1x128xf32>
    %257 = vector.extract_strided_slice %256 {offsets = [0, 0], sizes = [1, 96], strides = [1, 1]} : vector<1x128xf32> to vector<1x96xf32>
    %258 = arith.negf %257 : vector<1x96xf32>
    %259 = math.exp %258 : vector<1x96xf32>
    %cst_89 = arith.constant 1.000000e+00 : f32
    %260 = vector.broadcast %cst_89 : f32 to vector<1x96xf32>
    %261 = arith.addf %260, %259 : vector<1x96xf32>
    %262 = arith.divf %260, %261 : vector<1x96xf32>
    %263 = vector.extract_strided_slice %262 {offsets = [0, 0], sizes = [1, 32], strides = [1, 1]} : vector<1x96xf32> to vector<1x32xf32>
    %264 = vector.extract_strided_slice %262 {offsets = [0, 32], sizes = [1, 32], strides = [1, 1]} : vector<1x96xf32> to vector<1x32xf32>
    %265 = vector.extract_strided_slice %262 {offsets = [0, 64], sizes = [1, 32], strides = [1, 1]} : vector<1x96xf32> to vector<1x32xf32>
    %266 = vector.extract_strided_slice %256 {offsets = [0, 96], sizes = [1, 32], strides = [1, 1]} : vector<1x128xf32> to vector<1x32xf32>
    %267 = math.tanh %266 : vector<1x32xf32>
    %268 = arith.mulf %264, %248 : vector<1x32xf32>
    %269 = arith.mulf %263, %267 : vector<1x32xf32>
    %270 = arith.addf %268, %269 : vector<1x32xf32>
    %271 = math.tanh %270 : vector<1x32xf32>
    %272 = arith.mulf %265, %271 : vector<1x32xf32>
    %c10_90 = arith.constant 10 : index
    %c0_91 = arith.constant 0 : index
    %273 = vector.load %arg17[%c10_90, %c0_91] : memref<12x32xf32, #tpu.memory_space<vmem>>, vector<1x32xf32>
    tpu.vector_store %arg17[%c10_90, %c0_91], %272 {strides = array<i32>} : memref<12x32xf32, #tpu.memory_space<vmem>>, vector<1x32xf32>,
    %c11_92 = arith.constant 11 : index
    %c0_93 = arith.constant 0 : index
    %274 = vector.load %arg15[%c11_92, %c0_93] : memref<12x128xf32, #tpu.memory_space<vmem>>, vector<1x128xf32>
    %c0_94 = arith.constant 0 : index
    %c0_95 = arith.constant 0 : index
    %275 = vector.load %arg15[%c0_94, %c0_95] : memref<12x128xf32, #tpu.memory_space<vmem>>, vector<1x128xf32>
    %276 = arith.select %25, %275, %274 : vector<1x128xi1>, vector<1x128xf32>
    %cst_96 = arith.constant dense<0.000000e+00> : vector<1x128xf32>
    %277 = tpu.matmul %272, %29, %cst_96 {dimension_numbers = #tpu.dot_dimension_numbers<[1], [0], [0], [1], [0, 0, 1, 1], [], []>} : vector<1x32xf32>, vector<32x128xf32>, vector<1x128xf32> -> vector<1x128xf32>
    %278 = arith.addf %276, %277 : vector<1x128xf32>
    %279 = vector.extract_strided_slice %278 {offsets = [0, 0], sizes = [1, 96], strides = [1, 1]} : vector<1x128xf32> to vector<1x96xf32>
    %280 = arith.negf %279 : vector<1x96xf32>
    %281 = math.exp %280 : vector<1x96xf32>
    %cst_97 = arith.constant 1.000000e+00 : f32
    %282 = vector.broadcast %cst_97 : f32 to vector<1x96xf32>
    %283 = arith.addf %282, %281 : vector<1x96xf32>
    %284 = arith.divf %282, %283 : vector<1x96xf32>
    %285 = vector.extract_strided_slice %284 {offsets = [0, 0], sizes = [1, 32], strides = [1, 1]} : vector<1x96xf32> to vector<1x32xf32>
    %286 = vector.extract_strided_slice %284 {offsets = [0, 32], sizes = [1, 32], strides = [1, 1]} : vector<1x96xf32> to vector<1x32xf32>
    %287 = vector.extract_strided_slice %284 {offsets = [0, 64], sizes = [1, 32], strides = [1, 1]} : vector<1x96xf32> to vector<1x32xf32>
    %288 = vector.extract_strided_slice %278 {offsets = [0, 96], sizes = [1, 32], strides = [1, 1]} : vector<1x128xf32> to vector<1x32xf32>
    %289 = math.tanh %288 : vector<1x32xf32>
    %290 = arith.mulf %286, %270 : vector<1x32xf32>
    %291 = arith.mulf %285, %289 : vector<1x32xf32>
    %292 = arith.addf %290, %291 : vector<1x32xf32>
    %293 = math.tanh %292 : vector<1x32xf32>
    %294 = arith.mulf %287, %293 : vector<1x32xf32>
    %c11_98 = arith.constant 11 : index
    %c0_99 = arith.constant 0 : index
    %295 = vector.load %arg17[%c11_98, %c0_99] : memref<12x32xf32, #tpu.memory_space<vmem>>, vector<1x32xf32>
    tpu.vector_store %arg17[%c11_98, %c0_99], %294 {strides = array<i32>} : memref<12x32xf32, #tpu.memory_space<vmem>>, vector<1x32xf32>,
    %c11_100 = arith.constant 11 : index
    %c0_101 = arith.constant 0 : index
    %296 = vector.load %arg17[%c11_100, %c0_101] : memref<12x32xf32, #tpu.memory_space<vmem>>, vector<1x32xf32>
    %c0_102 = arith.constant 0 : index
    %c0_103 = arith.constant 0 : index
    %297 = vector.load %arg17[%c0_102, %c0_103] : memref<12x32xf32, #tpu.memory_space<vmem>>, vector<1x32xf32>
    %298 = arith.select %28, %296, %297 : vector<1x32xi1>, vector<1x32xf32>
    %c0_104 = arith.constant 0 : index
    %c0_105 = arith.constant 0 : index
    %299 = vector.load %arg13[%c0_104, %c0_105] : memref<12x32xf32, #tpu.memory_space<vmem>>, vector<1x32xf32>
    tpu.vector_store %arg13[%c0_104, %c0_105], %298 {strides = array<i32>} : memref<12x32xf32, #tpu.memory_space<vmem>>, vector<1x32xf32>,
    %c10_106 = arith.constant 10 : index
    %c0_107 = arith.constant 0 : index
    %300 = vector.load %arg17[%c10_106, %c0_107] : memref<12x32xf32, #tpu.memory_space<vmem>>, vector<1x32xf32>
    %c1_108 = arith.constant 1 : index
    %c0_109 = arith.constant 0 : index
    %301 = vector.load %arg17[%c1_108, %c0_109] : memref<12x32xf32, #tpu.memory_space<vmem>>, vector<1x32xf32>
    %302 = arith.select %28, %300, %301 : vector<1x32xi1>, vector<1x32xf32>
    %c1_110 = arith.constant 1 : index
    %c0_111 = arith.constant 0 : index
    %303 = vector.load %arg13[%c1_110, %c0_111] : memref<12x32xf32, #tpu.memory_space<vmem>>, vector<1x32xf32>
    tpu.vector_store %arg13[%c1_110, %c0_111], %302 {strides = array<i32>} : memref<12x32xf32, #tpu.memory_space<vmem>>, vector<1x32xf32>,
    %c9_112 = arith.constant 9 : index
    %c0_113 = arith.constant 0 : index
    %304 = vector.load %arg17[%c9_112, %c0_113] : memref<12x32xf32, #tpu.memory_space<vmem>>, vector<1x32xf32>
    %c2_114 = arith.constant 2 : index
    %c0_115 = arith.constant 0 : index
    %305 = vector.load %arg17[%c2_114, %c0_115] : memref<12x32xf32, #tpu.memory_space<vmem>>, vector<1x32xf32>
    %306 = arith.select %28, %304, %305 : vector<1x32xi1>, vector<1x32xf32>
    %c2_116 = arith.constant 2 : index
    %c0_117 = arith.constant 0 : index
    %307 = vector.load %arg13[%c2_116, %c0_117] : memref<12x32xf32, #tpu.memory_space<vmem>>, vector<1x32xf32>
    tpu.vector_store %arg13[%c2_116, %c0_117], %306 {strides = array<i32>} : memref<12x32xf32, #tpu.memory_space<vmem>>, vector<1x32xf32>,
    %c8_118 = arith.constant 8 : index
    %c0_119 = arith.constant 0 : index
    %308 = vector.load %arg17[%c8_118, %c0_119] : memref<12x32xf32, #tpu.memory_space<vmem>>, vector<1x32xf32>
    %c3_120 = arith.constant 3 : index
    %c0_121 = arith.constant 0 : index
    %309 = vector.load %arg17[%c3_120, %c0_121] : memref<12x32xf32, #tpu.memory_space<vmem>>, vector<1x32xf32>
    %310 = arith.select %28, %308, %309 : vector<1x32xi1>, vector<1x32xf32>
    %c3_122 = arith.constant 3 : index
    %c0_123 = arith.constant 0 : index
    %311 = vector.load %arg13[%c3_122, %c0_123] : memref<12x32xf32, #tpu.memory_space<vmem>>, vector<1x32xf32>
    tpu.vector_store %arg13[%c3_122, %c0_123], %310 {strides = array<i32>} : memref<12x32xf32, #tpu.memory_space<vmem>>, vector<1x32xf32>,
    %c7_124 = arith.constant 7 : index
    %c0_125 = arith.constant 0 : index
    %312 = vector.load %arg17[%c7_124, %c0_125] : memref<12x32xf32, #tpu.memory_space<vmem>>, vector<1x32xf32>
    %c4_126 = arith.constant 4 : index
    %c0_127 = arith.constant 0 : index
    %313 = vector.load %arg17[%c4_126, %c0_127] : memref<12x32xf32, #tpu.memory_space<vmem>>, vector<1x32xf32>
    %314 = arith.select %28, %312, %313 : vector<1x32xi1>, vector<1x32xf32>
    %c4_128 = arith.constant 4 : index
    %c0_129 = arith.constant 0 : index
    %315 = vector.load %arg13[%c4_128, %c0_129] : memref<12x32xf32, #tpu.memory_space<vmem>>, vector<1x32xf32>
    tpu.vector_store %arg13[%c4_128, %c0_129], %314 {strides = array<i32>} : memref<12x32xf32, #tpu.memory_space<vmem>>, vector<1x32xf32>,
    %c6_130 = arith.constant 6 : index
    %c0_131 = arith.constant 0 : index
    %316 = vector.load %arg17[%c6_130, %c0_131] : memref<12x32xf32, #tpu.memory_space<vmem>>, vector<1x32xf32>
    %c5_132 = arith.constant 5 : index
    %c0_133 = arith.constant 0 : index
    %317 = vector.load %arg17[%c5_132, %c0_133] : memref<12x32xf32, #tpu.memory_space<vmem>>, vector<1x32xf32>
    %318 = arith.select %28, %316, %317 : vector<1x32xi1>, vector<1x32xf32>
    %c5_134 = arith.constant 5 : index
    %c0_135 = arith.constant 0 : index
    %319 = vector.load %arg13[%c5_134, %c0_135] : memref<12x32xf32, #tpu.memory_space<vmem>>, vector<1x32xf32>
    tpu.vector_store %arg13[%c5_134, %c0_135], %318 {strides = array<i32>} : memref<12x32xf32, #tpu.memory_space<vmem>>, vector<1x32xf32>,
    %c5_136 = arith.constant 5 : index
    %c0_137 = arith.constant 0 : index
    %320 = vector.load %arg17[%c5_136, %c0_137] : memref<12x32xf32, #tpu.memory_space<vmem>>, vector<1x32xf32>
    %c6_138 = arith.constant 6 : index
    %c0_139 = arith.constant 0 : index
    %321 = vector.load %arg17[%c6_138, %c0_139] : memref<12x32xf32, #tpu.memory_space<vmem>>, vector<1x32xf32>
    %322 = arith.select %28, %320, %321 : vector<1x32xi1>, vector<1x32xf32>
    %c6_140 = arith.constant 6 : index
    %c0_141 = arith.constant 0 : index
    %323 = vector.load %arg13[%c6_140, %c0_141] : memref<12x32xf32, #tpu.memory_space<vmem>>, vector<1x32xf32>
    tpu.vector_store %arg13[%c6_140, %c0_141], %322 {strides = array<i32>} : memref<12x32xf32, #tpu.memory_space<vmem>>, vector<1x32xf32>,
    %c4_142 = arith.constant 4 : index
    %c0_143 = arith.constant 0 : index
    %324 = vector.load %arg17[%c4_142, %c0_143] : memref<12x32xf32, #tpu.memory_space<vmem>>, vector<1x32xf32>
    %c7_144 = arith.constant 7 : index
    %c0_145 = arith.constant 0 : index
    %325 = vector.load %arg17[%c7_144, %c0_145] : memref<12x32xf32, #tpu.memory_space<vmem>>, vector<1x32xf32>
    %326 = arith.select %28, %324, %325 : vector<1x32xi1>, vector<1x32xf32>
    %c7_146 = arith.constant 7 : index
    %c0_147 = arith.constant 0 : index
    %327 = vector.load %arg13[%c7_146, %c0_147] : memref<12x32xf32, #tpu.memory_space<vmem>>, vector<1x32xf32>
    tpu.vector_store %arg13[%c7_146, %c0_147], %326 {strides = array<i32>} : memref<12x32xf32, #tpu.memory_space<vmem>>, vector<1x32xf32>,
    %c3_148 = arith.constant 3 : index
    %c0_149 = arith.constant 0 : index
    %328 = vector.load %arg17[%c3_148, %c0_149] : memref<12x32xf32, #tpu.memory_space<vmem>>, vector<1x32xf32>
    %c8_150 = arith.constant 8 : index
    %c0_151 = arith.constant 0 : index
    %329 = vector.load %arg17[%c8_150, %c0_151] : memref<12x32xf32, #tpu.memory_space<vmem>>, vector<1x32xf32>
    %330 = arith.select %28, %328, %329 : vector<1x32xi1>, vector<1x32xf32>
    %c8_152 = arith.constant 8 : index
    %c0_153 = arith.constant 0 : index
    %331 = vector.load %arg13[%c8_152, %c0_153] : memref<12x32xf32, #tpu.memory_space<vmem>>, vector<1x32xf32>
    tpu.vector_store %arg13[%c8_152, %c0_153], %330 {strides = array<i32>} : memref<12x32xf32, #tpu.memory_space<vmem>>, vector<1x32xf32>,
    %c2_154 = arith.constant 2 : index
    %c0_155 = arith.constant 0 : index
    %332 = vector.load %arg17[%c2_154, %c0_155] : memref<12x32xf32, #tpu.memory_space<vmem>>, vector<1x32xf32>
    %c9_156 = arith.constant 9 : index
    %c0_157 = arith.constant 0 : index
    %333 = vector.load %arg17[%c9_156, %c0_157] : memref<12x32xf32, #tpu.memory_space<vmem>>, vector<1x32xf32>
    %334 = arith.select %28, %332, %333 : vector<1x32xi1>, vector<1x32xf32>
    %c9_158 = arith.constant 9 : index
    %c0_159 = arith.constant 0 : index
    %335 = vector.load %arg13[%c9_158, %c0_159] : memref<12x32xf32, #tpu.memory_space<vmem>>, vector<1x32xf32>
    tpu.vector_store %arg13[%c9_158, %c0_159], %334 {strides = array<i32>} : memref<12x32xf32, #tpu.memory_space<vmem>>, vector<1x32xf32>,
    %c1_160 = arith.constant 1 : index
    %c0_161 = arith.constant 0 : index
    %336 = vector.load %arg17[%c1_160, %c0_161] : memref<12x32xf32, #tpu.memory_space<vmem>>, vector<1x32xf32>
    %c10_162 = arith.constant 10 : index
    %c0_163 = arith.constant 0 : index
    %337 = vector.load %arg17[%c10_162, %c0_163] : memref<12x32xf32, #tpu.memory_space<vmem>>, vector<1x32xf32>
    %338 = arith.select %28, %336, %337 : vector<1x32xi1>, vector<1x32xf32>
    %c10_164 = arith.constant 10 : index
    %c0_165 = arith.constant 0 : index
    %339 = vector.load %arg13[%c10_164, %c0_165] : memref<12x32xf32, #tpu.memory_space<vmem>>, vector<1x32xf32>
    tpu.vector_store %arg13[%c10_164, %c0_165], %338 {strides = array<i32>} : memref<12x32xf32, #tpu.memory_space<vmem>>, vector<1x32xf32>,
    %c0_166 = arith.constant 0 : index
    %c0_167 = arith.constant 0 : index
    %340 = vector.load %arg17[%c0_166, %c0_167] : memref<12x32xf32, #tpu.memory_space<vmem>>, vector<1x32xf32>
    %c11_168 = arith.constant 11 : index
    %c0_169 = arith.constant 0 : index
    %341 = vector.load %arg17[%c11_168, %c0_169] : memref<12x32xf32, #tpu.memory_space<vmem>>, vector<1x32xf32>
    %342 = arith.select %28, %340, %341 : vector<1x32xi1>, vector<1x32xf32>
    %c11_170 = arith.constant 11 : index
    %c0_171 = arith.constant 0 : index
    %343 = vector.load %arg13[%c11_170, %c0_171] : memref<12x32xf32, #tpu.memory_space<vmem>>, vector<1x32xf32>
    tpu.vector_store %arg13[%c11_170, %c0_171], %342 {strides = array<i32>} : memref<12x32xf32, #tpu.memory_space<vmem>>, vector<1x32xf32>,
    %c0_172 = arith.constant 0 : index
    %344 = memref.load %arg0[%c0_172] : memref<2xi32, #tpu.memory_space<smem>>
    %c1_173 = arith.constant 1 : index
    %345 = memref.load %arg0[%c1_173] : memref<2xi32, #tpu.memory_space<smem>>
    %c0_174 = arith.constant 0 : index
    %c0_175 = arith.constant 0 : index
    %346 = vector.load %arg2[%c0_174, %c0_175] : memref<8x32xf32, #tpu.memory_space<vmem>>, vector<8x32xf32>
    %c0_176 = arith.constant 0 : index
    %c0_177 = arith.constant 0 : index
    %347 = vector.load %arg6[%c0_176, %c0_177] : memref<32x128xf32, #tpu.memory_space<vmem>>, vector<32x128xf32>
    %cst_178 = arith.constant dense<0.000000e+00> : vector<8x128xf32>
    %348 = tpu.matmul %346, %347, %cst_178 {dimension_numbers = #tpu.dot_dimension_numbers<[1], [0], [0], [1], [0, 0, 1, 1], [], []>} : vector<8x32xf32>, vector<32x128xf32>, vector<8x128xf32> -> vector<8x128xf32>
    %c0_179 = arith.constant 0 : index
    %c0_180 = arith.constant 0 : index
    %349 = vector.load %arg8[%c0_179, %c0_180] : memref<1x128xf32, #tpu.memory_space<vmem>>, vector<1x128xf32>
    %350 = vector.broadcast %349 : vector<1x128xf32> to vector<8x128xf32>
    %351 = arith.addf %348, %350 : vector<8x128xf32>
    %c0_181 = arith.constant 0 : index
    %c0_182 = arith.constant 0 : index
    %352 = vector.load %arg16[%c0_181, %c0_182] : memref<8x128xf32, #tpu.memory_space<vmem>>, vector<8x128xf32>
    tpu.vector_store %arg16[%c0_181, %c0_182], %351 {strides = array<i32>} : memref<8x128xf32, #tpu.memory_space<vmem>>, vector<8x128xf32>,
    %353 = tpu.iota {dimensions = array<i32: 1>} : vector<1x128xi32>
    %c32_i32_183 = arith.constant 32 : i32
    %c0_i32_184 = arith.constant 0 : i32
    %354 = arith.cmpi eq, %c32_i32_183, %c0_i32_184 : i32
    %c1_i32_185 = arith.constant 1 : i32
    %355 = arith.select %354, %c1_i32_185, %c32_i32_183 : i32
    %356 = vector.broadcast %355 : i32 to vector<1x128xi32>
    %357 = arith.remsi %353, %356 : vector<1x128xi32>
    %c0_i32_186 = arith.constant 0 : i32
    %358 = vector.broadcast %c0_i32_186 : i32 to vector<1x128xi32>
    %359 = arith.cmpi ne, %357, %358 : vector<1x128xi32>
    %c0_i32_187 = arith.constant 0 : i32
    %360 = vector.broadcast %c0_i32_187 : i32 to vector<1x128xi32>
    %361 = arith.cmpi slt, %357, %360 : vector<1x128xi32>
    %c0_i32_188 = arith.constant 0 : i32
    %362 = arith.cmpi slt, %355, %c0_i32_188 : i32
    %363 = vector.broadcast %362 : i1 to vector<1x128xi1>
    %364 = vector.broadcast %363 : vector<1x128xi1> to vector<1x128xi1>
    %365 = arith.xori %361, %364 : vector<1x128xi1>
    %366 = arith.andi %365, %359 : vector<1x128xi1>
    %367 = vector.broadcast %355 : i32 to vector<1x128xi32>
    %368 = arith.addi %357, %367 : vector<1x128xi32>
    %369 = arith.select %366, %368, %357 : vector<1x128xi1>, vector<1x128xi32>
    %c16_i32_189 = arith.constant 16 : i32
    %370 = vector.broadcast %c16_i32_189 : i32 to vector<1x128xi32>
    %371 = arith.cmpi sge, %369, %370 : vector<1x128xi32>
    %372 = tpu.iota {dimensions = array<i32: 1>} : vector<1x32xi32>
    %c16_i32_190 = arith.constant 16 : i32
    %373 = vector.broadcast %c16_i32_190 : i32 to vector<1x32xi32>
    %374 = arith.cmpi slt, %372, %373 : vector<1x32xi32>
    %375 = arith.extui %374 : vector<1x32xi1> to vector<1x32xi32>
    %376 = arith.sitofp %375 : vector<1x32xi32> to vector<1x32xf32>
    %cst_191 = arith.constant 1.000000e+00 : f32
    %377 = vector.broadcast %cst_191 : f32 to vector<1x32xf32>
    %378 = arith.subf %377, %376 : vector<1x32xf32>
    %c0_192 = arith.constant 0 : index
    %c0_193 = arith.constant 0 : index
    %379 = vector.load %arg7[%c0_192, %c0_193] : memref<32x128xf32, #tpu.memory_space<vmem>>, vector<32x128xf32>
    %cst_194 = arith.constant 0.000000e+00 : f32
    %380 = vector.broadcast %cst_194 : f32 to vector<1x32xf32>
    %cst_195 = arith.constant 0.000000e+00 : f32
    %381 = vector.broadcast %cst_195 : f32 to vector<1x32xf32>
    %cst_196 = arith.constant 0.000000e+00 : f32
    %382 = vector.broadcast %cst_196 : f32 to vector<1x32xf32>
    %c0_197 = arith.constant 0 : index
    %c0_198 = arith.constant 0 : index
    %383 = vector.load %arg16[%c0_197, %c0_198] : memref<8x128xf32, #tpu.memory_space<vmem>>, vector<1x128xf32>
    %c7_199 = arith.constant 7 : index
    %c0_200 = arith.constant 0 : index
    %384 = vector.load %arg16[%c7_199, %c0_200] : memref<8x128xf32, #tpu.memory_space<vmem>>, vector<1x128xf32>
    %385 = arith.select %371, %384, %383 : vector<1x128xi1>, vector<1x128xf32>
    %cst_201 = arith.constant dense<0.000000e+00> : vector<1x128xf32>
    %386 = tpu.matmul %380, %379, %cst_201 {dimension_numbers = #tpu.dot_dimension_numbers<[1], [0], [0], [1], [0, 0, 1, 1], [], []>} : vector<1x32xf32>, vector<32x128xf32>, vector<1x128xf32> -> vector<1x128xf32>
    %387 = arith.addf %385, %386 : vector<1x128xf32>
    %388 = vector.extract_strided_slice %387 {offsets = [0, 0], sizes = [1, 96], strides = [1, 1]} : vector<1x128xf32> to vector<1x96xf32>
    %389 = arith.negf %388 : vector<1x96xf32>
    %390 = math.exp %389 : vector<1x96xf32>
    %cst_202 = arith.constant 1.000000e+00 : f32
    %391 = vector.broadcast %cst_202 : f32 to vector<1x96xf32>
    %392 = arith.addf %391, %390 : vector<1x96xf32>
    %393 = arith.divf %391, %392 : vector<1x96xf32>
    %394 = vector.extract_strided_slice %393 {offsets = [0, 0], sizes = [1, 32], strides = [1, 1]} : vector<1x96xf32> to vector<1x32xf32>
    %395 = vector.extract_strided_slice %393 {offsets = [0, 32], sizes = [1, 32], strides = [1, 1]} : vector<1x96xf32> to vector<1x32xf32>
    %396 = vector.extract_strided_slice %393 {offsets = [0, 64], sizes = [1, 32], strides = [1, 1]} : vector<1x96xf32> to vector<1x32xf32>
    %397 = vector.extract_strided_slice %387 {offsets = [0, 96], sizes = [1, 32], strides = [1, 1]} : vector<1x128xf32> to vector<1x32xf32>
    %398 = math.tanh %397 : vector<1x32xf32>
    %399 = arith.mulf %395, %381 : vector<1x32xf32>
    %400 = arith.mulf %394, %398 : vector<1x32xf32>
    %401 = arith.addf %399, %400 : vector<1x32xf32>
    %402 = math.tanh %401 : vector<1x32xf32>
    %403 = arith.mulf %396, %402 : vector<1x32xf32>
    %c0_i32_203 = arith.constant 0 : i32
    %404 = arith.cmpi sle, %344, %c0_i32_203 : i32
    %c0_i32_204 = arith.constant 0 : i32
    %405 = arith.cmpi sgt, %345, %c0_i32_204 : i32
    %406 = arith.andi %404, %405 : i1
    %407 = arith.extui %406 : i1 to i32
    %408 = arith.sitofp %407 : i32 to f32
    %c7_i32 = arith.constant 7 : i32
    %409 = arith.cmpi sle, %344, %c7_i32 : i32
    %c7_i32_205 = arith.constant 7 : i32
    %410 = arith.cmpi sgt, %345, %c7_i32_205 : i32
    %411 = arith.andi %409, %410 : i1
    %412 = arith.extui %411 : i1 to i32
    %413 = arith.sitofp %412 : i32 to f32
    %414 = vector.broadcast %408 : f32 to vector<1x32xf32>
    %415 = arith.mulf %414, %376 : vector<1x32xf32>
    %416 = vector.broadcast %413 : f32 to vector<1x32xf32>
    %417 = arith.mulf %416, %378 : vector<1x32xf32>
    %418 = arith.addf %415, %417 : vector<1x32xf32>
    %419 = arith.mulf %403, %418 : vector<1x32xf32>
    %420 = arith.addf %382, %419 : vector<1x32xf32>
    %c1_206 = arith.constant 1 : index
    %c0_207 = arith.constant 0 : index
    %421 = vector.load %arg16[%c1_206, %c0_207] : memref<8x128xf32, #tpu.memory_space<vmem>>, vector<1x128xf32>
    %c6_208 = arith.constant 6 : index
    %c0_209 = arith.constant 0 : index
    %422 = vector.load %arg16[%c6_208, %c0_209] : memref<8x128xf32, #tpu.memory_space<vmem>>, vector<1x128xf32>
    %423 = arith.select %371, %422, %421 : vector<1x128xi1>, vector<1x128xf32>
    %cst_210 = arith.constant dense<0.000000e+00> : vector<1x128xf32>
    %424 = tpu.matmul %403, %379, %cst_210 {dimension_numbers = #tpu.dot_dimension_numbers<[1], [0], [0], [1], [0, 0, 1, 1], [], []>} : vector<1x32xf32>, vector<32x128xf32>, vector<1x128xf32> -> vector<1x128xf32>
    %425 = arith.addf %423, %424 : vector<1x128xf32>
    %426 = vector.extract_strided_slice %425 {offsets = [0, 0], sizes = [1, 96], strides = [1, 1]} : vector<1x128xf32> to vector<1x96xf32>
    %427 = arith.negf %426 : vector<1x96xf32>
    %428 = math.exp %427 : vector<1x96xf32>
    %cst_211 = arith.constant 1.000000e+00 : f32
    %429 = vector.broadcast %cst_211 : f32 to vector<1x96xf32>
    %430 = arith.addf %429, %428 : vector<1x96xf32>
    %431 = arith.divf %429, %430 : vector<1x96xf32>
    %432 = vector.extract_strided_slice %431 {offsets = [0, 0], sizes = [1, 32], strides = [1, 1]} : vector<1x96xf32> to vector<1x32xf32>
    %433 = vector.extract_strided_slice %431 {offsets = [0, 32], sizes = [1, 32], strides = [1, 1]} : vector<1x96xf32> to vector<1x32xf32>
    %434 = vector.extract_strided_slice %431 {offsets = [0, 64], sizes = [1, 32], strides = [1, 1]} : vector<1x96xf32> to vector<1x32xf32>
    %435 = vector.extract_strided_slice %425 {offsets = [0, 96], sizes = [1, 32], strides = [1, 1]} : vector<1x128xf32> to vector<1x32xf32>
    %436 = math.tanh %435 : vector<1x32xf32>
    %437 = arith.mulf %433, %401 : vector<1x32xf32>
    %438 = arith.mulf %432, %436 : vector<1x32xf32>
    %439 = arith.addf %437, %438 : vector<1x32xf32>
    %440 = math.tanh %439 : vector<1x32xf32>
    %441 = arith.mulf %434, %440 : vector<1x32xf32>
    %c1_i32_212 = arith.constant 1 : i32
    %442 = arith.cmpi sle, %344, %c1_i32_212 : i32
    %c1_i32_213 = arith.constant 1 : i32
    %443 = arith.cmpi sgt, %345, %c1_i32_213 : i32
    %444 = arith.andi %442, %443 : i1
    %445 = arith.extui %444 : i1 to i32
    %446 = arith.sitofp %445 : i32 to f32
    %c6_i32 = arith.constant 6 : i32
    %447 = arith.cmpi sle, %344, %c6_i32 : i32
    %c6_i32_214 = arith.constant 6 : i32
    %448 = arith.cmpi sgt, %345, %c6_i32_214 : i32
    %449 = arith.andi %447, %448 : i1
    %450 = arith.extui %449 : i1 to i32
    %451 = arith.sitofp %450 : i32 to f32
    %452 = vector.broadcast %446 : f32 to vector<1x32xf32>
    %453 = arith.mulf %452, %376 : vector<1x32xf32>
    %454 = vector.broadcast %451 : f32 to vector<1x32xf32>
    %455 = arith.mulf %454, %378 : vector<1x32xf32>
    %456 = arith.addf %453, %455 : vector<1x32xf32>
    %457 = arith.mulf %441, %456 : vector<1x32xf32>
    %458 = arith.addf %420, %457 : vector<1x32xf32>
    %c2_215 = arith.constant 2 : index
    %c0_216 = arith.constant 0 : index
    %459 = vector.load %arg16[%c2_215, %c0_216] : memref<8x128xf32, #tpu.memory_space<vmem>>, vector<1x128xf32>
    %c5_217 = arith.constant 5 : index
    %c0_218 = arith.constant 0 : index
    %460 = vector.load %arg16[%c5_217, %c0_218] : memref<8x128xf32, #tpu.memory_space<vmem>>, vector<1x128xf32>
    %461 = arith.select %371, %460, %459 : vector<1x128xi1>, vector<1x128xf32>
    %cst_219 = arith.constant dense<0.000000e+00> : vector<1x128xf32>
    %462 = tpu.matmul %441, %379, %cst_219 {dimension_numbers = #tpu.dot_dimension_numbers<[1], [0], [0], [1], [0, 0, 1, 1], [], []>} : vector<1x32xf32>, vector<32x128xf32>, vector<1x128xf32> -> vector<1x128xf32>
    %463 = arith.addf %461, %462 : vector<1x128xf32>
    %464 = vector.extract_strided_slice %463 {offsets = [0, 0], sizes = [1, 96], strides = [1, 1]} : vector<1x128xf32> to vector<1x96xf32>
    %465 = arith.negf %464 : vector<1x96xf32>
    %466 = math.exp %465 : vector<1x96xf32>
    %cst_220 = arith.constant 1.000000e+00 : f32
    %467 = vector.broadcast %cst_220 : f32 to vector<1x96xf32>
    %468 = arith.addf %467, %466 : vector<1x96xf32>
    %469 = arith.divf %467, %468 : vector<1x96xf32>
    %470 = vector.extract_strided_slice %469 {offsets = [0, 0], sizes = [1, 32], strides = [1, 1]} : vector<1x96xf32> to vector<1x32xf32>
    %471 = vector.extract_strided_slice %469 {offsets = [0, 32], sizes = [1, 32], strides = [1, 1]} : vector<1x96xf32> to vector<1x32xf32>
    %472 = vector.extract_strided_slice %469 {offsets = [0, 64], sizes = [1, 32], strides = [1, 1]} : vector<1x96xf32> to vector<1x32xf32>
    %473 = vector.extract_strided_slice %463 {offsets = [0, 96], sizes = [1, 32], strides = [1, 1]} : vector<1x128xf32> to vector<1x32xf32>
    %474 = math.tanh %473 : vector<1x32xf32>
    %475 = arith.mulf %471, %439 : vector<1x32xf32>
    %476 = arith.mulf %470, %474 : vector<1x32xf32>
    %477 = arith.addf %475, %476 : vector<1x32xf32>
    %478 = math.tanh %477 : vector<1x32xf32>
    %479 = arith.mulf %472, %478 : vector<1x32xf32>
    %c2_i32 = arith.constant 2 : i32
    %480 = arith.cmpi sle, %344, %c2_i32 : i32
    %c2_i32_221 = arith.constant 2 : i32
    %481 = arith.cmpi sgt, %345, %c2_i32_221 : i32
    %482 = arith.andi %480, %481 : i1
    %483 = arith.extui %482 : i1 to i32
    %484 = arith.sitofp %483 : i32 to f32
    %c5_i32 = arith.constant 5 : i32
    %485 = arith.cmpi sle, %344, %c5_i32 : i32
    %c5_i32_222 = arith.constant 5 : i32
    %486 = arith.cmpi sgt, %345, %c5_i32_222 : i32
    %487 = arith.andi %485, %486 : i1
    %488 = arith.extui %487 : i1 to i32
    %489 = arith.sitofp %488 : i32 to f32
    %490 = vector.broadcast %484 : f32 to vector<1x32xf32>
    %491 = arith.mulf %490, %376 : vector<1x32xf32>
    %492 = vector.broadcast %489 : f32 to vector<1x32xf32>
    %493 = arith.mulf %492, %378 : vector<1x32xf32>
    %494 = arith.addf %491, %493 : vector<1x32xf32>
    %495 = arith.mulf %479, %494 : vector<1x32xf32>
    %496 = arith.addf %458, %495 : vector<1x32xf32>
    %c3_223 = arith.constant 3 : index
    %c0_224 = arith.constant 0 : index
    %497 = vector.load %arg16[%c3_223, %c0_224] : memref<8x128xf32, #tpu.memory_space<vmem>>, vector<1x128xf32>
    %c4_225 = arith.constant 4 : index
    %c0_226 = arith.constant 0 : index
    %498 = vector.load %arg16[%c4_225, %c0_226] : memref<8x128xf32, #tpu.memory_space<vmem>>, vector<1x128xf32>
    %499 = arith.select %371, %498, %497 : vector<1x128xi1>, vector<1x128xf32>
    %cst_227 = arith.constant dense<0.000000e+00> : vector<1x128xf32>
    %500 = tpu.matmul %479, %379, %cst_227 {dimension_numbers = #tpu.dot_dimension_numbers<[1], [0], [0], [1], [0, 0, 1, 1], [], []>} : vector<1x32xf32>, vector<32x128xf32>, vector<1x128xf32> -> vector<1x128xf32>
    %501 = arith.addf %499, %500 : vector<1x128xf32>
    %502 = vector.extract_strided_slice %501 {offsets = [0, 0], sizes = [1, 96], strides = [1, 1]} : vector<1x128xf32> to vector<1x96xf32>
    %503 = arith.negf %502 : vector<1x96xf32>
    %504 = math.exp %503 : vector<1x96xf32>
    %cst_228 = arith.constant 1.000000e+00 : f32
    %505 = vector.broadcast %cst_228 : f32 to vector<1x96xf32>
    %506 = arith.addf %505, %504 : vector<1x96xf32>
    %507 = arith.divf %505, %506 : vector<1x96xf32>
    %508 = vector.extract_strided_slice %507 {offsets = [0, 0], sizes = [1, 32], strides = [1, 1]} : vector<1x96xf32> to vector<1x32xf32>
    %509 = vector.extract_strided_slice %507 {offsets = [0, 32], sizes = [1, 32], strides = [1, 1]} : vector<1x96xf32> to vector<1x32xf32>
    %510 = vector.extract_strided_slice %507 {offsets = [0, 64], sizes = [1, 32], strides = [1, 1]} : vector<1x96xf32> to vector<1x32xf32>
    %511 = vector.extract_strided_slice %501 {offsets = [0, 96], sizes = [1, 32], strides = [1, 1]} : vector<1x128xf32> to vector<1x32xf32>
    %512 = math.tanh %511 : vector<1x32xf32>
    %513 = arith.mulf %509, %477 : vector<1x32xf32>
    %514 = arith.mulf %508, %512 : vector<1x32xf32>
    %515 = arith.addf %513, %514 : vector<1x32xf32>
    %516 = math.tanh %515 : vector<1x32xf32>
    %517 = arith.mulf %510, %516 : vector<1x32xf32>
    %c3_i32 = arith.constant 3 : i32
    %518 = arith.cmpi sle, %344, %c3_i32 : i32
    %c3_i32_229 = arith.constant 3 : i32
    %519 = arith.cmpi sgt, %345, %c3_i32_229 : i32
    %520 = arith.andi %518, %519 : i1
    %521 = arith.extui %520 : i1 to i32
    %522 = arith.sitofp %521 : i32 to f32
    %c4_i32 = arith.constant 4 : i32
    %523 = arith.cmpi sle, %344, %c4_i32 : i32
    %c4_i32_230 = arith.constant 4 : i32
    %524 = arith.cmpi sgt, %345, %c4_i32_230 : i32
    %525 = arith.andi %523, %524 : i1
    %526 = arith.extui %525 : i1 to i32
    %527 = arith.sitofp %526 : i32 to f32
    %528 = vector.broadcast %522 : f32 to vector<1x32xf32>
    %529 = arith.mulf %528, %376 : vector<1x32xf32>
    %530 = vector.broadcast %527 : f32 to vector<1x32xf32>
    %531 = arith.mulf %530, %378 : vector<1x32xf32>
    %532 = arith.addf %529, %531 : vector<1x32xf32>
    %533 = arith.mulf %517, %532 : vector<1x32xf32>
    %534 = arith.addf %496, %533 : vector<1x32xf32>
    %c4_231 = arith.constant 4 : index
    %c0_232 = arith.constant 0 : index
    %535 = vector.load %arg16[%c4_231, %c0_232] : memref<8x128xf32, #tpu.memory_space<vmem>>, vector<1x128xf32>
    %c3_233 = arith.constant 3 : index
    %c0_234 = arith.constant 0 : index
    %536 = vector.load %arg16[%c3_233, %c0_234] : memref<8x128xf32, #tpu.memory_space<vmem>>, vector<1x128xf32>
    %537 = arith.select %371, %536, %535 : vector<1x128xi1>, vector<1x128xf32>
    %cst_235 = arith.constant dense<0.000000e+00> : vector<1x128xf32>
    %538 = tpu.matmul %517, %379, %cst_235 {dimension_numbers = #tpu.dot_dimension_numbers<[1], [0], [0], [1], [0, 0, 1, 1], [], []>} : vector<1x32xf32>, vector<32x128xf32>, vector<1x128xf32> -> vector<1x128xf32>
    %539 = arith.addf %537, %538 : vector<1x128xf32>
    %540 = vector.extract_strided_slice %539 {offsets = [0, 0], sizes = [1, 96], strides = [1, 1]} : vector<1x128xf32> to vector<1x96xf32>
    %541 = arith.negf %540 : vector<1x96xf32>
    %542 = math.exp %541 : vector<1x96xf32>
    %cst_236 = arith.constant 1.000000e+00 : f32
    %543 = vector.broadcast %cst_236 : f32 to vector<1x96xf32>
    %544 = arith.addf %543, %542 : vector<1x96xf32>
    %545 = arith.divf %543, %544 : vector<1x96xf32>
    %546 = vector.extract_strided_slice %545 {offsets = [0, 0], sizes = [1, 32], strides = [1, 1]} : vector<1x96xf32> to vector<1x32xf32>
    %547 = vector.extract_strided_slice %545 {offsets = [0, 32], sizes = [1, 32], strides = [1, 1]} : vector<1x96xf32> to vector<1x32xf32>
    %548 = vector.extract_strided_slice %545 {offsets = [0, 64], sizes = [1, 32], strides = [1, 1]} : vector<1x96xf32> to vector<1x32xf32>
    %549 = vector.extract_strided_slice %539 {offsets = [0, 96], sizes = [1, 32], strides = [1, 1]} : vector<1x128xf32> to vector<1x32xf32>
    %550 = math.tanh %549 : vector<1x32xf32>
    %551 = arith.mulf %547, %515 : vector<1x32xf32>
    %552 = arith.mulf %546, %550 : vector<1x32xf32>
    %553 = arith.addf %551, %552 : vector<1x32xf32>
    %554 = math.tanh %553 : vector<1x32xf32>
    %555 = arith.mulf %548, %554 : vector<1x32xf32>
    %c4_i32_237 = arith.constant 4 : i32
    %556 = arith.cmpi sle, %344, %c4_i32_237 : i32
    %c4_i32_238 = arith.constant 4 : i32
    %557 = arith.cmpi sgt, %345, %c4_i32_238 : i32
    %558 = arith.andi %556, %557 : i1
    %559 = arith.extui %558 : i1 to i32
    %560 = arith.sitofp %559 : i32 to f32
    %c3_i32_239 = arith.constant 3 : i32
    %561 = arith.cmpi sle, %344, %c3_i32_239 : i32
    %c3_i32_240 = arith.constant 3 : i32
    %562 = arith.cmpi sgt, %345, %c3_i32_240 : i32
    %563 = arith.andi %561, %562 : i1
    %564 = arith.extui %563 : i1 to i32
    %565 = arith.sitofp %564 : i32 to f32
    %566 = vector.broadcast %560 : f32 to vector<1x32xf32>
    %567 = arith.mulf %566, %376 : vector<1x32xf32>
    %568 = vector.broadcast %565 : f32 to vector<1x32xf32>
    %569 = arith.mulf %568, %378 : vector<1x32xf32>
    %570 = arith.addf %567, %569 : vector<1x32xf32>
    %571 = arith.mulf %555, %570 : vector<1x32xf32>
    %572 = arith.addf %534, %571 : vector<1x32xf32>
    %c5_241 = arith.constant 5 : index
    %c0_242 = arith.constant 0 : index
    %573 = vector.load %arg16[%c5_241, %c0_242] : memref<8x128xf32, #tpu.memory_space<vmem>>, vector<1x128xf32>
    %c2_243 = arith.constant 2 : index
    %c0_244 = arith.constant 0 : index
    %574 = vector.load %arg16[%c2_243, %c0_244] : memref<8x128xf32, #tpu.memory_space<vmem>>, vector<1x128xf32>
    %575 = arith.select %371, %574, %573 : vector<1x128xi1>, vector<1x128xf32>
    %cst_245 = arith.constant dense<0.000000e+00> : vector<1x128xf32>
    %576 = tpu.matmul %555, %379, %cst_245 {dimension_numbers = #tpu.dot_dimension_numbers<[1], [0], [0], [1], [0, 0, 1, 1], [], []>} : vector<1x32xf32>, vector<32x128xf32>, vector<1x128xf32> -> vector<1x128xf32>
    %577 = arith.addf %575, %576 : vector<1x128xf32>
    %578 = vector.extract_strided_slice %577 {offsets = [0, 0], sizes = [1, 96], strides = [1, 1]} : vector<1x128xf32> to vector<1x96xf32>
    %579 = arith.negf %578 : vector<1x96xf32>
    %580 = math.exp %579 : vector<1x96xf32>
    %cst_246 = arith.constant 1.000000e+00 : f32
    %581 = vector.broadcast %cst_246 : f32 to vector<1x96xf32>
    %582 = arith.addf %581, %580 : vector<1x96xf32>
    %583 = arith.divf %581, %582 : vector<1x96xf32>
    %584 = vector.extract_strided_slice %583 {offsets = [0, 0], sizes = [1, 32], strides = [1, 1]} : vector<1x96xf32> to vector<1x32xf32>
    %585 = vector.extract_strided_slice %583 {offsets = [0, 32], sizes = [1, 32], strides = [1, 1]} : vector<1x96xf32> to vector<1x32xf32>
    %586 = vector.extract_strided_slice %583 {offsets = [0, 64], sizes = [1, 32], strides = [1, 1]} : vector<1x96xf32> to vector<1x32xf32>
    %587 = vector.extract_strided_slice %577 {offsets = [0, 96], sizes = [1, 32], strides = [1, 1]} : vector<1x128xf32> to vector<1x32xf32>
    %588 = math.tanh %587 : vector<1x32xf32>
    %589 = arith.mulf %585, %553 : vector<1x32xf32>
    %590 = arith.mulf %584, %588 : vector<1x32xf32>
    %591 = arith.addf %589, %590 : vector<1x32xf32>
    %592 = math.tanh %591 : vector<1x32xf32>
    %593 = arith.mulf %586, %592 : vector<1x32xf32>
    %c5_i32_247 = arith.constant 5 : i32
    %594 = arith.cmpi sle, %344, %c5_i32_247 : i32
    %c5_i32_248 = arith.constant 5 : i32
    %595 = arith.cmpi sgt, %345, %c5_i32_248 : i32
    %596 = arith.andi %594, %595 : i1
    %597 = arith.extui %596 : i1 to i32
    %598 = arith.sitofp %597 : i32 to f32
    %c2_i32_249 = arith.constant 2 : i32
    %599 = arith.cmpi sle, %344, %c2_i32_249 : i32
    %c2_i32_250 = arith.constant 2 : i32
    %600 = arith.cmpi sgt, %345, %c2_i32_250 : i32
    %601 = arith.andi %599, %600 : i1
    %602 = arith.extui %601 : i1 to i32
    %603 = arith.sitofp %602 : i32 to f32
    %604 = vector.broadcast %598 : f32 to vector<1x32xf32>
    %605 = arith.mulf %604, %376 : vector<1x32xf32>
    %606 = vector.broadcast %603 : f32 to vector<1x32xf32>
    %607 = arith.mulf %606, %378 : vector<1x32xf32>
    %608 = arith.addf %605, %607 : vector<1x32xf32>
    %609 = arith.mulf %593, %608 : vector<1x32xf32>
    %610 = arith.addf %572, %609 : vector<1x32xf32>
    %c6_251 = arith.constant 6 : index
    %c0_252 = arith.constant 0 : index
    %611 = vector.load %arg16[%c6_251, %c0_252] : memref<8x128xf32, #tpu.memory_space<vmem>>, vector<1x128xf32>
    %c1_253 = arith.constant 1 : index
    %c0_254 = arith.constant 0 : index
    %612 = vector.load %arg16[%c1_253, %c0_254] : memref<8x128xf32, #tpu.memory_space<vmem>>, vector<1x128xf32>
    %613 = arith.select %371, %612, %611 : vector<1x128xi1>, vector<1x128xf32>
    %cst_255 = arith.constant dense<0.000000e+00> : vector<1x128xf32>
    %614 = tpu.matmul %593, %379, %cst_255 {dimension_numbers = #tpu.dot_dimension_numbers<[1], [0], [0], [1], [0, 0, 1, 1], [], []>} : vector<1x32xf32>, vector<32x128xf32>, vector<1x128xf32> -> vector<1x128xf32>
    %615 = arith.addf %613, %614 : vector<1x128xf32>
    %616 = vector.extract_strided_slice %615 {offsets = [0, 0], sizes = [1, 96], strides = [1, 1]} : vector<1x128xf32> to vector<1x96xf32>
    %617 = arith.negf %616 : vector<1x96xf32>
    %618 = math.exp %617 : vector<1x96xf32>
    %cst_256 = arith.constant 1.000000e+00 : f32
    %619 = vector.broadcast %cst_256 : f32 to vector<1x96xf32>
    %620 = arith.addf %619, %618 : vector<1x96xf32>
    %621 = arith.divf %619, %620 : vector<1x96xf32>
    %622 = vector.extract_strided_slice %621 {offsets = [0, 0], sizes = [1, 32], strides = [1, 1]} : vector<1x96xf32> to vector<1x32xf32>
    %623 = vector.extract_strided_slice %621 {offsets = [0, 32], sizes = [1, 32], strides = [1, 1]} : vector<1x96xf32> to vector<1x32xf32>
    %624 = vector.extract_strided_slice %621 {offsets = [0, 64], sizes = [1, 32], strides = [1, 1]} : vector<1x96xf32> to vector<1x32xf32>
    %625 = vector.extract_strided_slice %615 {offsets = [0, 96], sizes = [1, 32], strides = [1, 1]} : vector<1x128xf32> to vector<1x32xf32>
    %626 = math.tanh %625 : vector<1x32xf32>
    %627 = arith.mulf %623, %591 : vector<1x32xf32>
    %628 = arith.mulf %622, %626 : vector<1x32xf32>
    %629 = arith.addf %627, %628 : vector<1x32xf32>
    %630 = math.tanh %629 : vector<1x32xf32>
    %631 = arith.mulf %624, %630 : vector<1x32xf32>
    %c6_i32_257 = arith.constant 6 : i32
    %632 = arith.cmpi sle, %344, %c6_i32_257 : i32
    %c6_i32_258 = arith.constant 6 : i32
    %633 = arith.cmpi sgt, %345, %c6_i32_258 : i32
    %634 = arith.andi %632, %633 : i1
    %635 = arith.extui %634 : i1 to i32
    %636 = arith.sitofp %635 : i32 to f32
    %c1_i32_259 = arith.constant 1 : i32
    %637 = arith.cmpi sle, %344, %c1_i32_259 : i32
    %c1_i32_260 = arith.constant 1 : i32
    %638 = arith.cmpi sgt, %345, %c1_i32_260 : i32
    %639 = arith.andi %637, %638 : i1
    %640 = arith.extui %639 : i1 to i32
    %641 = arith.sitofp %640 : i32 to f32
    %642 = vector.broadcast %636 : f32 to vector<1x32xf32>
    %643 = arith.mulf %642, %376 : vector<1x32xf32>
    %644 = vector.broadcast %641 : f32 to vector<1x32xf32>
    %645 = arith.mulf %644, %378 : vector<1x32xf32>
    %646 = arith.addf %643, %645 : vector<1x32xf32>
    %647 = arith.mulf %631, %646 : vector<1x32xf32>
    %648 = arith.addf %610, %647 : vector<1x32xf32>
    %c7_261 = arith.constant 7 : index
    %c0_262 = arith.constant 0 : index
    %649 = vector.load %arg16[%c7_261, %c0_262] : memref<8x128xf32, #tpu.memory_space<vmem>>, vector<1x128xf32>
    %c0_263 = arith.constant 0 : index
    %c0_264 = arith.constant 0 : index
    %650 = vector.load %arg16[%c0_263, %c0_264] : memref<8x128xf32, #tpu.memory_space<vmem>>, vector<1x128xf32>
    %651 = arith.select %371, %650, %649 : vector<1x128xi1>, vector<1x128xf32>
    %cst_265 = arith.constant dense<0.000000e+00> : vector<1x128xf32>
    %652 = tpu.matmul %631, %379, %cst_265 {dimension_numbers = #tpu.dot_dimension_numbers<[1], [0], [0], [1], [0, 0, 1, 1], [], []>} : vector<1x32xf32>, vector<32x128xf32>, vector<1x128xf32> -> vector<1x128xf32>
    %653 = arith.addf %651, %652 : vector<1x128xf32>
    %654 = vector.extract_strided_slice %653 {offsets = [0, 0], sizes = [1, 96], strides = [1, 1]} : vector<1x128xf32> to vector<1x96xf32>
    %655 = arith.negf %654 : vector<1x96xf32>
    %656 = math.exp %655 : vector<1x96xf32>
    %cst_266 = arith.constant 1.000000e+00 : f32
    %657 = vector.broadcast %cst_266 : f32 to vector<1x96xf32>
    %658 = arith.addf %657, %656 : vector<1x96xf32>
    %659 = arith.divf %657, %658 : vector<1x96xf32>
    %660 = vector.extract_strided_slice %659 {offsets = [0, 0], sizes = [1, 32], strides = [1, 1]} : vector<1x96xf32> to vector<1x32xf32>
    %661 = vector.extract_strided_slice %659 {offsets = [0, 32], sizes = [1, 32], strides = [1, 1]} : vector<1x96xf32> to vector<1x32xf32>
    %662 = vector.extract_strided_slice %659 {offsets = [0, 64], sizes = [1, 32], strides = [1, 1]} : vector<1x96xf32> to vector<1x32xf32>
    %663 = vector.extract_strided_slice %653 {offsets = [0, 96], sizes = [1, 32], strides = [1, 1]} : vector<1x128xf32> to vector<1x32xf32>
    %664 = math.tanh %663 : vector<1x32xf32>
    %665 = arith.mulf %661, %629 : vector<1x32xf32>
    %666 = arith.mulf %660, %664 : vector<1x32xf32>
    %667 = arith.addf %665, %666 : vector<1x32xf32>
    %668 = math.tanh %667 : vector<1x32xf32>
    %669 = arith.mulf %662, %668 : vector<1x32xf32>
    %c7_i32_267 = arith.constant 7 : i32
    %670 = arith.cmpi sle, %344, %c7_i32_267 : i32
    %c7_i32_268 = arith.constant 7 : i32
    %671 = arith.cmpi sgt, %345, %c7_i32_268 : i32
    %672 = arith.andi %670, %671 : i1
    %673 = arith.extui %672 : i1 to i32
    %674 = arith.sitofp %673 : i32 to f32
    %c0_i32_269 = arith.constant 0 : i32
    %675 = arith.cmpi sle, %344, %c0_i32_269 : i32
    %c0_i32_270 = arith.constant 0 : i32
    %676 = arith.cmpi sgt, %345, %c0_i32_270 : i32
    %677 = arith.andi %675, %676 : i1
    %678 = arith.extui %677 : i1 to i32
    %679 = arith.sitofp %678 : i32 to f32
    %680 = vector.broadcast %674 : f32 to vector<1x32xf32>
    %681 = arith.mulf %680, %376 : vector<1x32xf32>
    %682 = vector.broadcast %679 : f32 to vector<1x32xf32>
    %683 = arith.mulf %682, %378 : vector<1x32xf32>
    %684 = arith.addf %681, %683 : vector<1x32xf32>
    %685 = arith.mulf %669, %684 : vector<1x32xf32>
    %686 = arith.addf %648, %685 : vector<1x32xf32>
    %687 = arith.subi %345, %344 : i32
    %c1_i32_271 = arith.constant 1 : i32
    %688 = arith.maxsi %687, %c1_i32_271 : i32
    %689 = arith.sitofp %688 : i32 to f32
    %cst_272 = arith.constant 1.000000e+00 : f32
    %690 = arith.divf %cst_272, %689 : f32
    %691 = vector.broadcast %690 : f32 to vector<1x32xf32>
    %692 = arith.mulf %686, %691 : vector<1x32xf32>
    %c0_273 = arith.constant 0 : index
    %c0_274 = arith.constant 0 : index
    %693 = vector.load %arg9[%c0_273, %c0_274] : memref<64x128xf32, #tpu.memory_space<vmem>>, vector<32x128xf32>
    %cst_275 = arith.constant dense<0.000000e+00> : vector<1x128xf32>
    %694 = tpu.matmul %692, %693, %cst_275 {dimension_numbers = #tpu.dot_dimension_numbers<[1], [0], [0], [1], [0, 0, 1, 1], [], []>} : vector<1x32xf32>, vector<32x128xf32>, vector<1x128xf32> -> vector<1x128xf32>
    %c32 = arith.constant 32 : index
    %c0_276 = arith.constant 0 : index
    %695 = vector.load %arg9[%c32, %c0_276] : memref<64x128xf32, #tpu.memory_space<vmem>>, vector<32x128xf32>
    %cst_277 = arith.constant dense<0.000000e+00> : vector<1x128xf32>
    %696 = tpu.matmul %669, %695, %cst_277 {dimension_numbers = #tpu.dot_dimension_numbers<[1], [0], [0], [1], [0, 0, 1, 1], [], []>} : vector<1x32xf32>, vector<32x128xf32>, vector<1x128xf32> -> vector<1x128xf32>
    %697 = arith.addf %694, %696 : vector<1x128xf32>
    %c0_278 = arith.constant 0 : index
    %c0_279 = arith.constant 0 : index
    %698 = vector.load %arg10[%c0_278, %c0_279] : memref<1x128xf32, #tpu.memory_space<vmem>>, vector<1x128xf32>
    %699 = arith.addf %697, %698 : vector<1x128xf32>
    %cst_280 = arith.constant 0.000000e+00 : f32
    %700 = vector.broadcast %cst_280 : f32 to vector<1x128xf32>
    %701 = arith.maximumf %699, %700 : vector<1x128xf32>
    %c0_281 = arith.constant 0 : index
    %c0_282 = arith.constant 0 : index
    %702 = vector.load %arg11[%c0_281, %c0_282] : memref<128x128xf32, #tpu.memory_space<vmem>>, vector<128x128xf32>
    %cst_283 = arith.constant dense<0.000000e+00> : vector<1x128xf32>
    %703 = tpu.matmul %701, %702, %cst_283 {dimension_numbers = #tpu.dot_dimension_numbers<[1], [0], [0], [1], [0, 0, 1, 1], [], []>} : vector<1x128xf32>, vector<128x128xf32>, vector<1x128xf32> -> vector<1x128xf32>
    %c0_284 = arith.constant 0 : index
    %c0_285 = arith.constant 0 : index
    %704 = vector.load %arg12[%c0_284, %c0_285] : memref<1x128xf32, #tpu.memory_space<vmem>>, vector<1x128xf32>
    %705 = arith.addf %703, %704 : vector<1x128xf32>
    %c0_286 = arith.constant 0 : index
    %c0_287 = arith.constant 0 : index
    %706 = vector.load %arg14[%c0_286, %c0_287] : memref<1x128xf32, #tpu.memory_space<vmem>>, vector<1x128xf32>
    tpu.vector_store %arg14[%c0_286, %c0_287], %705 {strides = array<i32>} : memref<1x128xf32, #tpu.memory_space<vmem>>, vector<1x128xf32>,
    return
  }
}

</mosaic_0001>

<bundles_post_ra>
// kernel: tpu_custom_call.1
= control target key start
LH: loop header
LB: loop body
LE: loop exit
PB: predicated region body
PF: predicated region fallthrough
CT: control target
= control target key end

     0   :  { %20 = vsyncpa [#allocation8], 0  ;;  %s4844_s0 = inlined_call_operand.hbm [shape: s32[2], index: 0, kind: input, shape index: {}]   ;;  %s4845_s1 = inlined_call_operand.hbm [shape: f32[12,32], index: 1, kind: input, shape index: {}]   ;;  %s4846_s2 = inlined_call_operand.hbm [shape: f32[8,32], index: 2, kind: input, shape index: {}]   ;;  %s4847_s3 = inlined_call_operand.hbm [shape: f32[32,128], index: 3, kind: input, shape index: {}]   ;;  %s4848_s4 = inlined_call_operand.hbm [shape: f32[32,128], index: 4, kind: input, shape index: {}]   ;;  %s4849_s5 = inlined_call_operand.vmem [shape: f32[1,128], index: 5, kind: input, shape index: {}]   ;;  %s4850_s6 = inlined_call_operand.hbm [shape: f32[32,128], index: 6, kind: input, shape index: {}]   ;;  %s4851_s7 = inlined_call_operand.hbm [shape: f32[32,128], index: 7, kind: input, shape index: {}]   ;;  %s4852_s8 = inlined_call_operand.vmem [shape: f32[1,128], index: 8, kind: input, shape index: {}]   ;;  %s4853_s9 = inlined_call_operand.hbm [shape: f32[64,128], index: 9, kind: input, shape index: {}]   ;;  %s4854_s10 = inlined_call_operand.vmem [shape: f32[1,128], index: 10, kind: input, shape index: {}]   ;;  %s4855_s11 = inlined_call_operand.hbm [shape: f32[128,128], index: 11, kind: input, shape index: {}]   ;;  %s4856_s12 = inlined_call_operand.vmem [shape: f32[1,128], index: 12, kind: input, shape index: {}]   ;;  %s4857_s13 = inlined_call_operand.hbm [shape: f32[12,32], index: 13, kind: output, shape index: {0}]   ;;  %s4858_s14 = inlined_call_operand.hbm [shape: f32[1,128], index: 14, kind: output, shape index: {1}]  }
   0x1   :  { %21 = vsyncpa [#allocation6], 0 }
   0x2   :  { %22 = vsyncpa [#allocation11], 0 }
   0x3   :  { %23 = vsyncpa [#allocation14], 0 }
   0x4   :  { %24 = vsyncpa [#allocation17], 0 }
   0x5   :  { %25 = vsyncpa [#allocation20], 0 }
   0x6   :  { %26 = vsyncpa [#allocation7], 0 }
   0x7   :  { %27 = vsyncpa [#allocation23], 0  ;;  %s4012_s29 = smov [#allocation10]   ;;  %s3766_s17 = scalar_lea.hbm %s4846_s2, 128 }
   0x8   :  { %s54_s30 = sshll.u32 %s4012_s29, 4  ;;  %p3767_p0 = scmp.ne.s32.totalorder %s4846_s2, %s3766_s17  ;;  %s55_s30 = int_to_ptr.vmem [resolvable:$true] %s54_s30 }
   0x9   :  { %p3770_p1 = scmp.lt.u32.totalorder %s3766_s17, %s4846_s2 }
   0xb   :  { %p3772_p2 = pnand %p3770_p1, %p3767_p0 }
   0xd   :  { %3775 = shalt.err (!%p3772_p2)
}
   0xe   :  { %s3776_s22 = scalar_lea.vmem %s55_s30, 128  ;;  %p3781_p4 = scmp.lt.s32.totalorder %s55_s30, %s55_s30 }
   0xf   :  { %p3777_p3 = scmp.ne.s32.totalorder %s55_s30, %s3776_s22  ;;  %p3782_p5 = scmp.lt.s32.totalorder %s3776_s22, %s3776_s22 }
  0x11   :  { %p3783_p6 = por %p3782_p5, %p3781_p4 }
  0x13   :  { %p3784_p7 = pnand %p3783_p6, %p3777_p3 }
  0x15   :  { %3787 = shalt.err (!%p3784_p7)
}
  0x16   :  { %57 = dma.hbm_to_vmem [thread:$0]  %s4846_s2, 128, %s55_s30, [#allocation11]  }
  0x17   :  { %s4013_s25 = smov [#allocation13]   ;;  %s4014_s27 = smov [#allocation16]  }
  0x18   :  { %s75_s26 = sshll.u32 %s4013_s25, 4  ;;  %s101_s28 = sshll.u32 %s4014_s27, 4  ;;  %s76_s26 = int_to_ptr.vmem [resolvable:$true] %s75_s26  ;;  %s102_s28 = int_to_ptr.vmem [resolvable:$true] %s101_s28 }
  0x19   :  { %s3788_s16 = scalar_lea.hbm %s4848_s4, 512 }
  0x1a   :  { %p3789_p8 = scmp.ne.s32.totalorder %s4848_s4, %s3788_s16  ;;  %p3792_p9 = scmp.lt.u32.totalorder %s3788_s16, %s4848_s4 }
  0x1c   :  { %p3794_p10 = pnand %p3792_p9, %p3789_p8 }
  0x1e   :  { %3797 = shalt.err (!%p3794_p10)
}
  0x1f   :  { %s3798_s2 = scalar_lea.vmem %s76_s26, 512  ;;  %p3803_p12 = scmp.lt.s32.totalorder %s76_s26, %s76_s26 }
  0x20   :  { %p3799_p11 = scmp.ne.s32.totalorder %s76_s26, %s3798_s2  ;;  %p3804_p13 = scmp.lt.s32.totalorder %s3798_s2, %s3798_s2 }
  0x22   :  { %p3805_p0 = por %p3804_p13, %p3803_p12 }
  0x24   :  { %p3806_p1 = pnand %p3805_p0, %p3799_p11 }
  0x26   :  { %3809 = shalt.err (!%p3806_p1)
}
  0x27   :  { %s4015_s30 = smov 128   ;;  %s4016_s21 = smov 8  }
  0x28   :  { %81 = dma.hbm_to_vmem [thread:$0]  %s4848_s4, 512, %s76_s26, [#allocation14], %s4015_s30, %s4015_s30, %s4016_s21  }
  0x29   :  { %s3810_s27 = scalar_lea.hbm %s4851_s7, 512 }
  0x2a   :  { %p3811_p2 = scmp.ne.s32.totalorder %s4851_s7, %s3810_s27  ;;  %p3814_p3 = scmp.lt.u32.totalorder %s3810_s27, %s4851_s7 }
  0x2c   :  { %p3816_p4 = pnand %p3814_p3, %p3811_p2 }
  0x2e   :  { %3819 = shalt.err (!%p3816_p4)
}
  0x2f   :  { %s3820_s18 = scalar_lea.vmem %s102_s28, 512  ;;  %p3825_p6 = scmp.lt.s32.totalorder %s102_s28, %s102_s28 }
  0x30   :  { %p3821_p5 = scmp.ne.s32.totalorder %s102_s28, %s3820_s18  ;;  %p3826_p7 = scmp.lt.s32.totalorder %s3820_s18, %s3820_s18 }
  0x32   :  { %p3827_p8 = por %p3826_p7, %p3825_p6 }
  0x34   :  { %p3828_p9 = pnand %p3827_p8, %p3821_p5 }
  0x36   :  { %3831 = shalt.err (!%p3828_p9)
}
  0x37   :  { %107 = dma.hbm_to_vmem [thread:$0]  %s4851_s7, 512, %s102_s28, [#allocation17], %s4015_s30, %s4015_s30, %s4016_s21  }
  0x38   :  { %s3832_s2 = scalar_lea.hbm %s4844_s0, 16 }
  0x39   :  { %p3833_p10 = scmp.ne.s32.totalorder %s4844_s0, %s3832_s2  ;;  %p3836_p11 = scmp.lt.u32.totalorder %s3832_s2, %s4844_s0 }
  0x3b   :  { %p3838_p12 = pnand %p3836_p11, %p3833_p10 }
  0x3d   :  { %3841 = shalt.err (!%p3838_p12)
}
  0x3e   :  { %s4017_s27 = smov [#allocation5]   ;;  %s4018_s7 = smov [#allocation9]  }
  0x3f   :  { %35 = dma.hbm_to_smem %s4844_s0, 16, %s4017_s27, [#allocation8]  }
  0x40   :  { %s41_s28 = sshll.u32 %s4018_s7, 4  ;;  %s4019_s16 = smov [#allocation12]   ;;  %s42_s28 = int_to_ptr.vmem [resolvable:$true] %s41_s28 }
  0x41   :  { %s63_s17 = sshll.u32 %s4019_s16, 4  ;;  %s3842_s26 = scalar_lea.hbm %s4845_s1, 256  ;;  %s4159_s17 = int_to_ptr.vmem [resolvable:$true] %s63_s17 }
  0x42   :  { %p3843_p13 = scmp.ne.s32.totalorder %s4845_s1, %s3842_s26  ;;  %p3846_p0 = scmp.lt.u32.totalorder %s3842_s26, %s4845_s1 }
  0x44   :  { %p3848_p1 = pnand %p3846_p0, %p3843_p13 }
  0x46   :  { %3851 = shalt.err (!%p3848_p1)
}
  0x47   :  { %s3852_s0 = scalar_lea.vmem %s42_s28, 256  ;;  %p3857_p3 = scmp.lt.s32.totalorder %s42_s28, %s42_s28 }
  0x48   :  { %p3853_p2 = scmp.ne.s32.totalorder %s42_s28, %s3852_s0  ;;  %p3858_p4 = scmp.lt.s32.totalorder %s3852_s0, %s3852_s0 }
  0x4a   :  { %p3859_p5 = por %p3858_p4, %p3857_p3 }
  0x4c   :  { %p3860_p6 = pnand %p3859_p5, %p3853_p2 }
  0x4e   :  { %3863 = shalt.err (!%p3860_p6)
}
  0x4f   :  { %47 = dma.hbm_to_vmem [thread:$0]  %s4845_s1, 256, %s42_s28, [#allocation6], %s4015_s30, %s4015_s30, %s4016_s21  }
  0x50   :  { %s3864_s29 = scalar_lea.hbm %s4847_s3, 512 }
  0x51   :  { %p3865_p7 = scmp.ne.s32.totalorder %s4847_s3, %s3864_s29  ;;  %p3868_p8 = scmp.lt.u32.totalorder %s3864_s29, %s4847_s3 }
  0x53   :  { %p3870_p9 = pnand %p3868_p8, %p3865_p7 }
  0x55   :  { %3873 = shalt.err (!%p3870_p9)
}
  0x56   :  { %s3874_s4 = scalar_lea.vmem %s4159_s17, 512  ;;  %p3879_p11 = scmp.lt.s32.totalorder %s4159_s17, %s4159_s17 }
  0x57   :  { %p3875_p10 = scmp.ne.s32.totalorder %s4159_s17, %s3874_s4  ;;  %p3880_p12 = scmp.lt.s32.totalorder %s3874_s4, %s3874_s4 }
  0x59   :  { %p3881_p13 = por %p3880_p12, %p3879_p11 }
  0x5b   :  { %p3882_p0 = pnand %p3881_p13, %p3875_p10 }
  0x5d   :  { %3885 = shalt.err (!%p3882_p0)
}
  0x5e   :  { %69 = dma.hbm_to_vmem [thread:$0]  %s4847_s3, 512, %s4159_s17, [#allocation11], %s4015_s30, %s4015_s30, %s4016_s21  }
  0x5f   :  { %s4020_s26 = smov [#allocation15]   ;;  %s4021_s20 = smov [#allocation18]  }
  0x60   :  { %s89_s19 = sshll.u32 %s4020_s26, 4  ;;  %s115_s2 = sshll.u32 %s4021_s20, 4  ;;  %s90_s19 = int_to_ptr.vmem [resolvable:$true] %s89_s19  ;;  %s4196_s2 = int_to_ptr.vmem [resolvable:$true] %s115_s2 }
  0x61   :  { %s3886_s23 = scalar_lea.hbm %s4850_s6, 512 }
  0x62   :  { %p3887_p1 = scmp.ne.s32.totalorder %s4850_s6, %s3886_s23  ;;  %p3890_p2 = scmp.lt.u32.totalorder %s3886_s23, %s4850_s6 }
  0x64   :  { %p3892_p3 = pnand %p3890_p2, %p3887_p1 }
  0x66   :  { %3895 = shalt.err (!%p3892_p3)
}
  0x67   :  { %s3896_s3 = scalar_lea.vmem %s90_s19, 512  ;;  %p3901_p5 = scmp.lt.s32.totalorder %s90_s19, %s90_s19 }
  0x68   :  { %p3897_p4 = scmp.ne.s32.totalorder %s90_s19, %s3896_s3  ;;  %p3902_p6 = scmp.lt.s32.totalorder %s3896_s3, %s3896_s3 }
  0x6a   :  { %p3903_p7 = por %p3902_p6, %p3901_p5 }
  0x6c   :  { %p3904_p8 = pnand %p3903_p7, %p3897_p4 }
  0x6e   :  { %3907 = shalt.err (!%p3904_p8)
}
  0x6f   :  { %95 = dma.hbm_to_vmem [thread:$0]  %s4850_s6, 512, %s90_s19, [#allocation14], %s4015_s30, %s4015_s30, %s4016_s21  }
  0x70   :  { %s3908_s18 = scalar_lea.hbm %s4853_s9, 1024 }
  0x71   :  { %p3909_p9 = scmp.ne.s32.totalorder %s4853_s9, %s3908_s18  ;;  %p3912_p10 = scmp.lt.u32.totalorder %s3908_s18, %s4853_s9 }
  0x73   :  { %p3914_p11 = pnand %p3912_p10, %p3909_p9 }
  0x75   :  { %3917 = shalt.err (!%p3914_p11)
}
  0x76   :  { %s3918_s20 = scalar_lea.vmem %s4196_s2, 1024  ;;  %p3923_p13 = scmp.lt.s32.totalorder %s4196_s2, %s4196_s2 }
  0x77   :  { %p3919_p12 = scmp.ne.s32.totalorder %s4196_s2, %s3918_s20  ;;  %p3924_p0 = scmp.lt.s32.totalorder %s3918_s20, %s3918_s20 }
  0x79   :  { %p3925_p1 = por %p3924_p0, %p3923_p13 }
  0x7b   :  { %p3926_p2 = pnand %p3925_p1, %p3919_p12 }
  0x7d   :  { %3929 = shalt.err (!%p3926_p2)
}
  0x7e   :  { %121 = dma.hbm_to_vmem [thread:$0]  %s4853_s9, 1024, %s4196_s2, [#allocation17], %s4015_s30, %s4015_s30, %s4016_s21  }
  0x7f   :  { %s4022_s22 = smov [#allocation19]   ;;  %s3930_s25 = scalar_lea.hbm %s4855_s11, 2048 }
  0x80   :  { %s129_s0 = sshll.u32 %s4022_s22, 4  ;;  %p3931_p3 = scmp.ne.s32.totalorder %s4855_s11, %s3930_s25  ;;  %s130_s0 = int_to_ptr.vmem [resolvable:$true] %s129_s0 }
  0x81   :  { %p3934_p4 = scmp.lt.u32.totalorder %s3930_s25, %s4855_s11 }
  0x83   :  { %p3936_p5 = pnand %p3934_p4, %p3931_p3 }
  0x85   :  { %3939 = shalt.err (!%p3936_p5)
}
  0x86   :  { %s3940_s15 = scalar_lea.vmem %s130_s0, 2048  ;;  %p3945_p7 = scmp.lt.s32.totalorder %s130_s0, %s130_s0 }
  0x87   :  { %p3941_p6 = scmp.ne.s32.totalorder %s130_s0, %s3940_s15  ;;  %p3946_p8 = scmp.lt.s32.totalorder %s3940_s15, %s3940_s15 }
  0x89   :  { %p3947_p9 = por %p3946_p8, %p3945_p7 }
  0x8b   :  { %p3948_p10 = pnand %p3947_p9, %p3941_p6 }
  0x8d   :  { %3951 = shalt.err (!%p3948_p10)
}
  0x8e   :  { %135 = dma.hbm_to_vmem [thread:$0]  %s4855_s11, 2048, %s130_s0, [#allocation20], %s4015_s30, %s4015_s30, %s4016_s21  }
  0x8f   :  { %3996 = dma.done.wait [#allocation8], 16  }
  0x90   :  { %3997 = vsyncadd [#allocation8], 4294967280 }
  0x91   :  { %3998 = dma.done.wait [#allocation6], 256  }
  0x92   :  { %3999 = vsyncadd [#allocation6], 4294967040 }
  0x93   :  { %4000 = dma.done.wait [#allocation11], 640  }
  0x94   :  { %4001 = vsyncadd [#allocation11], 4294966656 }
  0x95   :  { %4002 = dma.done.wait [#allocation14], 1024  }
  0x96   :  { %4003 = vsyncadd [#allocation14], 4294966272 }
  0x97   :  { %4004 = dma.done.wait [#allocation17], 1536  }
  0x98   :  { %4005 = vsyncadd [#allocation17], 4294965760 }
  0x99   :  { %4006 = dma.done.wait [#allocation20], 2048  }
  0x9a   :  { %4007 = vsyncadd [#allocation20], 4294965248 }
  0x9b   :  { %165 = sfence }
  0x9c   :  { %v168_v0 = vld [vmem:[#allocation12] sm:$0xff]  ;;  %v169_v1 = vld [vmem:[#allocation12 + $0x8] sm:$0xff]  ;;  %v170_v2 = vld [vmem:[#allocation12 + $0x10] sm:$0xff]  ;;  %vm179_vm0 = vcmask 261120   ;;  %v4023_v6 = vmov 0.0|0.0   ;;  %vm4024_vm1 = vmmov 0   ;;  %v263_v16 = vlaneseq }
  0x9d   :  { %v3414_v3 = vpack.c.bf16 %v169_v1, %v168_v0  ;;  %v171_v4 = vld [vmem:[#allocation12 + $0x18] sm:$0xff]  ;;  %v166_v5 = vld [vmem:[#allocation9] sm:$0xff]  ;;  %3440 = vmatprep.subr.bf16.mxu0 %v4023_v6  ;;  %v279_v8 = vld [vmem:[#allocation13] sm:$0xff]  ;;  %v4025_v10 = vmov 0.0   ;;  %s4027_s16 = smov 64   ;;  %vm388_vm3 = vcmask 253952  }
  0x9e   :  { %v3418_v7 = vpack.c.bf16 %v171_v4, %v170_v2  ;;  %3123 = vmatprep.mubr.msk.f32.mxu1 %vm179_vm0, %v166_v5  ;;  %v280_v9 = vld [vmem:[#allocation13 + $0x8] sm:$0xff]  ;;  %3167 = vmatprep.mubr.msk.f32.mxu0 %vm4024_vm1, %v4025_v10  ;;  %v281_v12 = vld [vmem:[#allocation13 + $0x10] sm:$0xff]  ;;  %v282_v13 = vld [vmem:[#allocation13 + $0x18] sm:$0xff]  ;;  %v4278_v21 = vand.u32 127, %v263_v16  ;;  %s4652_s1 = sld [smem:[#allocation5 + $0x1]] }
  0x9f   :  { %3415 = vmatprep.subr.bf16.mxu1 %v3414_v3  ;;  %v4252_v11 = vpack.c.bf16 %v280_v9, %v279_v8  ;;  %v4256_v14 = vpack.c.bf16 %v282_v13, %v281_v12  ;;  %v167_v15 = vld [vmem:[#allocation9 + $0x8] sm:$0xf]  ;;  %v2922_v17 = vld [vmem:[%s4849_s5] ss:$0 sm:$0xff]  ;;  %s4026_s5 = smov 32  }
  0xa0   :  { %3417 = vmatpush3.bf16.msra.mxu1 %v3414_v3  ;;  %v269_v23 = vand.u32 31, %v4278_v21  ;;  %vm278_vm4 = vcmp.ge.s32.totalorder %v4278_v21, 16  ;;  %vm1681_vm5 = vcmp.lt.s32.totalorder %v4278_v21, 16 }
  0xa1   :  { %3419 = vmatprep.subr.bf16.mxu1 %v3418_v7  ;;  %3442 = vmatpush3.bf16.msra.mxu0 %v4252_v11 }
  0xa2   :  { %3443 = vmatprep.subr.bf16.mxu0 %v4023_v6  ;;  %vm4281_vm2 = vcmp.ge.s32.totalorder %v269_v23, 16 }
  0xa4   :  { %3421 = vmatpush3.bf16.msra.mxu1 %v3418_v7  ;;  %p1788_p12 = scmp.gt.s32.totalorder %s4652_s1, 0  ;;  %p1794_p0 = scmp.gt.s32.totalorder %s4652_s1, 7 }
  0xa5   :  { %3422 = vmatprep.subr.bf16.mxu1 %v4023_v6  ;;  %3445 = vmatpush3.bf16.msra.mxu0 %v4256_v14  ;;  %p2040_p3 = scmp.gt.s32.totalorder %s4652_s1, 2  ;;  %p2046_p6 = scmp.gt.s32.totalorder %s4652_s1, 5 }
  0xa6   :  { %3452 = vmatprep.subr.bf16.mxu0 %v4023_v6  ;;  %p2166_p10 = scmp.gt.s32.totalorder %s4652_s1, 3 }
  0xa7   :  { %3124 = vmatmul.mubr.msk.f32.vlgmr.msra.gmra.mrb[0].mxu1 %vm179_vm0, %v167_v15 }
  0xa8   :  { %3424 = vmatpush3.bf16.msra.mxu1 %v4252_v11  ;;  %3134 = vmatprep.mubr.msk.f32.mxu1 %vm4024_vm1, %v4025_v10 }
  0xa9   :  { %3425 = vmatprep.subr.bf16.mxu1 %v4023_v6 }
  0xac   :  { %3427 = vmatpush3.bf16.msra.mxu1 %v4256_v14 }
  0xad   :  { %3428 = vmatprep.subr.bf16.mxu1 %v4023_v6 }
  0xaf   :  { %3135 = vmatmul.mubr.f32.vlgmr.msra.gmra.mrb[2].mxu1 %v4025_v10 }
  0xb0   :  { %3430 = vmatpush3.bf16.msra.mxu1 %v4252_v11  ;;  %3145 = vmatprep.mubr.msk.f32.mxu1 %vm4024_vm1, %v4025_v10 }
  0xb1   :  { %3431 = vmatprep.subr.bf16.mxu1 %v4023_v6 }
  0xb4   :  { %3433 = vmatpush3.bf16.msra.mxu1 %v4256_v14 }
  0xb5   :  { %3434 = vmatprep.subr.bf16.mxu1 %v4023_v6 }
 0x17a   :  { %v3125_v18 = vpop.f32.mrb[0].mxu1 }
 0x17b   :  { %v258_v19 = vadd.f32 %v3125_v18, %v2922_v17  ;;  %v252_v20 = vpop.f32.mrb[1].mxu1 }
 0x17c   :  { %v253_v22 = vadd.f32 %v2922_v17, %v252_v20 }
 0x17d   :  { %262 = vst [vmem:[#allocation2 + $0x8] sm:$0xf] %v258_v19 }
 0x17e   :  { %261 = vst [vmem:[#allocation2] sm:$0xff] %v253_v22 }
 0x182   :  { %v355_v24 = vpop.f32.mrb[2].mxu1 }
 0x183   :  { %v3136_v26 = vpop.f32.mrb[3].mxu1 }
 0x184   :  { %v284_v27 = vld [vmem:[#allocation2 + $0xb] sm:$0x1]  ;;  %v391_v46 = vld [vmem:[#allocation2 + $0xa] sm:$0x1]  ;;  %v496_v2 = vld [vmem:[#allocation2 + $0x9] sm:$0x1] }
 0x185   :  { %v283_v28 = vld [vmem:[#allocation2] sm:$0x1]  ;;  %v390_v45 = vld [vmem:[#allocation2 + $0x1] sm:$0x1]  ;;  %v495_v1 = vld [vmem:[#allocation2 + $0x2] sm:$0x1] }
 0x186   :  { %v285_v29 = vsel %vm4281_vm2, %v284_v27, %v283_v28  ;;  %v392_v47 = vsel %vm4281_vm2, %v391_v46, %v390_v45  ;;  %v497_v3 = vsel %vm4281_vm2, %v496_v2, %v495_v1  ;;  %v600_v27 = vld [vmem:[#allocation2 + $0x3] sm:$0x1]  ;;  %v601_v28 = vld [vmem:[#allocation2 + $0x8] sm:$0x1] }
 0x187   :  { %v359_v30 = vadd.f32 %v355_v24, %v285_v29  ;;  %v602_v29 = vsel %vm4281_vm2, %v601_v28, %v600_v27 }
 0x189   :  { %3604 = vtanh.f32 %v359_v30  ;;  %v2925_v32 = vmul.f32 -1.442695, %v359_v30 }
 0x18b   :  { %3606 = vpow2.f32 %v2925_v32 }
 0x193   :  { %v3605_v31 = vpop.eup %3604 }
 0x194   :  { %369 = vrot.lane.b32.xlu0 %v3605_v31, %s4026_s5 }
 0x195   :  { %v3607_v33 = vpop.eup %3606 }
 0x196   :  { %v363_v34 = vadd.f32 1.0, %v3607_v33 }
 0x198   :  { %3608 = vrcp.f32 %v363_v34 }
 0x1a2   :  { %v3609_v35 = vpop.eup %3608 }
 0x1a3   :  { %v367_v38 = vmul.f32 0.0, %v3609_v35 }
 0x206   :  { %v370_v36 = vpop.permute.xlu0 %369 }
 0x207   :  { %v372_v37 = vmul.f32 %v3609_v35, %v370_v36 }
 0x209   :  { %374 = vrot.lane.b32.xlu0 %v372_v37, %s4026_s5 }
 0x27b   :  { %v375_v39 = vpop.permute.xlu0 %374 }
 0x27c   :  { %v377_v40 = vadd.f32 %v375_v39, %v367_v38 }
 0x27e   :  { %3610 = vtanh.f32 %v377_v40 }
 0x288   :  { %v3611_v41 = vpop.eup %3610 }
 0x289   :  { %380 = vrot.lane.b32.xlu1 %v3611_v41, %s4026_s5 }
 0x2fb   :  { %v381_v42 = vpop.permute.xlu1 %380 }
 0x2fc   :  { %v383_v43 = vmul.f32 %v3609_v35, %v381_v42 }
 0x2fe   :  { %385 = vrot.lane.b32.xlu1 %v383_v43, %s4027_s16 }
 0x370   :  { %v386_v44 = vpop.permute.xlu1 %385 }
 0x371   :  { %389 = vst.msk [vmem:[#allocation4] sm:$0x1] %vm388_vm3, %v386_v44  ;;  %3146 = vmatmul.mubr.msk.f32.vlgmr.msra.gmra.mrb[4].mxu1 %vm179_vm0, %v386_v44 }
 0x372   :  { %3436 = vmatpush3.bf16.msra.mxu1 %v4252_v11  ;;  %3156 = vmatprep.mubr.msk.f32.mxu1 %vm4024_vm1, %v4025_v10 }
 0x373   :  { %3437 = vmatprep.subr.bf16.mxu1 %v4023_v6 }
 0x376   :  { %3439 = vmatpush3.bf16.msra.mxu1 %v4256_v14 }
 0x377   :  { %3446 = vmatprep.subr.bf16.mxu1 %v4023_v6 }
 0x444   :  { %v461_v48 = vpop.f32.mrb[4].mxu1 }
 0x445   :  { %v465_v49 = vadd.f32 %v461_v48, %v392_v47  ;;  %v3147_v50 = vpop.f32.mrb[5].mxu1  ;;  %v705_v47 = vld [vmem:[#allocation2 + $0x4] sm:$0x1]  ;;  %v706_v48 = vld [vmem:[#allocation2 + $0x7] sm:$0x1] }
 0x447   :  { %3612 = vtanh.f32 %v465_v49  ;;  %v2927_v52 = vmul.f32 -1.442695, %v465_v49  ;;  %v707_v49 = vsel %vm4281_vm2, %v706_v48, %v705_v47 }
 0x449   :  { %3614 = vpow2.f32 %v2927_v52 }
 0x451   :  { %v3613_v51 = vpop.eup %3612 }
 0x452   :  { %475 = vrot.lane.b32.xlu0 %v3613_v51, %s4026_s5 }
 0x453   :  { %v3615_v53 = vpop.eup %3614 }
 0x454   :  { %v469_v54 = vadd.f32 1.0, %v3615_v53 }
 0x456   :  { %3616 = vrcp.f32 %v469_v54 }
 0x460   :  { %v3617_v55 = vpop.eup %3616 }
 0x461   :  { %v473_v58 = vmul.f32 %v3617_v55, %v377_v40 }
 0x4c4   :  { %v476_v56 = vpop.permute.xlu0 %475 }
 0x4c5   :  { %v478_v57 = vmul.f32 %v3617_v55, %v476_v56 }
 0x4c7   :  { %480 = vrot.lane.b32.xlu1 %v478_v57, %s4026_s5 }
 0x539   :  { %v481_v59 = vpop.permute.xlu1 %480 }
 0x53a   :  { %v483_v60 = vadd.f32 %v481_v59, %v473_v58 }
 0x53c   :  { %3618 = vtanh.f32 %v483_v60 }
 0x546   :  { %v3619_v61 = vpop.eup %3618 }
 0x547   :  { %486 = vrot.lane.b32.xlu0 %v3619_v61, %s4026_s5 }
 0x5b9   :  { %v487_v62 = vpop.permute.xlu0 %486 }
 0x5ba   :  { %v489_v63 = vmul.f32 %v3617_v55, %v487_v62 }
 0x5bc   :  { %491 = vrot.lane.b32.xlu1 %v489_v63, %s4027_s16 }
 0x62e   :  { %v492_v0 = vpop.permute.xlu1 %491 }
 0x62f   :  { %494 = vst.msk [vmem:[#allocation4 + $0x1] sm:$0x1] %vm388_vm3, %v492_v0  ;;  %3157 = vmatmul.mubr.msk.f32.vlgmr.msra.gmra.mrb[6].mxu1 %vm179_vm0, %v492_v0 }
 0x630   :  { %3448 = vmatpush3.bf16.msra.mxu1 %v4252_v11  ;;  %3178 = vmatprep.mubr.msk.f32.mxu1 %vm4024_vm1, %v4025_v10 }
 0x631   :  { %3449 = vmatprep.subr.bf16.mxu1 %v4023_v6 }
 0x634   :  { %3451 = vmatpush3.bf16.msra.mxu1 %v4256_v14 }
 0x635   :  { %3458 = vmatprep.subr.bf16.mxu1 %v4023_v6 }
 0x702   :  { %v566_v4 = vpop.f32.mrb[6].mxu1 }
 0x703   :  { %v570_v5 = vadd.f32 %v566_v4, %v497_v3  ;;  %v3158_v7 = vpop.f32.mrb[7].mxu1  ;;  %v810_v3 = vld [vmem:[#allocation2 + $0x5] sm:$0x1]  ;;  %v811_v4 = vld [vmem:[#allocation2 + $0x6] sm:$0x1] }
 0x705   :  { %3620 = vtanh.f32 %v570_v5  ;;  %v2929_v9 = vmul.f32 -1.442695, %v570_v5  ;;  %v812_v5 = vsel %vm4281_vm2, %v811_v4, %v810_v3 }
 0x707   :  { %3622 = vpow2.f32 %v2929_v9 }
 0x70f   :  { %v3621_v8 = vpop.eup %3620 }
 0x710   :  { %580 = vrot.lane.b32.xlu0 %v3621_v8, %s4026_s5 }
 0x711   :  { %v3623_v12 = vpop.eup %3622 }
 0x712   :  { %v574_v13 = vadd.f32 1.0, %v3623_v12 }
 0x714   :  { %3624 = vrcp.f32 %v574_v13 }
 0x71e   :  { %v3625_v15 = vpop.eup %3624 }
 0x71f   :  { %v578_v18 = vmul.f32 %v3625_v15, %v483_v60 }
 0x782   :  { %v581_v16 = vpop.permute.xlu0 %580 }
 0x783   :  { %v583_v17 = vmul.f32 %v3625_v15, %v581_v16 }
 0x785   :  { %585 = vrot.lane.b32.xlu1 %v583_v17, %s4026_s5 }
 0x7f7   :  { %v586_v19 = vpop.permute.xlu1 %585 }
 0x7f8   :  { %v588_v20 = vadd.f32 %v586_v19, %v578_v18 }
 0x7fa   :  { %3626 = vtanh.f32 %v588_v20 }
 0x804   :  { %v3627_v22 = vpop.eup %3626 }
 0x805   :  { %591 = vrot.lane.b32.xlu0 %v3627_v22, %s4026_s5 }
 0x877   :  { %v592_v23 = vpop.permute.xlu0 %591 }
 0x878   :  { %v594_v24 = vmul.f32 %v3625_v15, %v592_v23 }
 0x87a   :  { %596 = vrot.lane.b32.xlu1 %v594_v24, %s4027_s16 }
 0x8ec   :  { %v597_v26 = vpop.permute.xlu1 %596 }
 0x8ed   :  { %599 = vst.msk [vmem:[#allocation4 + $0x2] sm:$0x1] %vm388_vm3, %v597_v26  ;;  %3168 = vmatmul.mubr.msk.f32.vlgmr.msra.gmra.mrb[0].mxu0 %vm179_vm0, %v597_v26 }
 0x8ee   :  { %3454 = vmatpush3.bf16.msra.mxu0 %v4252_v11  ;;  %3189 = vmatprep.mubr.msk.f32.mxu0 %vm4024_vm1, %v4025_v10 }
 0x8ef   :  { %3455 = vmatprep.subr.bf16.mxu0 %v4023_v6 }
 0x8f2   :  { %3457 = vmatpush3.bf16.msra.mxu0 %v4256_v14 }
 0x8f3   :  { %3464 = vmatprep.subr.bf16.mxu0 %v4023_v6 }
 0x9c0   :  { %v671_v30 = vpop.f32.mrb[0].mxu0 }
 0x9c1   :  { %v675_v31 = vadd.f32 %v671_v30, %v602_v29  ;;  %v3169_v32 = vpop.f32.mrb[1].mxu0  ;;  %v915_v29 = vld [vmem:[#allocation2 + $0x6] sm:$0x1]  ;;  %v916_v30 = vld [vmem:[#allocation2 + $0x5] sm:$0x1] }
 0x9c3   :  { %3628 = vtanh.f32 %v675_v31  ;;  %v2931_v34 = vmul.f32 -1.442695, %v675_v31  ;;  %v917_v31 = vsel %vm4281_vm2, %v916_v30, %v915_v29 }
 0x9c5   :  { %3630 = vpow2.f32 %v2931_v34 }
 0x9cd   :  { %v3629_v33 = vpop.eup %3628 }
 0x9ce   :  { %685 = vrot.lane.b32.xlu0 %v3629_v33, %s4026_s5 }
 0x9cf   :  { %v3631_v35 = vpop.eup %3630 }
 0x9d0   :  { %v679_v36 = vadd.f32 1.0, %v3631_v35 }
 0x9d2   :  { %3632 = vrcp.f32 %v679_v36 }
 0x9dc   :  { %v3633_v37 = vpop.eup %3632 }
 0x9dd   :  { %v683_v40 = vmul.f32 %v3633_v37, %v588_v20 }
 0xa40   :  { %v686_v38 = vpop.permute.xlu0 %685 }
 0xa41   :  { %v688_v39 = vmul.f32 %v3633_v37, %v686_v38 }
 0xa43   :  { %690 = vrot.lane.b32.xlu1 %v688_v39, %s4026_s5 }
 0xab5   :  { %v691_v41 = vpop.permute.xlu1 %690 }
 0xab6   :  { %v693_v42 = vadd.f32 %v691_v41, %v683_v40 }
 0xab8   :  { %3634 = vtanh.f32 %v693_v42 }
 0xac2   :  { %v3635_v43 = vpop.eup %3634 }
 0xac3   :  { %696 = vrot.lane.b32.xlu0 %v3635_v43, %s4026_s5 }
 0xb35   :  { %v697_v44 = vpop.permute.xlu0 %696 }
 0xb36   :  { %v699_v45 = vmul.f32 %v3633_v37, %v697_v44 }
 0xb38   :  { %701 = vrot.lane.b32.xlu1 %v699_v45, %s4027_s16 }
 0xbaa   :  { %v702_v46 = vpop.permute.xlu1 %701 }
 0xbab   :  { %704 = vst.msk [vmem:[#allocation4 + $0x3] sm:$0x1] %vm388_vm3, %v702_v46  ;;  %3179 = vmatmul.mubr.msk.f32.vlgmr.msra.gmra.mrb[8].mxu1 %vm179_vm0, %v702_v46 }
 0xbac   :  { %3460 = vmatpush3.bf16.msra.mxu1 %v4252_v11  ;;  %3200 = vmatprep.mubr.msk.f32.mxu1 %vm4024_vm1, %v4025_v10 }
 0xbad   :  { %3461 = vmatprep.subr.bf16.mxu1 %v4023_v6 }
 0xbb0   :  { %3463 = vmatpush3.bf16.msra.mxu1 %v4256_v14 }
 0xbb1   :  { %3470 = vmatprep.subr.bf16.mxu1 %v4023_v6 }
 0xc7e   :  { %v776_v50 = vpop.f32.mrb[8].mxu1 }
 0xc7f   :  { %v780_v51 = vadd.f32 %v776_v50, %v707_v49  ;;  %v3180_v52 = vpop.f32.mrb[9].mxu1 }
 0xc81   :  { %3636 = vtanh.f32 %v780_v51  ;;  %v2933_v54 = vmul.f32 -1.442695, %v780_v51 }
 0xc83   :  { %3638 = vpow2.f32 %v2933_v54 }
 0xc8b   :  { %v3637_v53 = vpop.eup %3636 }
 0xc8c   :  { %790 = vrot.lane.b32.xlu0 %v3637_v53, %s4026_s5 }
 0xc8d   :  { %v3639_v55 = vpop.eup %3638 }
 0xc8e   :  { %v784_v56 = vadd.f32 1.0, %v3639_v55  ;;  %v1020_v55 = vld [vmem:[#allocation2 + $0x7] sm:$0x1] }
 0xc90   :  { %3640 = vrcp.f32 %v784_v56  ;;  %v1021_v56 = vld [vmem:[#allocation2 + $0x4] sm:$0x1] }
 0xc9a   :  { %v3641_v57 = vpop.eup %3640 }
 0xc9b   :  { %v788_v60 = vmul.f32 %v3641_v57, %v693_v42 }
 0xcfe   :  { %v791_v58 = vpop.permute.xlu0 %790 }
 0xcff   :  { %v793_v59 = vmul.f32 %v3641_v57, %v791_v58 }
 0xd01   :  { %795 = vrot.lane.b32.xlu1 %v793_v59, %s4026_s5 }
 0xd73   :  { %v796_v61 = vpop.permute.xlu1 %795 }
 0xd74   :  { %v798_v62 = vadd.f32 %v796_v61, %v788_v60 }
 0xd76   :  { %3642 = vtanh.f32 %v798_v62 }
 0xd80   :  { %v3643_v63 = vpop.eup %3642 }
 0xd81   :  { %801 = vrot.lane.b32.xlu0 %v3643_v63, %s4026_s5 }
 0xdf3   :  { %v802_v0 = vpop.permute.xlu0 %801 }
 0xdf4   :  { %v804_v1 = vmul.f32 %v3641_v57, %v802_v0  ;;  %v1022_v57 = vsel %vm4281_vm2, %v1021_v56, %v1020_v55 }
 0xdf6   :  { %806 = vrot.lane.b32.xlu1 %v804_v1, %s4027_s16 }
 0xe68   :  { %v807_v2 = vpop.permute.xlu1 %806 }
 0xe69   :  { %809 = vst.msk [vmem:[#allocation4 + $0x4] sm:$0x1] %vm388_vm3, %v807_v2  ;;  %3190 = vmatmul.mubr.msk.f32.vlgmr.msra.gmra.mrb[2].mxu0 %vm179_vm0, %v807_v2 }
 0xe6a   :  { %3466 = vmatpush3.bf16.msra.mxu0 %v4252_v11  ;;  %3211 = vmatprep.mubr.msk.f32.mxu0 %vm4024_vm1, %v4025_v10 }
 0xe6b   :  { %3467 = vmatprep.subr.bf16.mxu0 %v4023_v6 }
 0xe6e   :  { %3469 = vmatpush3.bf16.msra.mxu0 %v4256_v14 }
 0xe6f   :  { %3476 = vmatprep.subr.bf16.mxu0 %v4023_v6 }
 0xf3c   :  { %v881_v7 = vpop.f32.mrb[2].mxu0 }
 0xf3d   :  { %v885_v8 = vadd.f32 %v881_v7, %v812_v5  ;;  %v3191_v9 = vpop.f32.mrb[3].mxu0 }
 0xf3f   :  { %3644 = vtanh.f32 %v885_v8  ;;  %v2935_v13 = vmul.f32 -1.442695, %v885_v8 }
 0xf41   :  { %3646 = vpow2.f32 %v2935_v13 }
 0xf49   :  { %v3645_v12 = vpop.eup %3644 }
 0xf4a   :  { %895 = vrot.lane.b32.xlu0 %v3645_v12, %s4026_s5 }
 0xf4b   :  { %v3647_v15 = vpop.eup %3646 }
 0xf4c   :  { %v889_v16 = vadd.f32 1.0, %v3647_v15  ;;  %v1562_v15 = vld [vmem:[#allocation4 + $0x4] sm:$0x1] }
 0xf4e   :  { %3648 = vrcp.f32 %v889_v16  ;;  %v1573_v16 = vld [vmem:[#allocation4 + $0x4] sm:$0x1] }
 0xf58   :  { %v3649_v17 = vpop.eup %3648 }
 0xf59   :  { %v893_v20 = vmul.f32 %v3649_v17, %v798_v62 }
 0xfbc   :  { %v896_v18 = vpop.permute.xlu0 %895 }
 0xfbd   :  { %v898_v19 = vmul.f32 %v3649_v17, %v896_v18 }
 0xfbf   :  { %900 = vrot.lane.b32.xlu1 %v898_v19, %s4026_s5 }
0x1031   :  { %v901_v22 = vpop.permute.xlu1 %900 }
0x1032   :  { %v903_v23 = vadd.f32 %v901_v22, %v893_v20  ;;  %v1125_v22 = vld [vmem:[#allocation2 + $0x8] sm:$0x1] }
0x1034   :  { %3650 = vtanh.f32 %v903_v23 }
0x103e   :  { %v3651_v24 = vpop.eup %3650 }
0x103f   :  { %906 = vrot.lane.b32.xlu0 %v3651_v24, %s4026_s5 }
0x10b1   :  { %v907_v26 = vpop.permute.xlu0 %906 }
0x10b2   :  { %v909_v27 = vmul.f32 %v3649_v17, %v907_v26 }
0x10b4   :  { %911 = vrot.lane.b32.xlu1 %v909_v27, %s4027_s16 }
0x1126   :  { %v912_v28 = vpop.permute.xlu1 %911 }
0x1127   :  { %914 = vst.msk [vmem:[#allocation4 + $0x5] sm:$0x1] %vm388_vm3, %v912_v28  ;;  %3201 = vmatmul.mubr.msk.f32.vlgmr.msra.gmra.mrb[10].mxu1 %vm179_vm0, %v912_v28 }
0x1128   :  { %3472 = vmatpush3.bf16.msra.mxu1 %v4252_v11  ;;  %3222 = vmatprep.mubr.msk.f32.mxu1 %vm4024_vm1, %v4025_v10 }
0x1129   :  { %3473 = vmatprep.subr.bf16.mxu1 %v4023_v6 }
0x112c   :  { %3475 = vmatpush3.bf16.msra.mxu1 %v4256_v14 }
0x112d   :  { %3482 = vmatprep.subr.bf16.mxu1 %v4023_v6 }
0x112e   :  { %v1566_v49 = vld [vmem:[#allocation4 + $0x5] sm:$0x1] }
0x112f   :  { %v1569_v50 = vld [vmem:[#allocation4 + $0x5] sm:$0x1] }
0x11fa   :  { %v986_v32 = vpop.f32.mrb[10].mxu1 }
0x11fb   :  { %v990_v33 = vadd.f32 %v986_v32, %v917_v31  ;;  %v3202_v34 = vpop.f32.mrb[11].mxu1 }
0x11fd   :  { %3652 = vtanh.f32 %v990_v33  ;;  %v2937_v36 = vmul.f32 -1.442695, %v990_v33 }
0x11ff   :  { %3654 = vpow2.f32 %v2937_v36 }
0x1207   :  { %v3653_v35 = vpop.eup %3652 }
0x1208   :  { %1000 = vrot.lane.b32.xlu0 %v3653_v35, %s4026_s5 }
0x1209   :  { %v3655_v37 = vpop.eup %3654 }
0x120a   :  { %v994_v38 = vadd.f32 1.0, %v3655_v37 }
0x120c   :  { %3656 = vrcp.f32 %v994_v38 }
0x1216   :  { %v3657_v39 = vpop.eup %3656 }
0x1217   :  { %v998_v42 = vmul.f32 %v3657_v39, %v903_v23  ;;  %v1126_v23 = vld [vmem:[#allocation2 + $0x3] sm:$0x1] }
0x1218   :  { %v1127_v24 = vsel %vm4281_vm2, %v1126_v23, %v1125_v22 }
0x127a   :  { %v1001_v40 = vpop.permute.xlu0 %1000 }
0x127b   :  { %v1003_v41 = vmul.f32 %v3657_v39, %v1001_v40 }
0x127d   :  { %1005 = vrot.lane.b32.xlu1 %v1003_v41, %s4026_s5 }
0x12ef   :  { %v1006_v43 = vpop.permute.xlu1 %1005 }
0x12f0   :  { %v1008_v44 = vadd.f32 %v1006_v43, %v998_v42  ;;  %v1558_v43 = vld [vmem:[#allocation4 + $0x3] sm:$0x1] }
0x12f2   :  { %3658 = vtanh.f32 %v1008_v44 }
0x12fc   :  { %v3659_v45 = vpop.eup %3658 }
0x12fd   :  { %1011 = vrot.lane.b32.xlu0 %v3659_v45, %s4026_s5 }
0x136f   :  { %v1012_v46 = vpop.permute.xlu0 %1011 }
0x1370   :  { %v1014_v47 = vmul.f32 %v3657_v39, %v1012_v46 }
0x1372   :  { %1016 = vrot.lane.b32.xlu1 %v1014_v47, %s4027_s16 }
0x13e4   :  { %v1017_v48 = vpop.permute.xlu1 %1016 }
0x13e5   :  { %1019 = vst.msk [vmem:[#allocation4 + $0x6] sm:$0x1] %vm388_vm3, %v1017_v48  ;;  %3212 = vmatmul.mubr.msk.f32.vlgmr.msra.gmra.mrb[4].mxu0 %vm179_vm0, %v1017_v48 }
0x13e6   :  { %3478 = vmatpush3.bf16.msra.mxu0 %v4252_v11  ;;  %3233 = vmatprep.mubr.msk.f32.mxu0 %vm4024_vm1, %v4025_v10 }
0x13e7   :  { %3479 = vmatprep.subr.bf16.mxu0 %v4023_v6 }
0x13ea   :  { %3481 = vmatpush3.bf16.msra.mxu0 %v4256_v14 }
0x13eb   :  { %3488 = vmatprep.subr.bf16.mxu0 %v4023_v6 }
0x13ec   :  { %v1565_v51 = vld [vmem:[#allocation4 + $0x6] sm:$0x1] }
0x13ed   :  { %v1570_v52 = vld [vmem:[#allocation4 + $0x6] sm:$0x1]  ;;  %v1567_v53 = vsel %vm278_vm4, %v1565_v51, %v1566_v49  ;;  %v1231_v49 = vld [vmem:[#allocation2 + $0x2] sm:$0x1] }
0x13ee   :  { %v1571_v54 = vsel %vm278_vm4, %v1569_v50, %v1570_v52  ;;  %1568 = vst.msk [vmem:[#allocation21 + $0x5] sm:$0x1] %vm388_vm3, %v1567_v53 }
0x13ef   :  { %1572 = vst.msk [vmem:[#allocation21 + $0x6] sm:$0x1] %vm388_vm3, %v1571_v54 }
0x14b8   :  { %v1091_v58 = vpop.f32.mrb[4].mxu0 }
0x14b9   :  { %v1095_v59 = vadd.f32 %v1091_v58, %v1022_v57  ;;  %v3213_v60 = vpop.f32.mrb[5].mxu0 }
0x14bb   :  { %3660 = vtanh.f32 %v1095_v59  ;;  %v2939_v62 = vmul.f32 -1.442695, %v1095_v59 }
0x14bd   :  { %3662 = vpow2.f32 %v2939_v62 }
0x14c5   :  { %v3661_v61 = vpop.eup %3660 }
0x14c6   :  { %1105 = vrot.lane.b32.xlu0 %v3661_v61, %s4026_s5 }
0x14c7   :  { %v3663_v63 = vpop.eup %3662 }
0x14c8   :  { %v1099_v0 = vadd.f32 1.0, %v3663_v63 }
0x14ca   :  { %3664 = vrcp.f32 %v1099_v0 }
0x14d4   :  { %v3665_v1 = vpop.eup %3664 }
0x14d5   :  { %v1103_v4 = vmul.f32 %v3665_v1, %v1008_v44  ;;  %v1577_v44 = vld [vmem:[#allocation4 + $0x3] sm:$0x1] }
0x1538   :  { %v1106_v2 = vpop.permute.xlu0 %1105 }
0x1539   :  { %v1108_v3 = vmul.f32 %v3665_v1, %v1106_v2 }
0x153b   :  { %1110 = vrot.lane.b32.xlu1 %v1108_v3, %s4026_s5  ;;  %v1554_v3 = vld [vmem:[#allocation4 + $0x2] sm:$0x1] }
0x15ad   :  { %v1111_v5 = vpop.permute.xlu1 %1110 }
0x15ae   :  { %v1113_v7 = vadd.f32 %v1111_v5, %v1103_v4  ;;  %v1581_v4 = vld [vmem:[#allocation4 + $0x2] sm:$0x1] }
0x15b0   :  { %3666 = vtanh.f32 %v1113_v7 }
0x15ba   :  { %v3667_v8 = vpop.eup %3666 }
0x15bb   :  { %1116 = vrot.lane.b32.xlu0 %v3667_v8, %s4026_s5 }
0x162d   :  { %v1117_v9 = vpop.permute.xlu0 %1116 }
0x162e   :  { %v1119_v12 = vmul.f32 %v3665_v1, %v1117_v9 }
0x1630   :  { %1121 = vrot.lane.b32.xlu1 %v1119_v12, %s4027_s16  ;;  %v1335_v12 = vld [vmem:[#allocation2 + $0xa] sm:$0x1] }
0x16a2   :  { %v1122_v13 = vpop.permute.xlu1 %1121 }
0x16a3   :  { %1124 = vst.msk [vmem:[#allocation4 + $0x7] sm:$0x1] %vm388_vm3, %v1122_v13  ;;  %3223 = vmatmul.mubr.msk.f32.vlgmr.msra.gmra.mrb[12].mxu1 %vm179_vm0, %v1122_v13  ;;  %v1336_v13 = vld [vmem:[#allocation2 + $0x1] sm:$0x1] }
0x16a4   :  { %3484 = vmatpush3.bf16.msra.mxu1 %v4252_v11  ;;  %3244 = vmatprep.mubr.msk.f32.mxu1 %vm4024_vm1, %v4025_v10 }
0x16a5   :  { %3485 = vmatprep.subr.bf16.mxu1 %v4023_v6 }
0x16a8   :  { %3487 = vmatpush3.bf16.msra.mxu1 %v4256_v14 }
0x16a9   :  { %3494 = vmatprep.subr.bf16.mxu1 %v4023_v6 }
0x16aa   :  { %v1561_v17 = vld [vmem:[#allocation4 + $0x7] sm:$0x1] }
0x16ab   :  { %v1574_v18 = vld [vmem:[#allocation4 + $0x7] sm:$0x1]  ;;  %v1563_v19 = vsel %vm278_vm4, %v1561_v17, %v1562_v15  ;;  %v1337_v15 = vsel %vm4281_vm2, %v1336_v13, %v1335_v12 }
0x16ac   :  { %v1575_v20 = vsel %vm278_vm4, %v1573_v16, %v1574_v18  ;;  %1564 = vst.msk [vmem:[#allocation21 + $0x4] sm:$0x1] %vm388_vm3, %v1563_v19 }
0x16ad   :  { %1576 = vst.msk [vmem:[#allocation21 + $0x7] sm:$0x1] %vm388_vm3, %v1575_v20 }
0x1776   :  { %v1196_v26 = vpop.f32.mrb[12].mxu1 }
0x1777   :  { %v1200_v27 = vadd.f32 %v1196_v26, %v1127_v24  ;;  %v3224_v28 = vpop.f32.mrb[13].mxu1 }
0x1779   :  { %3668 = vtanh.f32 %v1200_v27  ;;  %v2941_v30 = vmul.f32 -1.442695, %v1200_v27 }
0x177b   :  { %3670 = vpow2.f32 %v2941_v30 }
0x1783   :  { %v3669_v29 = vpop.eup %3668 }
0x1784   :  { %1210 = vrot.lane.b32.xlu0 %v3669_v29, %s4026_s5 }
0x1785   :  { %v3671_v31 = vpop.eup %3670 }
0x1786   :  { %v1204_v32 = vadd.f32 1.0, %v3671_v31  ;;  %v1596_v31 = vld [vmem:[#allocation15] sm:$0xff] }
0x1788   :  { %3672 = vrcp.f32 %v1204_v32  ;;  %v1597_v32 = vld [vmem:[#allocation15 + $0x8] sm:$0xff] }
0x1792   :  { %v3673_v33 = vpop.eup %3672 }
0x1793   :  { %v1208_v36 = vmul.f32 %v3673_v33, %v1113_v7 }
0x17f6   :  { %v1211_v34 = vpop.permute.xlu0 %1210 }
0x17f7   :  { %v1213_v35 = vmul.f32 %v3673_v33, %v1211_v34  ;;  %v3495_v34 = vpack.c.bf16 %v1597_v32, %v1596_v31 }
0x17f9   :  { %1215 = vrot.lane.b32.xlu1 %v1213_v35, %s4026_s5  ;;  %v1599_v35 = vld [vmem:[#allocation15 + $0x18] sm:$0xff] }
0x186b   :  { %v1216_v37 = vpop.permute.xlu1 %1215 }
0x186c   :  { %v1218_v38 = vadd.f32 %v1216_v37, %v1208_v36  ;;  %v1595_v37 = vld [vmem:[#allocation10] sm:$0xff] }
0x186e   :  { %3674 = vtanh.f32 %v1218_v38 }
0x1878   :  { %v3675_v39 = vpop.eup %3674 }
0x1879   :  { %1221 = vrot.lane.b32.xlu0 %v3675_v39, %s4026_s5  ;;  %v1685_v39 = vld [vmem:[#allocation16] sm:$0xff] }
0x18eb   :  { %v1222_v40 = vpop.permute.xlu0 %1221 }
0x18ec   :  { %v1224_v41 = vmul.f32 %v3673_v33, %v1222_v40  ;;  %v1598_v33 = vld [vmem:[#allocation15 + $0x10] sm:$0xff]  ;;  %v1686_v40 = vld [vmem:[#allocation16 + $0x8] sm:$0xff] }
0x18ed   :  { %v3498_v36 = vpack.c.bf16 %v1599_v35, %v1598_v33 }
0x18ee   :  { %1226 = vrot.lane.b32.xlu1 %v1224_v41, %s4027_s16  ;;  %v4459_v41 = vpack.c.bf16 %v1686_v40, %v1685_v39 }
0x1960   :  { %v1227_v42 = vpop.permute.xlu1 %1226 }
0x1961   :  { %1229 = vst.msk [vmem:[#allocation4 + $0x8] sm:$0x1] %vm388_vm3, %v1227_v42  ;;  %3234 = vmatmul.mubr.msk.f32.vlgmr.msra.gmra.mrb[6].mxu0 %vm179_vm0, %v1227_v42  ;;  %v1687_v42 = vld [vmem:[#allocation16 + $0x10] sm:$0xff] }
0x1962   :  { %3490 = vmatpush3.bf16.msra.mxu0 %v4252_v11  ;;  %3255 = vmatprep.mubr.msk.f32.mxu0 %vm4024_vm1, %v4025_v10  ;;  %v1230_v11 = vld [vmem:[#allocation2 + $0x9] sm:$0x1] }
0x1963   :  { %3491 = vmatprep.subr.bf16.mxu0 %v4023_v6 }
0x1966   :  { %3493 = vmatpush3.bf16.msra.mxu0 %v4256_v14  ;;  %v1232_v14 = vsel %vm4281_vm2, %v1231_v49, %v1230_v11 }
0x1967   :  { %3500 = vmatprep.subr.bf16.mxu0 %v4023_v6 }
0x1968   :  { %v1557_v45 = vld [vmem:[#allocation4 + $0x8] sm:$0x1] }
0x1969   :  { %v1578_v46 = vld [vmem:[#allocation4 + $0x8] sm:$0x1]  ;;  %v1559_v47 = vsel %vm278_vm4, %v1557_v45, %v1558_v43  ;;  %v1688_v43 = vld [vmem:[#allocation16 + $0x18] sm:$0xff] }
0x196a   :  { %v1579_v48 = vsel %vm278_vm4, %v1577_v44, %v1578_v46  ;;  %1560 = vst.msk [vmem:[#allocation21 + $0x3] sm:$0x1] %vm388_vm3, %v1559_v47  ;;  %v4463_v44 = vpack.c.bf16 %v1688_v43, %v1687_v42  ;;  %v2949_v47 = vld [vmem:[%s4852_s8] ss:$0 sm:$0xff]  ;;  %s4650_s8 = sld [smem:[#allocation5]] }
0x196b   :  { %1580 = vst.msk [vmem:[#allocation21 + $0x8] sm:$0x1] %vm388_vm3, %v1579_v48 }
0x1970   :  { %p1787_p11 = scmp.le.s32.totalorder %s4650_s8, 0  ;;  %p1793_p13 = scmp.le.s32.totalorder %s4650_s8, 7 }
0x1971   :  { %p2039_p2 = scmp.le.s32.totalorder %s4650_s8, 2  ;;  %p2045_p5 = scmp.le.s32.totalorder %s4650_s8, 5 }
0x1972   :  { %p4658_p1 = pnand %p1788_p12, %p1787_p11  ;;  %p4664_p4 = pnand %p1794_p0, %p1793_p13 }
0x1973   :  { %p4672_p7 = pnand %p2040_p3, %p2039_p2  ;;  %p4678_p8 = pnand %p2046_p6, %p2045_p5 }
0x1974   :  { %s2953_s20 = scalar_select %p4658_p1, 0, 1 }
0x1975   :  { %s2954_s19 = scalar_select %p4664_p4, 0, 1 }
0x1976   :  { %p2165_p9 = scmp.le.s32.totalorder %s4650_s8, 3  ;;  %p2171_p11 = scmp.le.s32.totalorder %s4650_s8, 4 }
0x1977   :  { %s2961_s0 = scalar_select %p4672_p7, 0, 1 }
0x1978   :  { %p2172_p12 = scmp.gt.s32.totalorder %s4652_s1, 4  ;;  %s4691_s24 = scvt.s32.f32 %s2953_s20 }
0x1979   :  { %s2962_s23 = scalar_select %p4678_p8, 0, 1 }
0x197a   :  { %p4693_p13 = pnand %p2166_p10, %p2165_p9  ;;  %p1913_p0 = scmp.le.s32.totalorder %s4650_s8, 1 }
0x197b   :  { %p1914_p1 = scmp.gt.s32.totalorder %s4652_s1, 1  ;;  %s4704_s27 = scvt.s32.f32 %s2954_s19 }
0x197c   :  { %p4706_p2 = pnand %p2172_p12, %p2171_p11  ;;  %p1919_p3 = scmp.le.s32.totalorder %s4650_s8, 6 }
0x197d   :  { %p1920_p4 = scmp.gt.s32.totalorder %s4652_s1, 6  ;;  %s4717_s17 = scvt.s32.f32 %s2961_s0 }
0x197e   :  { %s2965_s3 = scalar_select %p4693_p13, 0, 1 }
0x197f   :  { %p4719_p5 = pnand %p1914_p1, %p1913_p0  ;;  %s4728_s2 = scvt.s32.f32 %s2962_s23 }
0x1980   :  { %s2966_s9 = scalar_select %p4706_p2, 0, 1 }
0x1981   :  { %p4730_p6 = pnand %p1920_p4, %p1919_p3  ;;  %s4737_s18 = scvt.s32.f32 %s2965_s3 }
0x1982   :  { %s2957_s7 = scalar_select %p4719_p5, 0, 1 }
0x1983   :  { %s4739_s4 = scvt.s32.f32 %s2966_s9  ;;  %s2628_s6 = ssub.s32 %s4652_s1, %s4650_s8 }
0x1984   :  { %s2958_s28 = scalar_select %p4730_p6, 0, 1 }
0x1985   :  { %s1918_s26 = scvt.s32.f32 %s2957_s7  ;;  %p2629_p7 = scmp.gt.s32.totalorder %s2628_s6, 1 }
0x1986   :  { %s1924_s20 = scvt.s32.f32 %s2958_s28 }
0x1987   :  { %s4870_s6 = smov (!%p2629_p7, %s2628_s6), 1 }
0x1988   :  { %s2631_s19 = scvt.s32.f32 %s4870_s6 }
0x1a34   :  { %v1301_v50 = vpop.f32.mrb[6].mxu0 }
0x1a35   :  { %v1305_v51 = vadd.f32 %v1301_v50, %v1232_v14  ;;  %v3235_v52 = vpop.f32.mrb[7].mxu0  ;;  %v1550_v50 = vld [vmem:[#allocation4 + $0x1] sm:$0x1] }
0x1a37   :  { %3676 = vtanh.f32 %v1305_v51  ;;  %v2943_v54 = vmul.f32 -1.442695, %v1305_v51  ;;  %v1585_v51 = vld [vmem:[#allocation4 + $0x1] sm:$0x1] }
0x1a39   :  { %3678 = vpow2.f32 %v2943_v54 }
0x1a41   :  { %v3677_v53 = vpop.eup %3676 }
0x1a42   :  { %1315 = vrot.lane.b32.xlu0 %v3677_v53, %s4026_s5 }
0x1a43   :  { %v3679_v55 = vpop.eup %3678 }
0x1a44   :  { %v1309_v56 = vadd.f32 1.0, %v3679_v55 }
0x1a46   :  { %3680 = vrcp.f32 %v1309_v56 }
0x1a50   :  { %v3681_v57 = vpop.eup %3680 }
0x1a51   :  { %v1313_v60 = vmul.f32 %v3681_v57, %v1218_v38 }
0x1ab4   :  { %v1316_v58 = vpop.permute.xlu0 %1315 }
0x1ab5   :  { %v1318_v59 = vmul.f32 %v3681_v57, %v1316_v58 }
0x1ab7   :  { %1320 = vrot.lane.b32.xlu1 %v1318_v59, %s4026_s5 }
0x1b29   :  { %v1321_v61 = vpop.permute.xlu1 %1320 }
0x1b2a   :  { %v1323_v62 = vadd.f32 %v1321_v61, %v1313_v60 }
0x1b2c   :  { %3682 = vtanh.f32 %v1323_v62 }
0x1b36   :  { %v3683_v63 = vpop.eup %3682 }
0x1b37   :  { %1326 = vrot.lane.b32.xlu0 %v3683_v63, %s4026_s5 }
0x1ba9   :  { %v1327_v0 = vpop.permute.xlu0 %1326 }
0x1baa   :  { %v1329_v1 = vmul.f32 %v3681_v57, %v1327_v0 }
0x1bac   :  { %1331 = vrot.lane.b32.xlu1 %v1329_v1, %s4027_s16 }
0x1c1e   :  { %v1332_v2 = vpop.permute.xlu1 %1331 }
0x1c1f   :  { %1334 = vst.msk [vmem:[#allocation4 + $0x9] sm:$0x1] %vm388_vm3, %v1332_v2  ;;  %3245 = vmatmul.mubr.msk.f32.vlgmr.msra.gmra.mrb[14].mxu1 %vm179_vm0, %v1332_v2 }
0x1c20   :  { %3266 = vmatprep.mubr.msk.f32.mxu1 %vm4024_vm1, %v4025_v10  ;;  %3496 = vmatpush3.bf16.msra.mxu1 %v3495_v34 }
0x1c21   :  { %3497 = vmatprep.subr.bf16.mxu1 %v4023_v6 }
0x1c24   :  { %3499 = vmatpush3.bf16.msra.mxu1 %v3498_v36 }
0x1c25   :  { %3506 = vmatprep.subr.bf16.mxu1 %v4023_v6 }
0x1c26   :  { %v1553_v5 = vld [vmem:[#allocation4 + $0x9] sm:$0x1] }
0x1c27   :  { %v1582_v7 = vld [vmem:[#allocation4 + $0x9] sm:$0x1]  ;;  %v1555_v8 = vsel %vm278_vm4, %v1553_v5, %v1554_v3  ;;  %3267 = vmatmul.mubr.msk.f32.vlgmr.msra.gmra.mrb[16].mxu1 %vm179_vm0, %v1595_v37 }
0x1c28   :  { %v1583_v9 = vsel %vm278_vm4, %v1581_v4, %v1582_v7  ;;  %1556 = vst.msk [vmem:[#allocation21 + $0x2] sm:$0x1] %vm388_vm3, %v1555_v8  ;;  %3288 = vmatprep.mubr.msk.f32.mxu1 %vm4024_vm1, %v4025_v10  ;;  %3508 = vmatpush3.bf16.msra.mxu1 %v4459_v41 }
0x1c29   :  { %1584 = vst.msk [vmem:[#allocation21 + $0x9] sm:$0x1] %vm388_vm3, %v1583_v9  ;;  %3509 = vmatprep.subr.bf16.mxu1 %v4023_v6 }
0x1c2c   :  { %3511 = vmatpush3.bf16.msra.mxu1 %v4463_v44 }
0x1c2d   :  { %3518 = vmatprep.subr.bf16.mxu1 %v4023_v6 }
0x1cf2   :  { %v1406_v16 = vpop.f32.mrb[14].mxu1 }
0x1cf3   :  { %v1410_v17 = vadd.f32 %v1406_v16, %v1337_v15  ;;  %v3246_v18 = vpop.f32.mrb[15].mxu1 }
0x1cf5   :  { %3684 = vtanh.f32 %v1410_v17  ;;  %v2945_v20 = vmul.f32 -1.442695, %v1410_v17 }
0x1cf7   :  { %3686 = vpow2.f32 %v2945_v20 }
0x1cfa   :  { %v1676_v48 = vpop.f32.mrb[16].mxu1 }
0x1cfb   :  { %v1677_v11 = vadd.f32 %v2949_v47, %v1676_v48  ;;  %v3268_v49 = vpop.f32.mrb[17].mxu1 }
0x1cfd   :  { %1680 = vst [vmem:[#allocation3] sm:$0xff] %v1677_v11 }
0x1cff   :  { %v3685_v19 = vpop.eup %3684 }
0x1d00   :  { %1420 = vrot.lane.b32.xlu0 %v3685_v19, %s4026_s5 }
0x1d01   :  { %v3687_v22 = vpop.eup %3686 }
0x1d02   :  { %v1414_v23 = vadd.f32 1.0, %v3687_v22 }
0x1d04   :  { %3688 = vrcp.f32 %v1414_v23  ;;  %v4492_v56 = vld [vmem:[#allocation3] sm:$0x1]  ;;  %v4494_v57 = vld [vmem:[#allocation3 + $0x7] sm:$0x1]  ;;  %v4496_v58 = vld [vmem:[#allocation3 + $0x1] sm:$0x1] }
0x1d05   :  { %v4498_v59 = vld [vmem:[#allocation3 + $0x6] sm:$0x1]  ;;  %v4500_v60 = vld [vmem:[#allocation3 + $0x2] sm:$0x1]  ;;  %v4502_v61 = vld [vmem:[#allocation3 + $0x5] sm:$0x1]  ;;  %v1691_v7 = vsel %vm4281_vm2, %v4494_v57, %v4492_v56 }
0x1d06   :  { %v4508_v63 = vld [vmem:[#allocation3 + $0x3] sm:$0x1]  ;;  %v4510_v0 = vld [vmem:[#allocation3 + $0x4] sm:$0x1]  ;;  %v2298_v1 = vsel %vm4281_vm2, %v4500_v60, %v4502_v61  ;;  %v2408_v2 = vsel %vm4281_vm2, %v4496_v58, %v4498_v59  ;;  %v1812_v31 = vsel %vm4281_vm2, %v4498_v59, %v4496_v58 }
0x1d07   :  { %v2188_v3 = vsel %vm4281_vm2, %v4508_v63, %v4510_v0 }
0x1d0e   :  { %v3689_v24 = vpop.eup %3688 }
0x1d0f   :  { %v1418_v28 = vmul.f32 %v3689_v24, %v1323_v62  ;;  %v2518_v62 = vsel %vm4281_vm2, %v4492_v56, %v4494_v57  ;;  %v1799_v57 = vstv %s4691_s24 }
0x1d72   :  { %v1421_v26 = vpop.permute.xlu0 %1420 }
0x1d73   :  { %v1423_v27 = vmul.f32 %v3689_v24, %v1421_v26 }
0x1d75   :  { %1425 = vrot.lane.b32.xlu1 %v1423_v27, %s4026_s5 }
0x1de7   :  { %v1426_v29 = vpop.permute.xlu1 %1425 }
0x1de8   :  { %v4450_v30 = vadd.f32 %v1426_v29, %v1418_v28 }
0x1dea   :  { %3690 = vtanh.f32 %v4450_v30 }
0x1df4   :  { %v3691_v38 = vpop.eup %3690 }
0x1df5   :  { %1431 = vrot.lane.b32.xlu0 %v3691_v38, %s4026_s5 }
0x1e67   :  { %v1432_v45 = vpop.permute.xlu0 %1431 }
0x1e68   :  { %v1434_v46 = vmul.f32 %v3689_v24, %v1432_v45 }
0x1e6a   :  { %1436 = vrot.lane.b32.xlu1 %v1434_v46, %s4027_s16 }
0x1edc   :  { %v1437_v14 = vpop.permute.xlu1 %1436 }
0x1edd   :  { %1439 = vst.msk [vmem:[#allocation4 + $0xa] sm:$0x1] %vm388_vm3, %v1437_v14  ;;  %3256 = vmatmul.mubr.msk.f32.vlgmr.msra.gmra.mrb[8].mxu0 %vm179_vm0, %v1437_v14  ;;  %v1938_v14 = vsel %vm4281_vm2, %v4502_v61, %v4500_v60 }
0x1ede   :  { %3502 = vmatpush3.bf16.msra.mxu0 %v4459_v41  ;;  %3277 = vmatprep.mubr.msk.f32.mxu0 %vm4024_vm1, %v4025_v10 }
0x1edf   :  { %3503 = vmatprep.subr.bf16.mxu0 %v4023_v6 }
0x1ee2   :  { %3505 = vmatpush3.bf16.msra.mxu0 %v4463_v44 }
0x1ee3   :  { %3512 = vmatprep.subr.bf16.mxu0 %v4023_v6 }
0x1ee4   :  { %v1549_v52 = vld [vmem:[#allocation4 + $0xa] sm:$0x1] }
0x1ee5   :  { %v1586_v53 = vld [vmem:[#allocation4 + $0xa] sm:$0x1]  ;;  %v1551_v54 = vsel %vm278_vm4, %v1549_v52, %v1550_v50  ;;  %3278 = vmatmul.mubr.f32.vlgmr.msra.gmra.mrb[10].mxu0 %v4025_v10 }
0x1ee6   :  { %v1587_v55 = vsel %vm278_vm4, %v1585_v51, %v1586_v53  ;;  %1552 = vst.msk [vmem:[#allocation21 + $0x1] sm:$0x1] %vm388_vm3, %v1551_v54  ;;  %3514 = vmatpush3.bf16.msra.mxu0 %v4459_v41  ;;  %3299 = vmatprep.mubr.msk.f32.mxu0 %vm4024_vm1, %v4025_v10 }
0x1ee7   :  { %1588 = vst.msk [vmem:[#allocation21 + $0xa] sm:$0x1] %vm388_vm3, %v1587_v55  ;;  %3515 = vmatprep.subr.bf16.mxu0 %v4023_v6 }
0x1eea   :  { %3517 = vmatpush3.bf16.msra.mxu0 %v4463_v44 }
0x1eeb   :  { %3524 = vmatprep.subr.bf16.mxu0 %v4023_v6 }
0x1fb0   :  { %v4524_v4 = vpop.f32.mrb[8].mxu0 }
0x1fb1   :  { %v3257_v5 = vpop.f32.mrb[9].mxu0 }
0x1fb8   :  { %v1758_v8 = vpop.f32.mrb[10].mxu0 }
0x1fb9   :  { %v1762_v9 = vadd.f32 %v1758_v8, %v1691_v7  ;;  %v3279_v12 = vpop.f32.mrb[11].mxu0 }
0x1fbb   :  { %3692 = vtanh.f32 %v1762_v9  ;;  %v2952_v15 = vmul.f32 -1.442695, %v1762_v9 }
0x1fbd   :  { %3694 = vpow2.f32 %v2952_v15 }
0x1fc5   :  { %v3693_v13 = vpop.eup %3692 }
0x1fc6   :  { %1772 = vrot.lane.b32.xlu0 %v3693_v13, %s4026_s5 }
0x1fc7   :  { %v3695_v16 = vpop.eup %3694 }
0x1fc8   :  { %v1766_v17 = vadd.f32 1.0, %v3695_v16 }
0x1fca   :  { %3696 = vrcp.f32 %v1766_v17 }
0x1fd4   :  { %v3697_v18 = vpop.eup %3696 }
0x1fd5   :  { %v1770_v22 = vmul.f32 0.0, %v3697_v18 }
0x2038   :  { %v1773_v19 = vpop.permute.xlu0 %1772 }
0x2039   :  { %v1775_v20 = vmul.f32 %v3697_v18, %v1773_v19 }
0x203b   :  { %1777 = vrot.lane.b32.xlu1 %v1775_v20, %s4026_s5  ;;  %v2064_v20 = vsel %vm4281_vm2, %v4510_v0, %v4508_v63 }
0x20ad   :  { %v1778_v23 = vpop.permute.xlu1 %1777 }
0x20ae   :  { %v1780_v24 = vadd.f32 %v1778_v23, %v1770_v22 }
0x20b0   :  { %3698 = vtanh.f32 %v1780_v24 }
0x20ba   :  { %v3699_v26 = vpop.eup %3698 }
0x20bb   :  { %1783 = vrot.lane.b32.xlu0 %v3699_v26, %s4026_s5 }
0x212d   :  { %v1784_v27 = vpop.permute.xlu0 %1783 }
0x212e   :  { %v4533_v28 = vmul.f32 %v3697_v18, %v1784_v27 }
0x2130   :  { %1814 = vrot.lane.b32.xlu1 %v4533_v28, %s4027_s16 }
0x21a2   :  { %v1815_v29 = vpop.permute.xlu1 %1814 }
0x21a3   :  { %3289 = vmatmul.mubr.msk.f32.vlgmr.msra.gmra.mrb[18].mxu1 %vm179_vm0, %v1815_v29 }
0x21a4   :  { %3520 = vmatpush3.bf16.msra.mxu1 %v4459_v41  ;;  %3310 = vmatprep.mubr.msk.f32.mxu1 %vm4024_vm1, %v4025_v10 }
0x21a5   :  { %3521 = vmatprep.subr.bf16.mxu1 %v4023_v6 }
0x21a8   :  { %3523 = vmatpush3.bf16.msra.mxu1 %v4463_v44 }
0x21a9   :  { %3530 = vmatprep.subr.bf16.mxu1 %v4023_v6 }
0x2276   :  { %v1884_v32 = vpop.f32.mrb[18].mxu1 }
0x2277   :  { %v1888_v33 = vadd.f32 %v1884_v32, %v1812_v31  ;;  %v3290_v34 = vpop.f32.mrb[19].mxu1 }
0x2279   :  { %3700 = vtanh.f32 %v1888_v33  ;;  %v2956_v36 = vmul.f32 -1.442695, %v1888_v33 }
0x227b   :  { %3702 = vpow2.f32 %v2956_v36 }
0x2283   :  { %v3701_v35 = vpop.eup %3700 }
0x2284   :  { %1898 = vrot.lane.b32.xlu0 %v3701_v35, %s4026_s5 }
0x2285   :  { %v3703_v37 = vpop.eup %3702 }
0x2286   :  { %v1892_v38 = vadd.f32 1.0, %v3703_v37 }
0x2288   :  { %3704 = vrcp.f32 %v1892_v38 }
0x2292   :  { %v3705_v39 = vpop.eup %3704 }
0x2293   :  { %v1896_v43 = vmul.f32 %v3705_v39, %v1780_v24 }
0x22f6   :  { %v1899_v40 = vpop.permute.xlu0 %1898 }
0x22f7   :  { %v1901_v42 = vmul.f32 %v3705_v39, %v1899_v40 }
0x22f9   :  { %1903 = vrot.lane.b32.xlu1 %v1901_v42, %s4026_s5 }
0x236b   :  { %v1904_v45 = vpop.permute.xlu1 %1903 }
0x236c   :  { %v1906_v46 = vadd.f32 %v1904_v45, %v1896_v43 }
0x236e   :  { %3706 = vtanh.f32 %v1906_v46 }
0x2378   :  { %v3707_v47 = vpop.eup %3706 }
0x2379   :  { %1909 = vrot.lane.b32.xlu0 %v3707_v47, %s4026_s5 }
0x23eb   :  { %v1910_v48 = vpop.permute.xlu0 %1909 }
0x23ec   :  { %v4551_v11 = vmul.f32 %v3705_v39, %v1910_v48 }
0x23ee   :  { %1940 = vrot.lane.b32.xlu1 %v4551_v11, %s4027_s16 }
0x2460   :  { %v1941_v49 = vpop.permute.xlu1 %1940 }
0x2461   :  { %3300 = vmatmul.mubr.msk.f32.vlgmr.msra.gmra.mrb[12].mxu0 %vm179_vm0, %v1941_v49 }
0x2462   :  { %3526 = vmatpush3.bf16.msra.mxu0 %v4459_v41  ;;  %3321 = vmatprep.mubr.msk.f32.mxu0 %vm4024_vm1, %v4025_v10 }
0x2463   :  { %3527 = vmatprep.subr.bf16.mxu0 %v4023_v6 }
0x2466   :  { %3529 = vmatpush3.bf16.msra.mxu0 %v4463_v44 }
0x2467   :  { %3536 = vmatprep.subr.bf16.mxu0 %v4023_v6 }
0x2534   :  { %v2010_v50 = vpop.f32.mrb[12].mxu0 }
0x2535   :  { %v2014_v51 = vadd.f32 %v2010_v50, %v1938_v14  ;;  %v3301_v52 = vpop.f32.mrb[13].mxu0 }
0x2537   :  { %3708 = vtanh.f32 %v2014_v51  ;;  %v2960_v54 = vmul.f32 -1.442695, %v2014_v51 }
0x2539   :  { %3710 = vpow2.f32 %v2960_v54 }
0x2541   :  { %v3709_v53 = vpop.eup %3708 }
0x2542   :  { %2024 = vrot.lane.b32.xlu0 %v3709_v53, %s4026_s5 }
0x2543   :  { %v3711_v55 = vpop.eup %3710 }
0x2544   :  { %v2018_v5 = vadd.f32 1.0, %v3711_v55 }
0x2546   :  { %3712 = vrcp.f32 %v2018_v5 }
0x2550   :  { %v3713_v7 = vpop.eup %3712 }
0x2551   :  { %v2022_v12 = vmul.f32 %v3713_v7, %v1906_v46 }
0x25b4   :  { %v2025_v8 = vpop.permute.xlu0 %2024 }
0x25b5   :  { %v2027_v9 = vmul.f32 %v3713_v7, %v2025_v8 }
0x25b7   :  { %2029 = vrot.lane.b32.xlu1 %v2027_v9, %s4026_s5 }
0x2629   :  { %v2030_v13 = vpop.permute.xlu1 %2029 }
0x262a   :  { %v2032_v15 = vadd.f32 %v2030_v13, %v2022_v12 }
0x262c   :  { %3714 = vtanh.f32 %v2032_v15 }
0x2636   :  { %v3715_v16 = vpop.eup %3714 }
0x2637   :  { %2035 = vrot.lane.b32.xlu0 %v3715_v16, %s4026_s5 }
0x26a9   :  { %v2036_v17 = vpop.permute.xlu0 %2035 }
0x26aa   :  { %v4569_v18 = vmul.f32 %v3713_v7, %v2036_v17 }
0x26ac   :  { %2066 = vrot.lane.b32.xlu1 %v4569_v18, %s4027_s16 }
0x271e   :  { %v2067_v19 = vpop.permute.xlu1 %2066 }
0x271f   :  { %3311 = vmatmul.mubr.msk.f32.vlgmr.msra.gmra.mrb[20].mxu1 %vm179_vm0, %v2067_v19 }
0x2720   :  { %3532 = vmatpush3.bf16.msra.mxu1 %v4459_v41  ;;  %3332 = vmatprep.mubr.msk.f32.mxu1 %vm4024_vm1, %v4025_v10 }
0x2721   :  { %3533 = vmatprep.subr.bf16.mxu1 %v4023_v6 }
0x2724   :  { %3535 = vmatpush3.bf16.msra.mxu1 %v4463_v44 }
0x2725   :  { %3542 = vmatprep.subr.bf16.mxu1 %v4023_v6 }
0x27f2   :  { %v2136_v22 = vpop.f32.mrb[20].mxu1 }
0x27f3   :  { %v2140_v23 = vadd.f32 %v2136_v22, %v2064_v20  ;;  %v3312_v24 = vpop.f32.mrb[21].mxu1 }
0x27f5   :  { %3716 = vtanh.f32 %v2140_v23  ;;  %v2964_v27 = vmul.f32 -1.442695, %v2140_v23 }
0x27f7   :  { %3718 = vpow2.f32 %v2964_v27 }
0x27ff   :  { %v3717_v26 = vpop.eup %3716 }
0x2800   :  { %2150 = vrot.lane.b32.xlu0 %v3717_v26, %s4026_s5 }
0x2801   :  { %v3719_v29 = vpop.eup %3718 }
0x2802   :  { %v2144_v31 = vadd.f32 1.0, %v3719_v29 }
0x2804   :  { %3720 = vrcp.f32 %v2144_v31 }
0x280e   :  { %v3721_v32 = vpop.eup %3720 }
0x280f   :  { %v2148_v35 = vmul.f32 %v3721_v32, %v2032_v15 }
0x2872   :  { %v2151_v33 = vpop.permute.xlu0 %2150 }
0x2873   :  { %v2153_v34 = vmul.f32 %v3721_v32, %v2151_v33 }
0x2875   :  { %2155 = vrot.lane.b32.xlu1 %v2153_v34, %s4026_s5 }
0x28e7   :  { %v2156_v36 = vpop.permute.xlu1 %2155 }
0x28e8   :  { %v2158_v37 = vadd.f32 %v2156_v36, %v2148_v35 }
0x28ea   :  { %3722 = vtanh.f32 %v2158_v37 }
0x28f4   :  { %v3723_v38 = vpop.eup %3722 }
0x28f5   :  { %2161 = vrot.lane.b32.xlu0 %v3723_v38, %s4026_s5 }
0x2967   :  { %v2162_v39 = vpop.permute.xlu0 %2161 }
0x2968   :  { %v4587_v40 = vmul.f32 %v3721_v32, %v2162_v39 }
0x296a   :  { %2190 = vrot.lane.b32.xlu1 %v4587_v40, %s4027_s16 }
0x29dc   :  { %v2191_v42 = vpop.permute.xlu1 %2190 }
0x29dd   :  { %3322 = vmatmul.mubr.msk.f32.vlgmr.msra.gmra.mrb[14].mxu0 %vm179_vm0, %v2191_v42 }
0x29de   :  { %3538 = vmatpush3.bf16.msra.mxu0 %v4459_v41  ;;  %3343 = vmatprep.mubr.msk.f32.mxu0 %vm4024_vm1, %v4025_v10 }
0x29df   :  { %3539 = vmatprep.subr.bf16.mxu0 %v4023_v6 }
0x29e2   :  { %3541 = vmatpush3.bf16.msra.mxu0 %v4463_v44 }
0x29e3   :  { %3548 = vmatprep.subr.bf16.mxu0 %v4023_v6 }
0x2ab0   :  { %v2260_v43 = vpop.f32.mrb[14].mxu0 }
0x2ab1   :  { %v2264_v45 = vadd.f32 %v2260_v43, %v2188_v3  ;;  %v3323_v46 = vpop.f32.mrb[15].mxu0 }
0x2ab3   :  { %3724 = vtanh.f32 %v2264_v45  ;;  %v2968_v48 = vmul.f32 -1.442695, %v2264_v45 }
0x2ab5   :  { %3726 = vpow2.f32 %v2968_v48 }
0x2abd   :  { %v3725_v47 = vpop.eup %3724 }
0x2abe   :  { %2274 = vrot.lane.b32.xlu0 %v3725_v47, %s4026_s5  ;;  %v4711_v47 = vsel %vm1681_vm5, 1.0, %v4025_v10 }
0x2abf   :  { %v3727_v49 = vpop.eup %3726  ;;  %v1684_v56 = vsub.f32 1.0, %v4711_v47  ;;  %v1800_v48 = vmul.f32 %v4711_v47, %v1799_v57 }
0x2ac0   :  { %v2268_v14 = vadd.f32 1.0, %v3727_v49 }
0x2ac2   :  { %3728 = vrcp.f32 %v2268_v14  ;;  %v2051_v14 = vstv %s4717_s17 }
0x2acc   :  { %v3729_v50 = vpop.eup %3728 }
0x2acd   :  { %v2272_v53 = vmul.f32 %v3729_v50, %v2158_v37 }
0x2b30   :  { %v2275_v51 = vpop.permute.xlu0 %2274 }
0x2b31   :  { %v2277_v52 = vmul.f32 %v3729_v50, %v2275_v51 }
0x2b33   :  { %2279 = vrot.lane.b32.xlu1 %v2277_v52, %s4026_s5 }
0x2ba5   :  { %v2280_v54 = vpop.permute.xlu1 %2279 }
0x2ba6   :  { %v2282_v55 = vadd.f32 %v2280_v54, %v2272_v53  ;;  %v2052_v53 = vmul.f32 %v4711_v47, %v2051_v14 }
0x2ba8   :  { %3730 = vtanh.f32 %v2282_v55 }
0x2bb2   :  { %v3731_v63 = vpop.eup %3730 }
0x2bb3   :  { %2285 = vrot.lane.b32.xlu0 %v3731_v63, %s4026_s5  ;;  %v2179_v63 = vstv %s4739_s4 }
0x2c25   :  { %v2286_v0 = vpop.permute.xlu0 %2285 }
0x2c26   :  { %v4606_v3 = vmul.f32 %v3729_v50, %v2286_v0  ;;  %v2053_v50 = vstv %s4728_s2 }
0x2c27   :  { %v2054_v54 = vmul.f32 %v2053_v50, %v1684_v56 }
0x2c28   :  { %2300 = vrot.lane.b32.xlu1 %v4606_v3, %s4027_s16 }
0x2c29   :  { %v2055_v0 = vadd.f32 %v2054_v54, %v2052_v53 }
0x2c9a   :  { %v2301_v5 = vpop.permute.xlu1 %2300 }
0x2c9b   :  { %3333 = vmatmul.mubr.msk.f32.vlgmr.msra.gmra.mrb[22].mxu1 %vm179_vm0, %v2301_v5  ;;  %v2289_v5 = vmul.f32 %v4711_v47, %v2179_v63 }
0x2c9c   :  { %3544 = vmatpush3.bf16.msra.mxu1 %v4459_v41  ;;  %3354 = vmatprep.mubr.msk.f32.mxu1 %vm4024_vm1, %v4025_v10 }
0x2c9d   :  { %3545 = vmatprep.subr.bf16.mxu1 %v4023_v6 }
0x2ca0   :  { %3547 = vmatpush3.bf16.msra.mxu1 %v4463_v44 }
0x2ca1   :  { %3554 = vmatprep.subr.bf16.mxu1 %v4023_v6 }
0x2d6e   :  { %v2370_v7 = vpop.f32.mrb[22].mxu1 }
0x2d6f   :  { %v2374_v8 = vadd.f32 %v2370_v7, %v2298_v1  ;;  %v3334_v9 = vpop.f32.mrb[23].mxu1 }
0x2d70   :  { %v1927_v9 = vstv %s1924_s20 }
0x2d71   :  { %3732 = vtanh.f32 %v2374_v8  ;;  %v2970_v41 = vmul.f32 -1.442695, %v2374_v8  ;;  %v1925_v8 = vstv %s1918_s26 }
0x2d73   :  { %3734 = vpow2.f32 %v2970_v41  ;;  %v2509_v41 = vmul.f32 %v4711_v47, %v1927_v9 }
0x2d7b   :  { %v3733_v12 = vpop.eup %3732 }
0x2d7c   :  { %2384 = vrot.lane.b32.xlu0 %v3733_v12, %s4026_s5 }
0x2d7d   :  { %v3735_v13 = vpop.eup %3734 }
0x2d7e   :  { %v2378_v15 = vadd.f32 1.0, %v3735_v13  ;;  %v2510_v13 = vmul.f32 %v1925_v8, %v1684_v56 }
0x2d80   :  { %3736 = vrcp.f32 %v2378_v15  ;;  %v2511_v15 = vadd.f32 %v2510_v13, %v2509_v41 }
0x2d8a   :  { %v3737_v44 = vpop.eup %3736 }
0x2d8b   :  { %v2382_v19 = vmul.f32 %v3737_v44, %v2282_v55  ;;  %v2177_v55 = vstv %s4737_s18 }
0x2d8c   :  { %v2290_v7 = vmul.f32 %v2177_v55, %v1684_v56 }
0x2d8e   :  { %v2291_v12 = vadd.f32 %v2290_v7, %v2289_v5  ;;  %v1440_v5 = vld [vmem:[#allocation2 + $0xb] sm:$0x1]  ;;  %v1441_v7 = vld [vmem:[#allocation2] sm:$0x1] }
0x2d8f   :  { %v1442_v41 = vsel %vm4281_vm2, %v1441_v7, %v1440_v5 }
0x2dee   :  { %v2385_v16 = vpop.permute.xlu0 %2384 }
0x2def   :  { %v2387_v17 = vmul.f32 %v3737_v44, %v2385_v16 }
0x2df1   :  { %2389 = vrot.lane.b32.xlu1 %v2387_v17, %s4026_s5 }
0x2e63   :  { %v2390_v20 = vpop.permute.xlu1 %2389 }
0x2e64   :  { %v2392_v22 = vadd.f32 %v2390_v20, %v2382_v19  ;;  %v1926_v19 = vmul.f32 %v4711_v47, %v1925_v8  ;;  %v1928_v20 = vmul.f32 %v1927_v9, %v1684_v56  ;;  %v2639_v9 = vld [vmem:[#allocation18 + $0x10] sm:$0xff] }
0x2e66   :  { %3738 = vtanh.f32 %v2392_v22 }
0x2e70   :  { %v3739_v60 = vpop.eup %3738 }
0x2e71   :  { %2395 = vrot.lane.b32.xlu0 %v3739_v60, %s4026_s5 }
0x2ee3   :  { %v2396_v61 = vpop.permute.xlu0 %2395 }
0x2ee4   :  { %v4625_v1 = vmul.f32 %v3737_v44, %v2396_v61 }
0x2ee6   :  { %2410 = vrot.lane.b32.xlu1 %v4625_v1, %s4027_s16 }
0x2f58   :  { %v2411_v23 = vpop.permute.xlu1 %2410 }
0x2f59   :  { %3344 = vmatmul.mubr.msk.f32.vlgmr.msra.gmra.mrb[16].mxu0 %vm179_vm0, %v2411_v23  ;;  %v1929_v23 = vadd.f32 %v1928_v20, %v1926_v19 }
0x2f5a   :  { %3365 = vmatprep.mubr.msk.f32.mxu0 %vm4024_vm1, %v4025_v10 }
0x302c   :  { %v2480_v24 = vpop.f32.mrb[16].mxu0 }
0x302d   :  { %v2484_v26 = vadd.f32 %v2480_v24, %v2408_v2  ;;  %v3345_v27 = vpop.f32.mrb[17].mxu0  ;;  %v2178_v24 = vmul.f32 %v4711_v47, %v2177_v55 }
0x302f   :  { %3740 = vtanh.f32 %v2484_v26  ;;  %v2972_v31 = vmul.f32 -1.442695, %v2484_v26  ;;  %v2180_v26 = vmul.f32 %v2179_v63, %v1684_v56 }
0x3031   :  { %3742 = vpow2.f32 %v2972_v31 }
0x3039   :  { %v3741_v29 = vpop.eup %3740 }
0x303a   :  { %2494 = vrot.lane.b32.xlu0 %v3741_v29, %s4026_s5  ;;  %v2620_v29 = vmul.f32 %v1799_v57, %v1684_v56  ;;  %v2638_v57 = vld [vmem:[#allocation18 + $0x8] sm:$0xff] }
0x303b   :  { %v3743_v32 = vpop.eup %3742 }
0x303c   :  { %v2488_v33 = vadd.f32 1.0, %v3743_v32  ;;  %v2181_v32 = vadd.f32 %v2180_v26, %v2178_v24 }
0x303e   :  { %3744 = vrcp.f32 %v2488_v33  ;;  %v2399_v33 = vmul.f32 %v4711_v47, %v2053_v50 }
0x3048   :  { %v3745_v34 = vpop.eup %3744 }
0x3049   :  { %v2492_v37 = vmul.f32 %v3745_v34, %v2392_v22 }
0x30ac   :  { %v2495_v35 = vpop.permute.xlu0 %2494 }
0x30ad   :  { %v2497_v36 = vmul.f32 %v3745_v34, %v2495_v35 }
0x30af   :  { %2499 = vrot.lane.b32.xlu1 %v2497_v36, %s4026_s5  ;;  %v2632_v36 = vstv %s2631_s19 }
0x3121   :  { %v2500_v38 = vpop.permute.xlu1 %2499 }
0x3122   :  { %v4639_v39 = vadd.f32 %v2500_v38, %v2492_v37 }
0x3124   :  { %3746 = vtanh.f32 %v4639_v39 }
0x312e   :  { %v3747_v58 = vpop.eup %3746 }
0x312f   :  { %2505 = vrot.lane.b32.xlu0 %v3747_v58, %s4026_s5 }
0x31a1   :  { %v2506_v59 = vpop.permute.xlu0 %2505 }
0x31a2   :  { %v4643_v2 = vmul.f32 %v3745_v34, %v2506_v59  ;;  %v2400_v34 = vmul.f32 %v2051_v14, %v1684_v56 }
0x31a4   :  { %2520 = vrot.lane.b32.xlu1 %v4643_v2, %s4027_s16  ;;  %v2401_v35 = vadd.f32 %v2400_v34, %v2399_v33  ;;  %v2798_v34 = vld [vmem:[#allocation19] sm:$0xff] }
0x3216   :  { %v2521_v42 = vpop.permute.xlu1 %2520 }
0x3217   :  { %3355 = vmatmul.mubr.msk.f32.vlgmr.msra.gmra.mrb[24].mxu1 %vm179_vm0, %v2521_v42  ;;  %v2641_v42 = vld [vmem:[#allocation18 + $0x20] sm:$0xff] }
0x3218   :  { %3376 = vmatprep.mubr.msk.f32.mxu1 %vm4024_vm1, %v4025_v10 }
0x32ea   :  { %v2590_v43 = vpop.f32.mrb[24].mxu1 }
0x32eb   :  { %v2594_v45 = vadd.f32 %v2590_v43, %v2518_v62  ;;  %v3356_v46 = vpop.f32.mrb[25].mxu1  ;;  %v1801_v62 = vstv %s4704_s27  ;;  %v2642_v43 = vld [vmem:[#allocation18 + $0x28] sm:$0xff] }
0x32ec   :  { %v1802_v49 = vmul.f32 %v1801_v62, %v1684_v56  ;;  %v2619_v27 = vmul.f32 %v4711_v47, %v1801_v62  ;;  %v3549_v46 = vpack.c.bf16 %v2642_v43, %v2641_v42  ;;  %v2644_v47 = vld [vmem:[#allocation18 + $0x38] sm:$0xff]  ;;  %v2637_v56 = vld [vmem:[#allocation18] sm:$0xff]  ;;  %v2803_v42 = vld [vmem:[#allocation19 + $0x28] sm:$0xff] }
0x32ed   :  { %3748 = vtanh.f32 %v2594_v45  ;;  %v2974_v44 = vmul.f32 -1.442695, %v2594_v45  ;;  %v2643_v45 = vld [vmem:[#allocation18 + $0x30] sm:$0xff]  ;;  %v3555_v62 = vpack.c.bf16 %v2638_v57, %v2637_v56  ;;  %v2807_v56 = vld [vmem:[#allocation19 + $0x48] sm:$0xff] }
0x32ee   :  { %v1803_v52 = vadd.f32 %v1802_v49, %v1800_v48  ;;  %v2621_v31 = vadd.f32 %v2620_v29, %v2619_v27  ;;  %3550 = vmatpush3.bf16.msra.mxu0 %v3549_v46  ;;  %v3552_v48 = vpack.c.bf16 %v2644_v47, %v2643_v45  ;;  %v2804_v43 = vld [vmem:[#allocation19 + $0x30] sm:$0xff]  ;;  %v2805_v45 = vld [vmem:[#allocation19 + $0x38] sm:$0xff]  ;;  %v2806_v47 = vld [vmem:[#allocation19 + $0x40] sm:$0xff] }
0x32ef   :  { %3750 = vpow2.f32 %v2974_v44  ;;  %3551 = vmatprep.subr.bf16.mxu0 %v4023_v6  ;;  %3556 = vmatpush3.bf16.msra.mxu1 %v3555_v62  ;;  %v3570_v46 = vpack.c.bf16 %v2805_v45, %v2804_v43  ;;  %v3573_v57 = vpack.c.bf16 %v2807_v56, %v2806_v47  ;;  %v2808_v62 = vld [vmem:[#allocation19 + $0x50] sm:$0xff] }
0x32f0   :  { %3557 = vmatprep.subr.bf16.mxu1 %v4023_v6 }
0x32f2   :  { %3553 = vmatpush3.bf16.msra.mxu0 %v3552_v48  ;;  %v2809_v48 = vld [vmem:[#allocation19 + $0x58] sm:$0xff] }
0x32f3   :  { %3560 = vmatprep.subr.bf16.mxu0 %v4023_v6 }
0x32f7   :  { %v3749_v51 = vpop.eup %3748 }
0x32f8   :  { %2604 = vrot.lane.b32.xlu0 %v3749_v51, %s4026_s5 }
0x32f9   :  { %v3751_v16 = vpop.eup %3750 }
0x32fa   :  { %v2598_v17 = vadd.f32 1.0, %v3751_v16 }
0x32fc   :  { %1805 = vrot.lane.b32.xlu0 %v1803_v52, %s4027_s16  ;;  %3752 = vrcp.f32 %v2598_v17 }
0x32fd   :  { %3754 = vrcp.f32 %v2632_v36  ;;  %v2800_v36 = vld [vmem:[#allocation19 + $0x10] sm:$0xff] }
0x3300   :  { %2057 = vrot.lane.b32.xlu0 %v2055_v0, %s4027_s16 }
0x3304   :  { %2293 = vrot.lane.b32.xlu0 %v2291_v12, %s4027_s16  ;;  %v2640_v12 = vld [vmem:[#allocation18 + $0x18] sm:$0xff] }
0x3306   :  { %v4756_v22 = vpop.eup %3752 }
0x3307   :  { %v3755_v37 = vpop.eup %3754  ;;  %v2602_v38 = vmul.f32 %v4756_v22, %v4639_v39 }
0x3308   :  { %2513 = vrot.lane.b32.xlu0 %v2511_v15, %s4027_s16  ;;  %3584 = vpush %v3755_v37 }
0x330c   :  { %2623 = vrot.lane.b32.xlu0 %v2621_v31, %s4027_s16 }
0x3339   :  { %s3585_s8 = spop %3584 }
0x336a   :  { %v2605_v60 = vpop.permute.xlu0 %2604 }
0x336b   :  { %v2607_v61 = vmul.f32 %v4756_v22, %v2605_v60 }
0x336d   :  { %2609 = vrot.lane.b32.xlu1 %v2607_v61, %s4026_s5 }
0x336e   :  { %v1806_v39 = vpop.permute.xlu0 %1805 }
0x336f   :  { %v1808_v51 = vmul.f32 %v1806_v39, %v4533_v28  ;;  %v1515_v28 = vadd.f32 %v4524_v4, %v1442_v41  ;;  %v2635_v4 = vstv %s3585_s8  ;;  %v2810_v39 = vld [vmem:[#allocation19 + $0x60] sm:$0xff] }
0x3371   :  { %1931 = vrot.lane.b32.xlu1 %v1929_v23, %s4027_s16 }
0x3372   :  { %v2058_v52 = vpop.permute.xlu0 %2057 }
0x3373   :  { %v2060_v55 = vmul.f32 %v2058_v52, %v4569_v18  ;;  %v2813_v52 = vld [vmem:[#allocation19 + $0x78] sm:$0xff] }
0x3375   :  { %2183 = vrot.lane.b32.xlu1 %v2181_v32, %s4027_s16 }
0x3376   :  { %v2294_v8 = vpop.permute.xlu0 %2293 }
0x3377   :  { %v2296_v44 = vmul.f32 %v2294_v8, %v4606_v3 }
0x3379   :  { %2403 = vrot.lane.b32.xlu1 %v2401_v35, %s4027_s16  ;;  %v2799_v35 = vld [vmem:[#allocation19 + $0x8] sm:$0xff] }
0x337a   :  { %v3561_v37 = vpack.c.bf16 %v2799_v35, %v2798_v34 }
0x33df   :  { %v2610_v58 = vpop.permute.xlu1 %2609 }
0x33e0   :  { %v2612_v59 = vadd.f32 %v2610_v58, %v2602_v38  ;;  %v2801_v38 = vld [vmem:[#allocation19 + $0x18] sm:$0xff] }
0x33e1   :  { %v3564_v58 = vpack.c.bf16 %v2801_v38, %v2800_v36 }
0x33e2   :  { %3756 = vtanh.f32 %v2612_v59  ;;  %v2802_v59 = vld [vmem:[#allocation19 + $0x20] sm:$0xff] }
0x33e3   :  { %v1932_v14 = vpop.permute.xlu1 %1931  ;;  %3758 = vtanh.f32 %v1515_v28 }
0x33e4   :  { %v1934_v50 = vmul.f32 %v1932_v14, %v4551_v11  ;;  %v3558_v11 = vpack.c.bf16 %v2640_v12, %v2639_v9  ;;  %v2811_v14 = vld [vmem:[#allocation19 + $0x68] sm:$0xff]  ;;  %v2795_v9 = vld [vmem:[%s4854_s10] sm:$0x1] }
0x33e6   :  { %v1935_v53 = vadd.f32 %v1934_v50, %v1808_v51  ;;  %3559 = vmatpush3.bf16.msra.mxu1 %v3558_v11  ;;  %v3579_v50 = vpack.c.bf16 %v2811_v14, %v2810_v39  ;;  %v2812_v51 = vld [vmem:[#allocation19 + $0x70] sm:$0xff] }
0x33e7   :  { %v2184_v54 = vpop.permute.xlu1 %2183 }
0x33e8   :  { %v2061_v63 = vadd.f32 %v2060_v55, %v1935_v53  ;;  %v2186_v0 = vmul.f32 %v2184_v54, %v4587_v40  ;;  %v2514_v40 = vpop.permute.xlu0 %2513  ;;  %v3582_v53 = vpack.c.bf16 %v2813_v52, %v2812_v51 }
0x33e9   :  { %v2516_v60 = vmul.f32 %v2514_v40, %v4643_v2 }
0x33ea   :  { %v2187_v13 = vadd.f32 %v2186_v0, %v2061_v63 }
0x33eb   :  { %v2404_v15 = vpop.permute.xlu1 %2403 }
0x33ec   :  { %v3757_v49 = vpop.eup %3756  ;;  %v2297_v18 = vadd.f32 %v2296_v44, %v2187_v13  ;;  %v2406_v16 = vmul.f32 %v2404_v15, %v4625_v1  ;;  %v2624_v20 = vpop.permute.xlu0 %2623  ;;  %v2947_v1 = vmul.f32 -1.442695, %v1515_v28  ;;  %v1546_v15 = vld [vmem:[#allocation4] sm:$0x1] }
0x33ed   :  { %2615 = vrot.lane.b32.xlu1 %v3757_v49, %s4026_s5  ;;  %v3759_v24 = vpop.eup %3758  ;;  %v3576_v49 = vpack.c.bf16 %v2809_v48, %v2808_v62  ;;  %v1589_v44 = vld [vmem:[#allocation4] sm:$0x1] }
0x33ee   :  { %v2407_v17 = vadd.f32 %v2406_v16, %v2297_v18  ;;  %3760 = vpow2.f32 %v2947_v1 }
0x33f0   :  { %v2517_v61 = vadd.f32 %v2516_v60, %v2407_v17 }
0x33f8   :  { %v3761_v27 = vpop.eup %3760 }
0x33f9   :  { %v1519_v29 = vadd.f32 1.0, %v3761_v27 }
0x33fb   :  { %3762 = vrcp.f32 %v1519_v29 }
0x345f   :  { %v2616_v19 = vpop.permute.xlu1 %2615 }
0x3460   :  { %v2618_v25 = vmul.f32 %v4756_v22, %v2616_v19  ;;  %v3763_v22 = vpop.eup %3762 }
0x3461   :  { %v1523_v54 = vmul.f32 %v3763_v22, %v4450_v30 }
0x3462   :  { %v2626_v23 = vmul.f32 %v2624_v20, %v2618_v25  ;;  %2646 = vrot.lane.b32.xlu1 %v2618_v25, %s4027_s16 }
0x3464   :  { %v2627_v3 = vadd.f32 %v2626_v23, %v2517_v61 }
0x3466   :  { %v2636_v26 = vmul.f32 %v2635_v4, %v2627_v3  ;;  %1525 = vrot.lane.b32.xlu1 %v3759_v24, %s4026_s5 }
0x3468   :  { %2721 = vrot.lane.b32.xlu0 %v2636_v26, %s4027_s16 }
0x34d4   :  { %v2647_v2 = vpop.permute.xlu1 %2646 }
0x34d5   :  { %3366 = vmatmul.mubr.msk.f32.vlgmr.msra.gmra.mrb[18].mxu0 %vm179_vm0, %v2647_v2 }
0x34d6   :  { %3411 = vmatprep.mubr.msk.f32.mxu0 %vm4024_vm1, %v4025_v10  ;;  %3562 = vmatpush3.bf16.msra.mxu0 %v3561_v37  ;;  %v3567_v10 = vpack.c.bf16 %v2803_v42, %v2802_v59 }
0x34d7   :  { %3563 = vmatprep.subr.bf16.mxu0 %v4023_v6 }
0x34d8   :  { %v1526_v31 = vpop.permute.xlu1 %1525 }
0x34d9   :  { %v1528_v32 = vmul.f32 %v3763_v22, %v1526_v31 }
0x34da   :  { %v2722_v33 = vpop.permute.xlu0 %2721  ;;  %3565 = vmatpush3.bf16.msra.mxu0 %v3564_v58 }
0x34db   :  { %1530 = vrot.lane.b32.xlu0 %v1528_v32, %s4026_s5  ;;  %3377 = vmatmul.mubr.msk.f32.vlgmr.msra.gmra.mrb[26].mxu1 %vm179_vm0, %v2722_v33 }
0x34dc   :  { %3566 = vmatprep.subr.bf16.mxu0 %v4023_v6 }
0x34de   :  { %3568 = vmatpush3.bf16.msra.mxu0 %v3567_v10 }
0x34df   :  { %3569 = vmatprep.subr.bf16.mxu0 %v4023_v6 }
0x34e2   :  { %3571 = vmatpush3.bf16.msra.mxu0 %v3570_v46 }
0x34e3   :  { %3572 = vmatprep.subr.bf16.mxu0 %v4023_v6 }
0x34e6   :  { %3574 = vmatpush3.bf16.msra.mxu0 %v3573_v57 }
0x34e7   :  { %3575 = vmatprep.subr.bf16.mxu0 %v4023_v6 }
0x34ea   :  { %3577 = vmatpush3.bf16.msra.mxu0 %v3576_v49 }
0x34eb   :  { %3578 = vmatprep.subr.bf16.mxu0 %v4023_v6 }
0x34ee   :  { %3580 = vmatpush3.bf16.msra.mxu0 %v3579_v50 }
0x34ef   :  { %3581 = vmatprep.subr.bf16.mxu0 %v4023_v6 }
0x34f2   :  { %3583 = vmatpush3.bf16.msra.mxu0 %v3582_v53 }
0x354d   :  { %v1531_v55 = vpop.permute.xlu0 %1530 }
0x354e   :  { %v1533_v63 = vadd.f32 %v1531_v55, %v1523_v54 }
0x3550   :  { %3764 = vtanh.f32 %v1533_v63 }
0x355a   :  { %v3765_v0 = vpop.eup %3764 }
0x355b   :  { %1536 = vrot.lane.b32.xlu1 %v3765_v0, %s4026_s5  ;;  %s4028_s5 = smov [#allocation21]  }
0x355c   :  { %s2891_s0 = sshll.u32 %s4028_s5, 4  ;;  %s2892_s0 = int_to_ptr.vmem [resolvable:$true] %s2891_s0 }
0x355d   :  { %s3952_s10 = scalar_lea.vmem %s2892_s0, 256  ;;  %p3957_p9 = scmp.lt.s32.totalorder %s2892_s0, %s2892_s0 }
0x355e   :  { %p3953_p8 = scmp.ne.s32.totalorder %s2892_s0, %s3952_s10  ;;  %p3958_p10 = scmp.lt.s32.totalorder %s3952_s10, %s3952_s10 }
0x3560   :  { %p3959_p11 = por %p3958_p10, %p3957_p9 }
0x3562   :  { %p3960_p12 = pnand %p3959_p11, %p3953_p8 }
0x35a8   :  { %v2716_v5 = vpop.f32.mrb[18].mxu0 }
0x35a9   :  { %v3367_v7 = vpop.f32.mrb[19].mxu0 }
0x35ae   :  { %v2791_v8 = vpop.f32.mrb[26].mxu1 }
0x35af   :  { %v2792_v12 = vadd.f32 %v2791_v8, %v2716_v5  ;;  %v3378_v41 = vpop.f32.mrb[27].mxu1 }
0x35b1   :  { %v2796_v13 = vadd.f32 %v2795_v9, %v2792_v12 }
0x35b3   :  { %v2797_v6 = vmax.f32 %v2796_v13, 0.0 }
0x35b5   :  { %3412 = vmatmul.mubr.f32.vlgmr.msra.gmra.mrb[20].mxu0 %v2797_v6 }
0x35cd   :  { %v1537_v11 = vpop.permute.xlu1 %1536 }
0x35ce   :  { %v1539_v30 = vmul.f32 %v3763_v22, %v1537_v11 }
0x35d0   :  { %1541 = vrot.lane.b32.xlu0 %v1539_v30, %s4027_s16 }
0x3642   :  { %v1542_v28 = vpop.permute.xlu0 %1541 }
0x3643   :  { %1544 = vst.msk [vmem:[#allocation4 + $0xb] sm:$0x1] %vm388_vm3, %v1542_v28 }
0x364a   :  { %v1545_v18 = vld [vmem:[#allocation4 + $0xb] sm:$0x1] }
0x364b   :  { %v1590_v16 = vld [vmem:[#allocation4 + $0xb] sm:$0x1]  ;;  %v1547_v40 = vsel %vm278_vm4, %v1545_v18, %v1546_v15 }
0x364c   :  { %v1591_v17 = vsel %vm278_vm4, %v1589_v44, %v1590_v16  ;;  %1548 = vst.msk [vmem:[#allocation21] sm:$0x1] %vm388_vm3, %v1547_v40 }
0x364d   :  { %1592 = vst.msk [vmem:[#allocation21 + $0xb] sm:$0x1] %vm388_vm3, %v1591_v17 }
0x364e   :  { %3963 = shalt.err (!%p3960_p12)
}
0x364f   :  { %s3964_s24 = scalar_lea.hbm %s4857_s13, 256 }
0x3650   :  { %p3965_p13 = scmp.ne.s32.totalorder %s4857_s13, %s3964_s24  ;;  %p3968_p0 = scmp.lt.u32.totalorder %s3964_s24, %s4857_s13 }
0x3652   :  { %p3970_p1 = pnand %p3968_p0, %p3965_p13 }
0x3654   :  { %3973 = shalt.err (!%p3970_p1)
}
0x3655   :  { %2897 = dma.vmem_to_hbm [thread:$0]  %s2892_s0, 256, %s4857_s13, [#allocation7], %s4015_s30, %s4015_s30, %s4016_s21  }
0x3656   :  { %v2814_v21 = vld [vmem:[%s4856_s12] sm:$0x1]  ;;  %s4029_s11 = smov [#allocation22]  }
0x3657   :  { %s2904_s7 = sshll.u32 %s4029_s11, 4  ;;  %s2905_s7 = int_to_ptr.vmem [resolvable:$true] %s2904_s7 }
0x3658   :  { %s3974_s18 = scalar_lea.vmem %s2905_s7, 16  ;;  %s3978_s4 = scalar_lea.vmem %s2905_s7, 32 }
0x3659   :  { %p3975_p2 = scmp.ne.s32.totalorder %s2905_s7, %s3974_s18  ;;  %p3979_p3 = scmp.lt.s32.totalorder %s2905_s7, %s2905_s7 }
0x365a   :  { %p3980_p4 = scmp.lt.s32.totalorder %s3978_s4, %s3974_s18 }
0x365c   :  { %p3981_p5 = por %p3980_p4, %p3979_p3 }
0x365e   :  { %p3982_p6 = pnand %p3981_p5, %p3975_p2 }
0x3688   :  { %v2881_v19 = vpop.f32.mrb[20].mxu0 }
0x3689   :  { %v2882_v20 = vadd.f32 %v2881_v19, %v2814_v21  ;;  %v3413_v60 = vpop.f32.mrb[21].mxu0 }
0x368b   :  { %2885 = vst [vmem:[#allocation22] sm:$0x1] %v2882_v20 }
0x368c   :  { %3985 = shalt.err (!%p3982_p6)
}
0x368d   :  { %s3986_s21 = scalar_lea.hbm %s4858_s14, 16 }
0x368e   :  { %p3987_p7 = scmp.ne.s32.totalorder %s4858_s14, %s3986_s21  ;;  %p3990_p8 = scmp.lt.u32.totalorder %s3986_s21, %s4858_s14 }
0x3690   :  { %p3992_p9 = pnand %p3990_p8, %p3987_p7 }
0x3692   :  { %3995 = shalt.err (!%p3992_p9)
}
0x3693   :  { %2907 = dma.vmem_to_hbm [thread:$0]  %s2905_s7, 16, %s4858_s14, [#allocation23]  }
0x3694   :  { %4008 = dma.done.wait [#allocation7], 256  }
0x3695   :  { %4009 = vsyncadd [#allocation7], 4294967040 }
0x3696   :  { %4010 = dma.done.wait [#allocation23], 16  }
0x3697   :  { %4011 = vsyncadd [#allocation23], 4294967280 }
0x3698   :  { %2914 = vsyncpa [#allocation6], 1 }
0x3699   :  { %2915 = vsyncpa [#allocation11], 1 }
0x369a   :  { %2916 = vsyncpa [#allocation14], 1 }
0x369b   :  { %2917 = vsyncpa [#allocation17], 1 }
0x369c   :  { %2918 = vsyncpa [#allocation20], 1 }
0x369d   :  { %2919 = vsyncpa [#allocation7], 1 }
0x369e   :  { %2920 = vsyncpa [#allocation23], 1 }
0x369f   :  { %2921 = vsyncpa [#allocation8], 1 }

</bundles_post_ra>
